<compile_context>
chip_gen: v5e
topology: v5e:2x2
jax: 0.10.0
libtpu: 0.0.40
codegen_flags: <defaults>
</compile_context>

<pallas_src>
import functools

import numpy as np
import jax
import jax.numpy as jnp
from jax.experimental import pallas as pl
from jax.experimental.pallas import tpu as pltpu


# ----------------------------------------------------------------------------
# Parameter construction (deterministic; mirrors transition('lmu', N) +
# scipy.signal.cont2discrete(..., method='bilinear')).
# ----------------------------------------------------------------------------
def lmu_transition(N):
    Q = np.arange(N, dtype=np.float64)
    R = (2 * Q + 1)[:, None]
    j, i = np.meshgrid(Q, Q)              # i = row index, j = column index
    A = np.where(i < j, -1.0, (-1.0) ** (i - j + 1)) * R
    B = (-1.0) ** Q[:, None] * R          # (N, 1)
    return A, B


def cont2discrete_bilinear(A, B, dt=1.0):
    N = A.shape[0]
    I = np.eye(N)
    ima = I - 0.5 * dt * A
    Ad = np.linalg.solve(ima, I + 0.5 * dt * A)
    Bd = np.linalg.solve(ima, dt * B)
    return Ad, Bd


# TODO(synk): `eval_matrix` / reconstruct() (Legendre readout) is not part of the
# forward pass and is omitted here.


# ----------------------------------------------------------------------------
# Host-side precompute of the blocked-scan operators for a chunk of T steps
# (float64 for accuracy, cast once to f32):
#   M[j]              = B @ (A^T)^j                     (T, N)
#   U[s, k*N:(k+1)*N] = M[k-s]  if k >= s else 0        (T, T*N)   input injection
#   W[:, k*N:(k+1)*N] = (A^T)^(k+1)                     (N, T*N)   carry propagation
#   Un = U[:, -N:]  (T, N),  Wn = W[:, -N:] = (A^T)^T   (N, N)     end-of-chunk carry
# ----------------------------------------------------------------------------
def build_chunk_operators(A_d, B_d, T):
    A_d = np.asarray(A_d, dtype=np.float64)
    B_d = np.asarray(B_d, dtype=np.float64).reshape(-1)
    N = A_d.shape[0]
    At = A_d.T

    powers = np.empty((T + 1, N, N), dtype=np.float64)
    powers[0] = np.eye(N)
    for j in range(1, T + 1):
        powers[j] = powers[j - 1] @ At

    M = np.einsum("n,jnm->jm", B_d, powers[:T])                 # (T, N)
    W = powers[1:T + 1].transpose(1, 0, 2).reshape(N, T * N)    # (N, T*N)

    U3 = np.zeros((T, T, N), dtype=np.float64)
    for s in range(T):
        U3[s, s:, :] = M[: T - s]
    U = U3.reshape(T, T * N)                                    # (T, T*N)

    Un = U[:, -N:]                                              # (T, N)
    Wn = W[:, -N:]                                              # (N, N)
    return (U.astype(np.float32), W.astype(np.float32),
            np.ascontiguousarray(Un, dtype=np.float32),
            np.ascontiguousarray(Wn, dtype=np.float32))


# ----------------------------------------------------------------------------
# Pallas kernel: one grid step per group of C chunks (C*T timesteps).
# ----------------------------------------------------------------------------
def hippo_chunk_kernel(f_ref, u_ref, w_ref, un_ref, wn_ref, o_ref,
                       c_ref, carries_ref, *, bt, n_chunks,
                       mxu_precision, carry_precision):
    # f_ref       (C*Bt, T)    inputs; row c*Bt+b = chunk c, batch b (lanes = time)
    # u_ref       (T, T*N)     injection operator (resident across the grid)
    # w_ref       (N, T*N)     carry-propagation operator (resident)
    # un_ref      (T, N)       last-N columns of U  (carry injection)
    # wn_ref      (N, N)       last-N columns of W  = (A^T)^T (carry propagation)
    # o_ref       (C*Bt, T*N)  states of the C chunks, lanes = (t, n)
    # c_ref       (Bt, N)      persistent carry across grid steps (VMEM scratch)
    # carries_ref (C*Bt, N)    start-of-chunk carries, stacked (VMEM scratch)
    @pl.when(pl.program_id(0) == 0)
    def _():
        c_ref[...] = jnp.zeros_like(c_ref)

    # Tiny sequential carry chain in f32/HIGHEST.  This is the ONLY cross-chunk
    # dependency, so dropping precision on the big output matmuls below cannot
    # compound error over the sequence length.
    un = un_ref[...]
    wn = wn_ref[...]
    carry = c_ref[...]
    for c in range(n_chunks):                       # static trip count, unrolled
        lo = c * bt
        carries_ref[lo:lo + bt, :] = carry          # carry at the START of chunk c
        f_c = f_ref[lo:lo + bt, :]
        carry = (jnp.dot(carry, wn, preferred_element_type=jnp.float32,
                         precision=carry_precision)
                 + jnp.dot(f_c, un, preferred_element_type=jnp.float32,
                           precision=carry_precision))
    c_ref[...] = carry                              # carry into the next grid step

    # Two big MXU matmuls with M = C*Bt rows (outputs only; no feedback path).
    o_ref[...] = jnp.dot(f_ref[...], u_ref[...],
                         preferred_element_type=jnp.float32,
                         precision=mxu_precision).astype(o_ref.dtype)
    o_ref[...] += jnp.dot(carries_ref[...], w_ref[...],
                          preferred_element_type=jnp.float32,
                          precision=mxu_precision).astype(o_ref.dtype)


# ----------------------------------------------------------------------------
# Module-like wrapper.
# ----------------------------------------------------------------------------
class HiPPOLegTPallas:
    """HiPPO-LegT forward on TPU: inputs (L, Bt) f32 -> states (L, Bt, N) f32."""

    def __init__(self, N, dt=1.0, chunk=128, chunks_per_step=16,
                 mxu_precision=jax.lax.Precision.DEFAULT,
                 carry_precision=jax.lax.Precision.HIGHEST):
        # chunks_per_step: 16 fills a 128-wide MXU at Bt=8 (v5e); 32 fills the
        # 256-wide MXU of v6e/v7x.
        self.N = N
        A_c, B_c = lmu_transition(N)
        A_d, B_d = cont2discrete_bilinear(A_c, B_c, dt=dt)
        self.A = A_d                      # (N, N) discretized
        self.B = B_d.squeeze(-1)          # (N,)   discretized
        self.chunk = chunk                # keep at 128 (review #10)
        self.chunks_per_step = chunks_per_step
        self.mxu_precision = mxu_precision
        self.carry_precision = carry_precision
        self._ops_cache = {}              # T -> (U, W, Un, Wn)

    def _operators(self, T):
        if T not in self._ops_cache:
            self._ops_cache[T] = build_chunk_operators(self.A, self.B, T)
        return self._ops_cache[T]

    def __call__(self, inputs):
        L, Bt = inputs.shape
        N = self.N
        T = self.chunk
        G = -(-L // T)                               # chunks needed
        C = max(1, min(self.chunks_per_step, G))     # chunks per grid step
        G_outer = -(-G // C)
        C = -(-G // G_outer)                         # rebalance to minimise padding
        G_total = G_outer * C
        L_pad = G_total * T
        CB = C * Bt

        U_np, W_np, Un_np, Wn_np = self._operators(T)
        U, W, Un, Wn = (jnp.asarray(a) for a in (U_np, W_np, Un_np, Wn_np))

        # (L, Bt) -> pad time -> (G_total*Bt, T): row = (chunk, batch), lane-dense
        # time columns.  Zero-padded tail chunks are computed then discarded
        # (the recurrence is causal), so no in-kernel masking is needed.
        x = jnp.asarray(inputs, jnp.float32)
        if L_pad != L:
            x = jnp.pad(x, ((0, L_pad - L), (0, 0)))
        x = x.reshape(G_total, T, Bt).transpose(0, 2, 1).reshape(G_total * Bt, T)

        kernel = functools.partial(
            hippo_chunk_kernel, bt=Bt, n_chunks=C,
            mxu_precision=self.mxu_precision,
            carry_precision=self.carry_precision)

        # VMEM budget (reviews #5-#7): double-buffered blocks + resident U/W +
        # one dot intermediate, with headroom; capped below v7x's 64 MiB physical.
        vmem_est = 4 * (2 * CB * T            # input blocks
                        + 2 * T * T * N       # U (double-buffered by default)
                        + 2 * N * T * N       # W
                        + 2 * (T * N + N * N)  # Un, Wn
                        + 2 * CB * T * N      # output blocks
                        + CB * T * N          # dot intermediate
                        + CB * N + Bt * N)    # scratch
        vmem_limit = int(min(max(2 * vmem_est, 32 << 20), 48 << 20))

        out_flat = pl.pallas_call(
            kernel,
            out_shape=jax.ShapeDtypeStruct((G_total * Bt, T * N), jnp.float32),
            grid_spec=pltpu.PrefetchScalarGridSpec(
                num_scalar_prefetch=0,
                grid=(G_outer,),
                in_specs=[
                    pl.BlockSpec((CB, T), lambda g: (g, 0)),       # f block
                    pl.BlockSpec((T, T * N), lambda g: (0, 0)),    # U (resident)
                    pl.BlockSpec((N, T * N), lambda g: (0, 0)),    # W (resident)
                    pl.BlockSpec((T, N), lambda g: (0, 0)),        # Un (resident)
                    pl.BlockSpec((N, N), lambda g: (0, 0)),        # Wn (resident)
                ],
                out_specs=pl.BlockSpec((CB, T * N), lambda g: (g, 0)),
                scratch_shapes=[pltpu.VMEM((Bt, N), jnp.float32),
                                pltpu.VMEM((CB, N), jnp.float32)],
            ),
            compiler_params=pltpu.CompilerParams(
                dimension_semantics=("arbitrary",),   # sequential carry over groups
                vmem_limit_bytes=vmem_limit),
        )(x, U, W, Un, Wn)

        # (G_total*Bt, T*N) -> (L, Bt, N): wrapper-side layout plumbing only.
        # TODO(synk): review #4 — emit (L_pad, Bt*N) directly from the kernel to
        # avoid this extra HBM round trip on the output.
        out = out_flat.reshape(G_total, Bt, T, N).transpose(0, 2, 1, 3)
        out = out.reshape(L_pad, Bt, N)
        return out[:L]


# ----------------------------------------------------------------------------
# Pure-JAX reference (mirrors the PyTorch loop) for correctness checks.
# ----------------------------------------------------------------------------
def hippo_ref(inputs, A, B):
    Bt = inputs.shape[1]
    N = A.shape[0]
    A = jnp.asarray(A, jnp.float32)
    B = jnp.asarray(B, jnp.float32)

    def step(c, f):
        c = jnp.dot(c, A.T, precision=jax.lax.Precision.HIGHEST) \
            + f[:, None] * B[None, :]
        return c, c

    c0 = jnp.zeros((Bt, N), jnp.float32)
    _, cs = jax.lax.scan(step, c0, inputs.astype(jnp.float32))
    return cs


if __name__ == "__main__":
    N = 32          # HiPPO state size
    L = 200         # sequence length (deliberately not a multiple of the chunk)
    Bt = 8          # batch
    dt = 1.0 / L    # standard HiPPO-LegT usage: unit interval split into L steps

    key = jax.random.PRNGKey(0)
    x = jax.random.normal(key, (L, Bt), dtype=jnp.float32)

    # Perf configuration (review #1): DEFAULT precision on the big output
    # matmuls, f32/HIGHEST only on the tiny non-compounding carry chain.
    hippo_fast = HiPPOLegTPallas(N, dt=dt)
    out_fast = jax.block_until_ready(hippo_fast(x))
    assert out_fast.shape == (L, Bt, N)

    # Exact configuration: HIGHEST everywhere, validated at tight tolerance.
    hippo_exact = HiPPOLegTPallas(N, dt=dt,
                                  mxu_precision=jax.lax.Precision.HIGHEST)
    out_exact = jax.block_until_ready(hippo_exact(x))

    ref = jax.block_until_ready(hippo_ref(x, hippo_fast.A, hippo_fast.B))

    np.testing.assert_allclose(np.asarray(out_exact), np.asarray(ref),
                               rtol=2e-3, atol=2e-3)
    # DEFAULT precision may demote the emitted-state matmuls to bf16 passes on
    # the MXU; the carry chain stays f32 so the error does NOT grow with L —
    # tolerances below are sized for bf16-level rounding of the outputs.
    np.testing.assert_allclose(np.asarray(out_fast), np.asarray(ref),
                               rtol=2e-2, atol=5e-2)

    print("KERNEL_OK")
</pallas_src>

<mosaic_0001>
module attributes {stable_mosaic.version = 11 : i64} {
  func.func @hippo_chunk_kernel(%arg0: i32, %arg1: memref<16x128xf32, #tpu.memory_space<vmem>>, %arg2: memref<128x4096xf32, #tpu.memory_space<vmem>>, %arg3: memref<32x4096xf32, #tpu.memory_space<vmem>>, %arg4: memref<128x32xf32, #tpu.memory_space<vmem>>, %arg5: memref<32x32xf32, #tpu.memory_space<vmem>>, %arg6: memref<16x4096xf32, #tpu.memory_space<vmem>>, %arg7: memref<8x32xf32, #tpu.memory_space<vmem>>, %arg8: memref<16x32xf32, #tpu.memory_space<vmem>>) attributes {dimension_semantics = [#tpu.dimension_semantics<arbitrary>], iteration_bounds = array<i64: 1>, scalar_prefetch = 0 : i64, scratch_operands = 2 : i64, tpu.core_type = #tpu.core_type<tc>, window_params = [{transform_indices = @transform_0, window_bounds = array<i64: 16, 128>}, {pipeline_mode = #tpu.pipeline_mode<synchronous>, transform_indices = @transform_1, window_bounds = array<i64: 128, 4096>}, {pipeline_mode = #tpu.pipeline_mode<synchronous>, transform_indices = @transform_2, window_bounds = array<i64: 32, 4096>}, {pipeline_mode = #tpu.pipeline_mode<synchronous>, transform_indices = @transform_3, window_bounds = array<i64: 128, 32>}, {pipeline_mode = #tpu.pipeline_mode<synchronous>, transform_indices = @transform_4, window_bounds = array<i64: 32, 32>}, {transform_indices = @transform_5, window_bounds = array<i64: 16, 4096>}]} {
    %c0_i32 = arith.constant 0 : i32
    %0 = arith.cmpi eq, %arg0, %c0_i32 : i32
    %1 = arith.extui %0 : i1 to i32
    %c0_i32_0 = arith.constant 0 : i32
    %2 = arith.cmpi ne, %1, %c0_i32_0 : i32
    scf.if %2 {
      %cst_34 = arith.constant 0.000000e+00 : f32
      %27 = vector.broadcast %cst_34 : f32 to vector<8x32xf32>
      %c0_35 = arith.constant 0 : index
      %c0_36 = arith.constant 0 : index
      %28 = vector.load %arg7[%c0_35, %c0_36] : memref<8x32xf32, #tpu.memory_space<vmem>>, vector<8x32xf32>
      tpu.vector_store %arg7[%c0_35, %c0_36], %27 {strides = array<i32>} : memref<8x32xf32, #tpu.memory_space<vmem>>, vector<8x32xf32>,
    } else {
    }
    %c0 = arith.constant 0 : index
    %c0_1 = arith.constant 0 : index
    %3 = vector.load %arg4[%c0, %c0_1] : memref<128x32xf32, #tpu.memory_space<vmem>>, vector<128x32xf32>
    %c0_2 = arith.constant 0 : index
    %c0_3 = arith.constant 0 : index
    %4 = vector.load %arg5[%c0_2, %c0_3] : memref<32x32xf32, #tpu.memory_space<vmem>>, vector<32x32xf32>
    %c0_4 = arith.constant 0 : index
    %c0_5 = arith.constant 0 : index
    %5 = vector.load %arg7[%c0_4, %c0_5] : memref<8x32xf32, #tpu.memory_space<vmem>>, vector<8x32xf32>
    %c0_6 = arith.constant 0 : index
    %c0_7 = arith.constant 0 : index
    %6 = vector.load %arg8[%c0_6, %c0_7] : memref<16x32xf32, #tpu.memory_space<vmem>>, vector<8x32xf32>
    tpu.vector_store %arg8[%c0_6, %c0_7], %5 {strides = array<i32>} : memref<16x32xf32, #tpu.memory_space<vmem>>, vector<8x32xf32>,
    %c0_8 = arith.constant 0 : index
    %c0_9 = arith.constant 0 : index
    %7 = vector.load %arg1[%c0_8, %c0_9] : memref<16x128xf32, #tpu.memory_space<vmem>>, vector<8x128xf32>
    %cst = arith.constant dense<0.000000e+00> : vector<8x32xf32>
    %8 = tpu.matmul %5, %4, %cst {dimension_numbers = #tpu.dot_dimension_numbers<[1], [0], [0], [1], [0, 0, 1, 1], [], []>, precision = #tpu.contract_precision<fp32>} : vector<8x32xf32>, vector<32x32xf32>, vector<8x32xf32> -> vector<8x32xf32>
    %cst_10 = arith.constant dense<0.000000e+00> : vector<8x32xf32>
    %9 = tpu.matmul %7, %3, %cst_10 {dimension_numbers = #tpu.dot_dimension_numbers<[1], [0], [0], [1], [0, 0, 1, 1], [], []>, precision = #tpu.contract_precision<fp32>} : vector<8x128xf32>, vector<128x32xf32>, vector<8x32xf32> -> vector<8x32xf32>
    %10 = arith.addf %8, %9 : vector<8x32xf32>
    %c8 = arith.constant 8 : index
    %c0_11 = arith.constant 0 : index
    %11 = vector.load %arg8[%c8, %c0_11] : memref<16x32xf32, #tpu.memory_space<vmem>>, vector<8x32xf32>
    tpu.vector_store %arg8[%c8, %c0_11], %10 {strides = array<i32>} : memref<16x32xf32, #tpu.memory_space<vmem>>, vector<8x32xf32>,
    %c8_12 = arith.constant 8 : index
    %c0_13 = arith.constant 0 : index
    %12 = vector.load %arg1[%c8_12, %c0_13] : memref<16x128xf32, #tpu.memory_space<vmem>>, vector<8x128xf32>
    %cst_14 = arith.constant dense<0.000000e+00> : vector<8x32xf32>
    %13 = tpu.matmul %10, %4, %cst_14 {dimension_numbers = #tpu.dot_dimension_numbers<[1], [0], [0], [1], [0, 0, 1, 1], [], []>, precision = #tpu.contract_precision<fp32>} : vector<8x32xf32>, vector<32x32xf32>, vector<8x32xf32> -> vector<8x32xf32>
    %cst_15 = arith.constant dense<0.000000e+00> : vector<8x32xf32>
    %14 = tpu.matmul %12, %3, %cst_15 {dimension_numbers = #tpu.dot_dimension_numbers<[1], [0], [0], [1], [0, 0, 1, 1], [], []>, precision = #tpu.contract_precision<fp32>} : vector<8x128xf32>, vector<128x32xf32>, vector<8x32xf32> -> vector<8x32xf32>
    %15 = arith.addf %13, %14 : vector<8x32xf32>
    %c0_16 = arith.constant 0 : index
    %c0_17 = arith.constant 0 : index
    %16 = vector.load %arg7[%c0_16, %c0_17] : memref<8x32xf32, #tpu.memory_space<vmem>>, vector<8x32xf32>
    tpu.vector_store %arg7[%c0_16, %c0_17], %15 {strides = array<i32>} : memref<8x32xf32, #tpu.memory_space<vmem>>, vector<8x32xf32>,
    %c0_18 = arith.constant 0 : index
    %c0_19 = arith.constant 0 : index
    %17 = vector.load %arg1[%c0_18, %c0_19] : memref<16x128xf32, #tpu.memory_space<vmem>>, vector<16x128xf32>
    %c0_20 = arith.constant 0 : index
    %c0_21 = arith.constant 0 : index
    %18 = vector.load %arg2[%c0_20, %c0_21] : memref<128x4096xf32, #tpu.memory_space<vmem>>, vector<128x4096xf32>
    %cst_22 = arith.constant dense<0.000000e+00> : vector<16x4096xf32>
    %19 = tpu.matmul %17, %18, %cst_22 {dimension_numbers = #tpu.dot_dimension_numbers<[1], [0], [0], [1], [0, 0, 1, 1], [], []>} : vector<16x128xf32>, vector<128x4096xf32>, vector<16x4096xf32> -> vector<16x4096xf32>
    %c0_23 = arith.constant 0 : index
    %c0_24 = arith.constant 0 : index
    %20 = vector.load %arg6[%c0_23, %c0_24] : memref<16x4096xf32, #tpu.memory_space<vmem>>, vector<16x4096xf32>
    tpu.vector_store %arg6[%c0_23, %c0_24], %19 {strides = array<i32>} : memref<16x4096xf32, #tpu.memory_space<vmem>>, vector<16x4096xf32>,
    %c0_25 = arith.constant 0 : index
    %c0_26 = arith.constant 0 : index
    %21 = vector.load %arg6[%c0_25, %c0_26] : memref<16x4096xf32, #tpu.memory_space<vmem>>, vector<16x4096xf32>
    %c0_27 = arith.constant 0 : index
    %c0_28 = arith.constant 0 : index
    %22 = vector.load %arg8[%c0_27, %c0_28] : memref<16x32xf32, #tpu.memory_space<vmem>>, vector<16x32xf32>
    %c0_29 = arith.constant 0 : index
    %c0_30 = arith.constant 0 : index
    %23 = vector.load %arg3[%c0_29, %c0_30] : memref<32x4096xf32, #tpu.memory_space<vmem>>, vector<32x4096xf32>
    %cst_31 = arith.constant dense<0.000000e+00> : vector<16x4096xf32>
    %24 = tpu.matmul %22, %23, %cst_31 {dimension_numbers = #tpu.dot_dimension_numbers<[1], [0], [0], [1], [0, 0, 1, 1], [], []>} : vector<16x32xf32>, vector<32x4096xf32>, vector<16x4096xf32> -> vector<16x4096xf32>
    %25 = arith.addf %21, %24 : vector<16x4096xf32>
    %c0_32 = arith.constant 0 : index
    %c0_33 = arith.constant 0 : index
    %26 = vector.load %arg6[%c0_32, %c0_33] : memref<16x4096xf32, #tpu.memory_space<vmem>>, vector<16x4096xf32>
    tpu.vector_store %arg6[%c0_32, %c0_33], %25 {strides = array<i32>} : memref<16x4096xf32, #tpu.memory_space<vmem>>, vector<16x4096xf32>,
    return
  }
  func.func @transform_0(%arg0: i32) -> (i32, i32) {
    %c0_i32 = arith.constant 0 : i32
    %c0_i32_0 = arith.constant 0 : i32
    return %arg0, %c0_i32 : i32, i32
  }
  func.func @transform_1(%arg0: i32) -> (i32, i32) {
    %c0_i32 = arith.constant 0 : i32
    %c0_i32_0 = arith.constant 0 : i32
    %c0_i32_1 = arith.constant 0 : i32
    return %c0_i32, %c0_i32_0 : i32, i32
  }
  func.func @transform_2(%arg0: i32) -> (i32, i32) {
    %c0_i32 = arith.constant 0 : i32
    %c0_i32_0 = arith.constant 0 : i32
    %c0_i32_1 = arith.constant 0 : i32
    return %c0_i32, %c0_i32_0 : i32, i32
  }
  func.func @transform_3(%arg0: i32) -> (i32, i32) {
    %c0_i32 = arith.constant 0 : i32
    %c0_i32_0 = arith.constant 0 : i32
    %c0_i32_1 = arith.constant 0 : i32
    return %c0_i32, %c0_i32_0 : i32, i32
  }
  func.func @transform_4(%arg0: i32) -> (i32, i32) {
    %c0_i32 = arith.constant 0 : i32
    %c0_i32_0 = arith.constant 0 : i32
    %c0_i32_1 = arith.constant 0 : i32
    return %c0_i32, %c0_i32_0 : i32, i32
  }
  func.func @transform_5(%arg0: i32) -> (i32, i32) {
    %c0_i32 = arith.constant 0 : i32
    %c0_i32_0 = arith.constant 0 : i32
    return %arg0, %c0_i32 : i32, i32
  }
}

</mosaic_0001>

<bundles_post_ra>
// kernel: tpu_custom_call.1
= control target key start
LH: loop header
LB: loop body
LE: loop exit
PB: predicated region body
PF: predicated region fallthrough
CT: control target
= control target key end

     0   :  { %10 = vsyncpa [#allocation5], 0  ;;  %s4806_s0 = inlined_call_operand.hbm [shape: f32[16,128], index: 0, kind: input, shape index: {}]   ;;  %s4807_s1 = inlined_call_operand.hbm [shape: f32[128,4096], index: 1, kind: input, shape index: {}]   ;;  %s4808_s2 = inlined_call_operand.hbm [shape: f32[32,4096], index: 2, kind: input, shape index: {}]   ;;  %s4809_s3 = inlined_call_operand.vmem [shape: f32[128,32], index: 3, kind: input, shape index: {}]   ;;  %s4810_s4 = inlined_call_operand.hbm [shape: f32[32,32], index: 4, kind: input, shape index: {}]   ;;  %s4811_s5 = inlined_call_operand.hbm [shape: f32[16,4096], index: 5, kind: output, shape index: {}]  }
   0x1   :  { %11 = vsyncpa [#allocation8], 0 }
   0x2   :  { %12 = vsyncpa [#allocation11], 0  ;;  %s31_s20 = sshll.u32 %s4807_s1, 4  ;;  %s32_s20 = int_to_ptr.hbm [resolvable:$true] %s31_s20 }
   0x3   :  { %13 = vsyncpa [#allocation6], 0  ;;  %s3782_s21 = smov [#allocation7]   ;;  %s18_s25 = sshll.u32 %s4806_s0, 4  ;;  %s19_s25 = int_to_ptr.hbm [resolvable:$true] %s18_s25 }
   0x4   :  { %s33_s22 = sshll.u32 %s3782_s21, 4  ;;  %s3783_s26 = smov 4096   ;;  %s34_s22 = int_to_ptr.vmem [resolvable:$true] %s33_s22 }
   0x5   :  { %s3784_s27 = smov 256   ;;  %s3785_s28 = smov [#allocation4]  }
   0x6   :  { %39 = dma.hbm_to_vmem [thread:$0]  %s32_s20, 65536, %s34_s22, [#allocation8], %s3783_s26, %s3783_s26, %s3784_s27  }
   0x7   :  { %s20_s29 = sshll.u32 %s3785_s28, 4  ;;  %s3786_s1 = smov 128   ;;  %s21_s29 = int_to_ptr.vmem [resolvable:$true] %s20_s29 }
   0x8   :  { %s3787_s30 = smov 8   ;;  %s44_s8 = sshll.u32 %s4808_s2, 4  ;;  %s45_s8 = int_to_ptr.hbm [resolvable:$true] %s44_s8 }
   0x9   :  { %26 = dma.hbm_to_vmem [thread:$0]  %s19_s25, 256, %s21_s29, [#allocation5], %s3786_s1, %s3786_s1, %s3787_s30  }
   0xa   :  { %s3788_s9 = smov [#allocation9]   ;;  %s59_s12 = sshll.u32 %s4810_s4, 4  ;;  %s60_s12 = int_to_ptr.hbm [resolvable:$true] %s59_s12 }
   0xb   :  { %s46_s0 = sshll.u32 %s3788_s9, 4  ;;  %s3789_s13 = smov [#allocation10]   ;;  %s47_s0 = int_to_ptr.vmem [resolvable:$true] %s46_s0 }
   0xc   :  { %52 = dma.hbm_to_vmem [thread:$0]  %s45_s8, 16384, %s47_s0, [#allocation8], %s3783_s26, %s3783_s26, %s3784_s27  }
   0xd   :  { %s61_s14 = sshll.u32 %s3789_s13, 4  ;;  %s62_s14 = int_to_ptr.vmem [resolvable:$true] %s61_s14 }
   0xe   :  { %67 = dma.hbm_to_vmem [thread:$0]  %s60_s12, 512, %s62_s14, [#allocation11], %s3786_s1, %s3786_s1, %s3787_s30  }
   0xf   :  { %3774 = dma.done.wait [#allocation5], 256  }
  0x10   :  { %3775 = vsyncadd [#allocation5], 4294967040 }
  0x11   :  { %3776 = dma.done.wait [#allocation8], 81920  }
  0x12   :  { %3777 = vsyncadd [#allocation8], 4294885376 }
  0x13   :  { %3778 = dma.done.wait [#allocation11], 512  }
  0x14   :  { %3779 = vsyncadd [#allocation11], 4294966784  ;;  %v105_v0 = vld [vmem:[%s4809_s3 + $0x78] sm:$0xff]  ;;  %v104_v1 = vld [vmem:[%s4809_s3 + $0x70] sm:$0xff]  ;;  %vm88_vm0 = vcmask 261120   ;;  %v3790_v23 = vmov 0.0  }
  0x15   :  { %v103_v2 = vld [vmem:[%s4809_s3 + $0x68] sm:$0xff]  ;;  %v3849_v3 = vand.u32 4294901760, %v105_v0  ;;  %v3851_v4 = vand.u32 4294901760, %v104_v1  ;;  %v102_v6 = vld [vmem:[%s4809_s3 + $0x60] sm:$0xff]  ;;  %v101_v7 = vld [vmem:[%s4809_s3 + $0x58] sm:$0xff]  ;;  %89 = vst.msk [vmem:[#allocation2] sm:$0xff] %vm88_vm0, %v3790_v23 }
  0x16   :  { %v3853_v5 = vand.u32 4294901760, %v103_v2  ;;  %v100_v8 = vld [vmem:[%s4809_s3 + $0x50] sm:$0xff]  ;;  %v3864_v9 = vand.u32 4294901760, %v102_v6  ;;  %v3866_v10 = vand.u32 4294901760, %v101_v7  ;;  %v99_v12 = vld [vmem:[%s4809_s3 + $0x48] sm:$0xff]  ;;  %v98_v13 = vld [vmem:[%s4809_s3 + $0x40] sm:$0xff] }
  0x17   :  { %v3868_v11 = vand.u32 4294901760, %v100_v8  ;;  %115 = vmatpush.msra.mxu0 %v3849_v3  ;;  %311 = vmatpush.msra.mxu3 %v3849_v3  ;;  %v3879_v14 = vsub.f32 %v105_v0, %v3849_v3  ;;  %v3882_v15 = vsub.f32 %v104_v1, %v3851_v4  ;;  %v3887_v17 = vand.u32 4294901760, %v99_v12  ;;  %v97_v22 = vld [vmem:[%s4809_s3 + $0x38] sm:$0xff]  ;;  %v96_v30 = vld [vmem:[%s4809_s3 + $0x30] sm:$0xff]  ;;  %v95_v37 = vld [vmem:[%s4809_s3 + $0x28] sm:$0xff]  ;;  %s3559_s21 = sshll.u32 %s4811_s5, 4  ;;  %s3560_s21 = int_to_ptr.hbm [resolvable:$true] %s3559_s21 }
  0x18   :  { %v3885_v16 = vsub.f32 %v103_v2, %v3853_v5  ;;  %v3890_v18 = vsub.f32 %v102_v6, %v3864_v9  ;;  %v3893_v19 = vsub.f32 %v101_v7, %v3866_v10  ;;  %v3898_v21 = vand.u32 4294901760, %v98_v13  ;;  %v94_v43 = vld [vmem:[%s4809_s3 + $0x20] sm:$0xff]  ;;  %v93_v54 = vld [vmem:[%s4809_s3 + $0x18] sm:$0xff]  ;;  %v92_v60 = vld [vmem:[%s4809_s3 + $0x10] sm:$0xff] }
  0x19   :  { %4842 = vst [vmem:[#allocation17_spill] sm:$0xff] %v3879_v14  ;;  %v3896_v20 = vsub.f32 %v100_v8, %v3868_v11  ;;  %117 = vmatpush.msra.mxu0 %v3851_v4  ;;  %258 = vmatpush.msra.mxu2 %v3879_v14  ;;  %v3907_v24 = vand.u32 4294901760, %v3879_v14  ;;  %v3910_v25 = vand.u32 4294901760, %v3882_v15  ;;  %v3920_v28 = vsub.f32 %v99_v12, %v3887_v17  ;;  %v109_v55 = vld [vmem:[#allocation10 + $0x18] sm:$0xff]  ;;  %v108_v61 = vld [vmem:[#allocation10 + $0x10] sm:$0xff]  ;;  %v91_v6 = vld [vmem:[%s4809_s3 + $0x8] sm:$0xff] }
  0x1a   :  { %4843 = vst [vmem:[#allocation18_spill] sm:$0xff] %v3882_v15  ;;  %v3913_v26 = vand.u32 4294901760, %v3885_v16  ;;  %313 = vmatpush.msra.mxu3 %v3851_v4  ;;  %v3917_v27 = vand.u32 4294901760, %v3890_v18  ;;  %v3923_v29 = vand.u32 4294901760, %v3893_v19  ;;  %v3936_v34 = vand.u32 4294901760, %v97_v22  ;;  %v107_v8 = vld [vmem:[#allocation10 + $0x8] sm:$0xff] }
  0x1b   :  { %4844 = vst [vmem:[#allocation19_spill] sm:$0xff] %v3885_v16  ;;  %119 = vmatpush.msra.mxu0 %v3853_v5  ;;  %261 = vmatpush.msra.mxu2 %v3882_v15  ;;  %v158_v31 = vsub.f32 %v3879_v14, %v3907_v24  ;;  %v164_v32 = vsub.f32 %v3882_v15, %v3910_v25  ;;  %v3943_v36 = vand.u32 4294901760, %v3896_v20  ;;  %v3956_v41 = vand.u32 4294901760, %v96_v30 }
  0x1c   :  { %4845 = vst [vmem:[#allocation20_spill] sm:$0xff] %v3890_v18  ;;  %v170_v33 = vsub.f32 %v3885_v16, %v3913_v26  ;;  %315 = vmatpush.msra.mxu3 %v3853_v5  ;;  %v3940_v35 = vsub.f32 %v98_v13, %v3898_v21  ;;  %v176_v40 = vsub.f32 %v3890_v18, %v3917_v27  ;;  %v3971_v46 = vand.u32 4294901760, %v95_v37  ;;  %v3976_v48 = vld [vmem:[#allocation2] sm:$0xff] }
  0x1d   :  { %4846 = vst [vmem:[#allocation21_spill] sm:$0xff] %v3893_v19  ;;  %121 = vmatpush.msra.mxu0 %v3864_v9  ;;  %264 = vmatpush.msra.mxu2 %v3885_v16  ;;  %v3950_v38 = vand.u32 4294901760, %v158_v31  ;;  %v3952_v39 = vand.u32 4294901760, %v164_v32  ;;  %v182_v42 = vsub.f32 %v3893_v19, %v3923_v29  ;;  %v3969_v45 = vsub.f32 %v97_v22, %v3936_v34  ;;  %v106_v32 = vld [vmem:[#allocation10] sm:$0xff] }
  0x1e   :  { %4847 = vst [vmem:[#allocation22_spill] sm:$0xff] %v3896_v20  ;;  %317 = vmatpush.msra.mxu3 %v3864_v9  ;;  %v3966_v44 = vand.u32 4294901760, %v170_v33  ;;  %v3974_v47 = vand.u32 4294901760, %v3920_v28  ;;  %v188_v49 = vsub.f32 %v3896_v20, %v3943_v36  ;;  %v3986_v50 = vand.u32 4294901760, %v176_v40  ;;  %v90_v40 = vld [vmem:[%s4809_s3] sm:$0xff]  ;;  %s3791_s3 = smov [#allocation12]  }
  0x1f   :  { %4848 = vst [vmem:[#allocation23_spill] sm:$0xff] %v3907_v24  ;;  %123 = vmatpush.msra.mxu0 %v3866_v10  ;;  %160 = vmatpush.msra.mxu1 %v3950_v38  ;;  %v3989_v51 = vsub.f32 %v96_v30, %v3956_v41  ;;  %v3991_v52 = vand.u32 4294901760, %v94_v43  ;;  %v3994_v53 = vand.u32 4294901760, %v3940_v35  ;;  %v4003_v56 = vand.u32 4294901760, %v182_v42  ;;  %s3557_s18 = sshll.u32 %s3791_s3, 4  ;;  %s3558_s18 = int_to_ptr.vmem [resolvable:$true] %s3557_s18 }
  0x20   :  { %4849 = vst [vmem:[#allocation24_spill] sm:$0xff] %v3920_v28  ;;  %267 = vmatpush.msra.mxu2 %v3890_v18  ;;  %319 = vmatpush.msra.mxu3 %v3866_v10  ;;  %v194_v57 = vsub.f32 %v3920_v28, %v3974_v47  ;;  %v4008_v58 = vsub.f32 %v95_v37, %v3971_v46  ;;  %v4011_v59 = vand.u32 4294901760, %v3969_v45  ;;  %v4018_v62 = vand.u32 4294901760, %v188_v49 }
  0x21   :  { %4850 = vst [vmem:[#allocation25_spill] sm:$0xff] %v3940_v35  ;;  %125 = vmatpush.msra.mxu0 %v3868_v11  ;;  %166 = vmatpush.msra.mxu1 %v3952_v39  ;;  %v4020_v63 = vand.u32 4294901760, %v93_v54  ;;  %v200_v0 = vsub.f32 %v3940_v35, %v3994_v53  ;;  %v4027_v1 = vsub.f32 %v94_v43, %v3991_v52  ;;  %v4030_v2 = vand.u32 4294901760, %v3989_v51 }
  0x22   :  { %4851 = vst [vmem:[#allocation26_spill] sm:$0xff] %v3969_v45  ;;  %270 = vmatpush.msra.mxu2 %v3893_v19  ;;  %321 = vmatpush.msra.mxu3 %v3868_v11  ;;  %v4035_v7 = vand.u32 4294901760, %v109_v55  ;;  %v4039_v12 = vand.u32 4294901760, %v92_v60  ;;  %v4041_v13 = vand.u32 4294901760, %v108_v61  ;;  %v4045_v22 = vand.u32 4294901760, %v194_v57 }
  0x23   :  { %112 = vst.msk [vmem:[#allocation3] sm:$0xff] %vm88_vm0, %v3976_v48  ;;  %127 = vmatpush.msra.mxu0 %v3887_v17  ;;  %172 = vmatpush.msra.mxu1 %v3966_v44  ;;  %v206_v23 = vsub.f32 %v3969_v45, %v4011_v59  ;;  %v4050_v30 = vand.u32 4294901760, %v4008_v58  ;;  %v4058_v33 = vsub.f32 %v93_v54, %v4020_v63  ;;  %v4060_v37 = vand.u32 4294901760, %v91_v6 }
  0x24   :  { %4852 = vst [vmem:[#allocation27_spill] sm:$0xff] %v3989_v51  ;;  %273 = vmatpush.msra.mxu2 %v3896_v20  ;;  %323 = vmatpush.msra.mxu3 %v3887_v17  ;;  %v4053_v31 = vsub.f32 %v109_v55, %v4035_v7  ;;  %v4065_v42 = vand.u32 4294901760, %v107_v8  ;;  %v4069_v43 = vand.u32 4294901760, %v200_v0  ;;  %v212_v49 = vsub.f32 %v3989_v51, %v4030_v2 }
  0x25   :  { %4853 = vst [vmem:[#allocation28_spill] sm:$0xff] %v4008_v58  ;;  %129 = vmatpush.msra.mxu0 %v3898_v21  ;;  %178 = vmatpush.msra.mxu1 %v3986_v50  ;;  %v4074_v54 = vand.u32 4294901760, %v4027_v1  ;;  %v4079_v55 = vsub.f32 %v92_v60, %v4039_v12  ;;  %v4082_v57 = vsub.f32 %v108_v61, %v4041_v13  ;;  %v4088_v0 = vand.u32 4294901760, %v206_v23 }
  0x26   :  { %4854 = vst [vmem:[#allocation29_spill] sm:$0xff] %v4020_v63  ;;  %276 = vmatpush.msra.mxu2 %v3920_v28  ;;  %325 = vmatpush.msra.mxu3 %v3898_v21  ;;  %v218_v28 = vsub.f32 %v4008_v58, %v4050_v30  ;;  %v4095_v20 = vand.u32 4294901760, %v4053_v31  ;;  %v4100_v60 = vsub.f32 %v91_v6, %v4060_v37  ;;  %v4103_v61 = vand.u32 4294901760, %v4058_v33 }
  0x27   :  { %4855 = vst [vmem:[#allocation30_spill] sm:$0xff] %v4027_v1  ;;  %131 = vmatpush.msra.mxu0 %v3936_v34  ;;  %184 = vmatpush.msra.mxu1 %v4003_v56  ;;  %v4106_v23 = vsub.f32 %v107_v8, %v4065_v42  ;;  %v4110_v19 = vand.u32 4294901760, %v212_v49  ;;  %v4117_v6 = vand.u32 4294901760, %v4082_v57  ;;  %v4120_v18 = vand.u32 4294901760, %v4079_v55  ;;  %v4122_v8 = vld [vmem:[#allocation4] sm:$0xff] }
  0x28   :  { %4856 = vst [vmem:[#allocation31_spill] sm:$0xff] %v4039_v12  ;;  %279 = vmatpush.msra.mxu2 %v3940_v35  ;;  %327 = vmatpush.msra.mxu3 %v3936_v34  ;;  %v4084_v35 = vand.u32 4294901760, %v106_v32  ;;  %v4129_v49 = vand.u32 4294901760, %v218_v28 }
  0x29   :  { %4857 = vst [vmem:[#allocation32_spill] sm:$0xff] %v4045_v22  ;;  %133 = vmatpush.msra.mxu0 %v3956_v41  ;;  %190 = vmatpush.msra.mxu1 %v4018_v62  ;;  %v236_v14 = vsub.f32 %v4079_v55, %v4120_v18 }
  0x2a   :  { %4858 = vst [vmem:[#allocation33_spill] sm:$0xff] %v4058_v33  ;;  %282 = vmatpush.msra.mxu2 %v3969_v45  ;;  %329 = vmatpush.msra.mxu3 %v3956_v41  ;;  %v4092_v45 = vand.u32 4294901760, %v90_v40  ;;  %v4125_v16 = vsub.f32 %v106_v32, %v4084_v35  ;;  %v230_v32 = vsub.f32 %v4058_v33, %v4103_v61 }
  0x2b   :  { %4859 = vst [vmem:[#allocation34_spill] sm:$0xff] %v4060_v37  ;;  %135 = vmatpush.msra.mxu0 %v3971_v46  ;;  %196 = vmatpush.msra.mxu1 %v4045_v22 }
  0x2c   :  { %4860 = vst [vmem:[#allocation35_spill] sm:$0xff] %v4069_v43  ;;  %285 = vmatpush.msra.mxu2 %v3989_v51  ;;  %331 = vmatpush.msra.mxu3 %v3971_v46  ;;  %v224_v51 = vsub.f32 %v4027_v1, %v4074_v54  ;;  %v4134_v15 = vsub.f32 %v90_v40, %v4092_v45  ;;  %v4151_v40 = vand.u32 4294901760, %v4122_v8  ;;  %v4160_v22 = vand.u32 4294901760, %v4125_v16 }
  0x2d   :  { %4861 = vst [vmem:[#allocation36_spill] sm:$0xff] %v4079_v55  ;;  %137 = vmatpush.msra.mxu0 %v3991_v52  ;;  %202 = vmatpush.msra.mxu1 %v4069_v43  ;;  %v4141_v43 = vand.u32 4294901760, %v4106_v23 }
  0x2e   :  { %4862 = vst [vmem:[#allocation37_spill] sm:$0xff] %v4088_v0  ;;  %288 = vmatpush.msra.mxu2 %v4008_v58  ;;  %333 = vmatpush.msra.mxu3 %v3991_v52  ;;  %v502_v58 = vsub.f32 %v4053_v31, %v4095_v20  ;;  %v4148_v28 = vand.u32 4294901760, %v224_v51  ;;  %v456_v51 = vsel %vm88_vm0, %v3976_v48, 0 }
  0x2f   :  { %4863 = vst [vmem:[#allocation38_spill] sm:$0xff] %v4100_v60  ;;  %139 = vmatpush.msra.mxu0 %v4020_v63  ;;  %208 = vmatpush.msra.mxu1 %v4088_v0  ;;  %v4144_v0 = vand.u32 4294901760, %v4100_v60 }
  0x30   :  { %4864 = vst [vmem:[#allocation39_spill] sm:$0xff] %v4110_v19  ;;  %291 = vmatpush.msra.mxu2 %v4027_v1  ;;  %335 = vmatpush.msra.mxu3 %v4020_v63  ;;  %v508_v1 = vsub.f32 %v4082_v57, %v4117_v6  ;;  %v514_v63 = vsub.f32 %v4106_v23, %v4141_v43 }
  0x31   :  { %4865 = vst [vmem:[#allocation40_spill] sm:$0xff] %v4122_v8  ;;  %141 = vmatpush.msra.mxu0 %v4039_v12  ;;  %214 = vmatpush.msra.mxu1 %v4110_v19  ;;  %v4166_v19 = vand.u32 4294901760, %v502_v58  ;;  %v242_v48 = vsub.f32 %v4100_v60, %v4144_v0  ;;  %v147_v58 = vsub.f32 %v4122_v8, %v4151_v40 }
  0x32   :  { %4866 = vst [vmem:[#allocation41_spill] sm:$0xff] %v4129_v49  ;;  %294 = vmatpush.msra.mxu2 %v4058_v33  ;;  %337 = vmatpush.msra.mxu3 %v4039_v12  ;;  %v4169_v33 = vand.u32 4294901760, %v4134_v15  ;;  %v4173_v12 = vand.u32 4294901760, %v230_v32  ;;  %v4187_v32 = vand.u32 4294901760, %v508_v1 }
  0x33   :  { %143 = vmatpush.msra.mxu0 %v4060_v37  ;;  %220 = vmatpush.msra.mxu1 %v4129_v49  ;;  %4867 = vst [vmem:[#allocation42_spill] sm:$0xff] %v4166_v19  ;;  %v4183_v49 = vand.u32 4294901760, %v456_v51  ;;  %v4201_v1 = vand.u32 4294901760, %v242_v48 }
  0x34   :  { %297 = vmatpush.msra.mxu2 %v4079_v55  ;;  %339 = vmatpush.msra.mxu3 %v4060_v37  ;;  %v4189_v55 = vand.u32 4294901760, %v236_v14  ;;  %v520_v37 = vsub.f32 %v4125_v16, %v4160_v22  ;;  %v248_v8 = vsub.f32 %v4134_v15, %v4169_v33  ;;  %v148_v14 = vand.u32 4294901760, %v147_v58 }
  0x35   :  { %145 = vmatpush.msra.mxu0 %v4092_v45  ;;  %226 = vmatpush.msra.mxu1 %v4148_v28 }
  0x36   :  { %300 = vmatpush.msra.mxu2 %v4100_v60  ;;  %341 = vmatpush.msra.mxu3 %v4092_v45  ;;  %v4199_v60 = vand.u32 4294901760, %v514_v63  ;;  %v4212_v63 = vand.u32 4294901760, %v248_v8  ;;  %v149_v48 = vsub.f32 %v147_v58, %v148_v14 }
  0x37   :  { %352 = vmatpush.msrb.mxu0 %v3907_v24  ;;  %232 = vmatpush.msra.mxu1 %v4173_v12  ;;  %v479_v24 = vsub.f32 %v456_v51, %v4183_v49 }
  0x38   :  { %504 = vmatpush.msrb.mxu3 %v4166_v19  ;;  %303 = vmatpush.msra.mxu2 %v4134_v15  ;;  %v4208_v19 = vand.u32 4294901760, %v520_v37 }
  0x39   :  { %356 = vmatpush.msrb.mxu0 %v3910_v25  ;;  %238 = vmatpush.msra.mxu1 %v4189_v55  ;;  %v480_v51 = vand.u32 4294901760, %v479_v24 }
  0x3a   :  { %471 = vmatpush.msrb.mxu2 %v4035_v7  ;;  %510 = vmatpush.msrb.mxu3 %v4187_v32 }
  0x3b   :  { %360 = vmatpush.msrb.mxu0 %v3913_v26  ;;  %244 = vmatpush.msra.mxu1 %v4201_v1  ;;  %v481_v37 = vsub.f32 %v479_v24, %v480_v51 }
  0x3c   :  { %473 = vmatpush.msrb.mxu2 %v4041_v13  ;;  %516 = vmatpush.msrb.mxu3 %v4199_v60 }
  0x3d   :  { %345 = vmatmul.f32.vlgmr.msra.gmra.mxu3 %v148_v14  ;;  %364 = vmatpush.msrb.mxu0 %v3917_v27  ;;  %v482_v8 = vand.u32 4294901760, %v481_v37  ;;  %v150_v37 = vand.u32 4294901760, %v149_v48  ;;  %v4876_v14 = vld [vmem:[#allocation39_spill] sm:$0xff]  ;;  %v4297_v48 = vld [vmem:[#allocation4 + $0x8] sm:$0xff] }
  0x3e   :  { %475 = vmatpush.msrb.mxu2 %v4065_v42  ;;  %522 = vmatpush.msrb.mxu3 %v4208_v19 }
  0x3f   :  { %250 = vmatpush.msra.mxu1 %v4212_v63  ;;  %306 = vmatmul.f32.vlgmr.msra.gmra.mxu2 %v147_v58  ;;  %v4875_v58 = vld [vmem:[#allocation37_spill] sm:$0xff] }
  0x40   :  { %571 = vmatpush.msra.mxu3 %v4035_v7  ;;  %368 = vmatpush.msrb.mxu0 %v3923_v29 }
  0x41   :  { %419 = vmatpush.msrb.mxu1 %v3849_v3  ;;  %477 = vmatpush.msrb.mxu2 %v4084_v35 }
  0x42   :  { %573 = vmatpush.msra.mxu3 %v4041_v13  ;;  %372 = vmatpush.msrb.mxu0 %v3943_v36 }
  0x43   :  { %542 = vmatpush.msra.mxu2 %v4053_v31  ;;  %421 = vmatpush.msrb.mxu1 %v3851_v4 }
  0x44   :  { %575 = vmatpush.msra.mxu3 %v4065_v42  ;;  %376 = vmatpush.msrb.mxu0 %v3974_v47 }
  0x45   :  { %545 = vmatpush.msra.mxu2 %v4082_v57  ;;  %423 = vmatpush.msrb.mxu1 %v3853_v5 }
  0x46   :  { %524 = vmatmul.f32.vlgmr.msrb.gmra.mxu3 %v4183_v49  ;;  %380 = vmatpush.msrb.mxu0 %v3994_v53 }
  0x47   :  { %548 = vmatpush.msra.mxu2 %v4106_v23  ;;  %577 = vmatpush.msra.mxu3 %v4084_v35 }
  0x48   :  { %425 = vmatpush.msrb.mxu1 %v3864_v9  ;;  %483 = vmatmul.f32.vlgmr.msrb.gmra.mxu2 %v482_v8  ;;  %v4878_v8 = vld [vmem:[#allocation19_spill] sm:$0xff] }
  0x49   :  { %631 = vmatpush.msrb.mxu3 %v4035_v7  ;;  %384 = vmatpush.msrb.mxu0 %v4011_v59 }
  0x4a   :  { %551 = vmatpush.msra.mxu2 %v4125_v16  ;;  %427 = vmatpush.msrb.mxu1 %v3866_v10 }
  0x4b   :  { %633 = vmatpush.msrb.mxu3 %v4041_v13  ;;  %388 = vmatpush.msrb.mxu0 %v4030_v2 }
  0x4c   :  { %600 = vmatpush.msrb.mxu2 %v4095_v20  ;;  %429 = vmatpush.msrb.mxu1 %v3868_v11 }
  0x4d   :  { %635 = vmatpush.msrb.mxu3 %v4065_v42  ;;  %392 = vmatpush.msrb.mxu0 %v4050_v30 }
  0x4e   :  { %604 = vmatpush.msrb.mxu2 %v4117_v6  ;;  %431 = vmatpush.msrb.mxu1 %v3887_v17 }
  0x4f   :  { %637 = vmatpush.msrb.mxu3 %v4084_v35  ;;  %396 = vmatpush.msrb.mxu0 %v4074_v54 }
  0x50   :  { %608 = vmatpush.msrb.mxu2 %v4141_v43  ;;  %581 = vmatmul.f32.vlgmr.msra.gmra.mxu3 %v480_v51  ;;  %v4877_v51 = vld [vmem:[#allocation41_spill] sm:$0xff] }
  0x51   :  { %691 = vmatpush.msra.mxu3 %v3950_v38  ;;  %433 = vmatpush.msrb.mxu1 %v3898_v21  ;;  %v4869_v38 = vld [vmem:[#allocation32_spill] sm:$0xff] }
  0x52   :  { %612 = vmatpush.msrb.mxu2 %v4160_v22  ;;  %151 = vmatmul.f32.vlgmr.msra.gmra.mxu0 %v150_v37 }
  0x53   :  { %252 = vmatmul.f32.vlgmr.msra.gmra.mxu1 %v4151_v40  ;;  %554 = vmatmul.f32.vlgmr.msra.gmra.mxu2 %v479_v24  ;;  %v4868_v24 = vld [vmem:[#allocation29_spill] sm:$0xff] }
  0x54   :  { %646 = vmatpush.msra.mxu2 %v3849_v3  ;;  %697 = vmatpush.msra.mxu3 %v3952_v39  ;;  %v4870_v39 = vld [vmem:[#allocation31_spill] sm:$0xff] }
  0x55   :  { %400 = vmatpush.msrb.mxu0 %v4103_v61  ;;  %435 = vmatpush.msrb.mxu1 %v3936_v34 }
  0x56   :  { %648 = vmatpush.msra.mxu2 %v3851_v4  ;;  %703 = vmatpush.msra.mxu3 %v3966_v44  ;;  %v4871_v44 = vld [vmem:[#allocation17_spill] sm:$0xff] }
  0x57   :  { %404 = vmatpush.msrb.mxu0 %v4120_v18  ;;  %437 = vmatpush.msrb.mxu1 %v3956_v41 }
  0x58   :  { %650 = vmatpush.msra.mxu2 %v3853_v5  ;;  %709 = vmatpush.msra.mxu3 %v3986_v50  ;;  %v4872_v50 = vld [vmem:[#allocation35_spill] sm:$0xff] }
  0x59   :  { %408 = vmatpush.msrb.mxu0 %v4144_v0  ;;  %439 = vmatpush.msrb.mxu1 %v3971_v46 }
  0x5a   :  { %652 = vmatpush.msra.mxu2 %v3864_v9  ;;  %715 = vmatpush.msra.mxu3 %v4003_v56  ;;  %v4873_v56 = vld [vmem:[#allocation34_spill] sm:$0xff] }
  0x5b   :  { %412 = vmatpush.msrb.mxu0 %v4169_v33  ;;  %441 = vmatpush.msrb.mxu1 %v3991_v52 }
  0x5c   :  { %414 = vmatmul.f32.vlgmr.msrb.gmra.mxu0 %v4151_v40  ;;  %654 = vmatpush.msra.mxu2 %v3866_v10 }
  0x5d   :  { %721 = vmatpush.msra.mxu3 %v4018_v62  ;;  %443 = vmatpush.msrb.mxu1 %v4868_v24  ;;  %v4874_v62 = vld [vmem:[#allocation18_spill] sm:$0xff] }
  0x5e   :  { %656 = vmatpush.msra.mxu2 %v3868_v11  ;;  %639 = vmatmul.f32.vlgmr.msrb.gmra.mxu3 %v4183_v49 }
  0x5f   :  { %727 = vmatpush.msra.mxu3 %v4869_v38  ;;  %445 = vmatpush.msrb.mxu1 %v4870_v39  ;;  %v4880_v38 = vld [vmem:[#allocation21_spill] sm:$0xff] }
  0x60   :  { %658 = vmatpush.msra.mxu2 %v3887_v17  ;;  %789 = vmatpush.msra.mxu0 %v4871_v44  ;;  %v4881_v44 = vld [vmem:[#allocation22_spill] sm:$0xff] }
  0x61   :  { %733 = vmatpush.msra.mxu3 %v4872_v50  ;;  %447 = vmatpush.msrb.mxu1 %v4873_v56  ;;  %v4882_v50 = vld [vmem:[#allocation24_spill] sm:$0xff] }
  0x62   :  { %660 = vmatpush.msra.mxu2 %v3898_v21  ;;  %792 = vmatpush.msra.mxu0 %v4874_v62  ;;  %v4883_v62 = vld [vmem:[#allocation25_spill] sm:$0xff] }
  0x63   :  { %739 = vmatpush.msra.mxu3 %v4875_v58  ;;  %449 = vmatpush.msrb.mxu1 %v4092_v45  ;;  %v4884_v58 = vld [vmem:[#allocation23_spill] sm:$0xff] }
  0x64   :  { %451 = vmatmul.f32.vlgmr.msrb.gmra.mxu1 %v4151_v40  ;;  %662 = vmatpush.msra.mxu2 %v3936_v34  ;;  %v4302_v40 = vand.u32 4294901760, %v4297_v48 }
  0x65   :  { %745 = vmatpush.msra.mxu3 %v4876_v14  ;;  %614 = vmatmul.f32.vlgmr.msrb.gmra.mxu2 %v4183_v49  ;;  %v4879_v49 = vld [vmem:[#allocation20_spill] sm:$0xff]  ;;  %v1663_v14 = vld [vmem:[#allocation7 + $0xf30] sm:$0xff] }
  0x66   :  { %664 = vmatpush.msra.mxu2 %v3956_v41  ;;  %842 = vmatpush.msra.mxu1 %v3849_v3  ;;  %v4310_v37 = vsub.f32 %v4297_v48, %v4302_v40 }
  0x67   :  { %751 = vmatpush.msra.mxu3 %v4877_v51  ;;  %795 = vmatpush.msra.mxu0 %v4878_v8  ;;  %v1632_v51 = vld [vmem:[#allocation7 + $0xe38] sm:$0xff]  ;;  %v1631_v8 = vld [vmem:[#allocation7 + $0xe30] sm:$0xff] }
  0x68   :  { %666 = vmatpush.msra.mxu2 %v3971_v46  ;;  %844 = vmatpush.msra.mxu1 %v3851_v4 }
  0x69   :  { %757 = vmatpush.msra.mxu3 %v4148_v28  ;;  %798 = vmatpush.msra.mxu0 %v4879_v49  ;;  %v679_v28 = vand.u32 4294901760, %v4310_v37  ;;  %v4893_v49 = vld [vmem:[#allocation40_spill] sm:$0xff] }
  0x6a   :  { %668 = vmatpush.msra.mxu2 %v3991_v52  ;;  %846 = vmatpush.msra.mxu1 %v3853_v5 }
  0x6b   :  { %763 = vmatpush.msra.mxu3 %v4173_v12  ;;  %801 = vmatpush.msra.mxu0 %v4880_v38  ;;  %v680_v12 = vsub.f32 %v4310_v37, %v679_v28  ;;  %v1568_v38 = vld [vmem:[#allocation7 + $0xc38] sm:$0xff] }
  0x6c   :  { %670 = vmatpush.msra.mxu2 %v4868_v24  ;;  %848 = vmatpush.msra.mxu1 %v3864_v9 }
  0x6d   :  { %769 = vmatpush.msra.mxu3 %v4189_v55  ;;  %804 = vmatpush.msra.mxu0 %v4881_v44  ;;  %v681_v55 = vand.u32 4294901760, %v680_v12  ;;  %v1536_v44 = vld [vmem:[#allocation7 + $0xb38] sm:$0xff]  ;;  %v1535_v12 = vld [vmem:[#allocation7 + $0xb30] sm:$0xff] }
  0x6e   :  { %672 = vmatpush.msra.mxu2 %v4870_v39  ;;  %850 = vmatpush.msra.mxu1 %v3866_v10 }
  0x6f   :  { %775 = vmatpush.msra.mxu3 %v4201_v1  ;;  %807 = vmatpush.msra.mxu0 %v4882_v50  ;;  %v4885_v1 = vld [vmem:[#allocation26_spill] sm:$0xff]  ;;  %v1504_v50 = vld [vmem:[#allocation7 + $0xa38] sm:$0xff] }
  0x70   :  { %674 = vmatpush.msra.mxu2 %v4873_v56  ;;  %852 = vmatpush.msra.mxu1 %v3868_v11 }
  0x71   :  { %781 = vmatpush.msra.mxu3 %v4212_v63  ;;  %810 = vmatpush.msra.mxu0 %v4883_v62  ;;  %v1211_v63 = vld [vmem:[#allocation7 + $0x110] sm:$0xff]  ;;  %v1472_v62 = vld [vmem:[#allocation7 + $0x938] sm:$0xff] }
  0x72   :  { %676 = vmatpush.msra.mxu2 %v4092_v45  ;;  %783 = vmatmul.f32.vlgmr.msra.gmra.mxu3 %v4302_v40 }
  0x73   :  { %950 = vmatpush.msrb.mxu3 %v3849_v3  ;;  %682 = vmatmul.f32.vlgmr.msra.gmra.mxu2 %v681_v55  ;;  %v4886_v3 = vld [vmem:[#allocation27_spill] sm:$0xff] }
  0x74   :  { %883 = vmatpush.msrb.mxu2 %v4884_v58  ;;  %854 = vmatpush.msra.mxu1 %v3887_v17  ;;  %v1503_v55 = vld [vmem:[#allocation7 + $0xa30] sm:$0xff] }
  0x75   :  { %952 = vmatpush.msrb.mxu3 %v3851_v4  ;;  %813 = vmatpush.msra.mxu0 %v4885_v1  ;;  %v4887_v4 = vld [vmem:[#allocation28_spill] sm:$0xff]  ;;  %v1471_v58 = vld [vmem:[#allocation7 + $0x930] sm:$0xff] }
  0x76   :  { %887 = vmatpush.msrb.mxu2 %v3910_v25  ;;  %856 = vmatpush.msra.mxu1 %v3898_v21  ;;  %v1628_v25 = vld [vmem:[#allocation7 + $0xe18] sm:$0xff] }
  0x77   :  { %954 = vmatpush.msrb.mxu3 %v3853_v5  ;;  %816 = vmatpush.msra.mxu0 %v4886_v3  ;;  %v4888_v5 = vld [vmem:[#allocation30_spill] sm:$0xff]  ;;  %v1440_v1 = vld [vmem:[#allocation7 + $0x838] sm:$0xff]  ;;  %v1439_v3 = vld [vmem:[#allocation7 + $0x830] sm:$0xff] }
  0x78   :  { %891 = vmatpush.msrb.mxu2 %v3913_v26  ;;  %858 = vmatpush.msra.mxu1 %v3936_v34  ;;  %v1596_v26 = vld [vmem:[#allocation7 + $0xd18] sm:$0xff] }
  0x79   :  { %956 = vmatpush.msrb.mxu3 %v3864_v9  ;;  %819 = vmatpush.msra.mxu0 %v4887_v4  ;;  %v4889_v9 = vld [vmem:[#allocation33_spill] sm:$0xff]  ;;  %v1408_v4 = vld [vmem:[#allocation7 + $0x738] sm:$0xff] }
  0x7a   :  { %895 = vmatpush.msrb.mxu2 %v3917_v27  ;;  %860 = vmatpush.msra.mxu1 %v3956_v41  ;;  %v1564_v27 = vld [vmem:[#allocation7 + $0xc18] sm:$0xff] }
  0x7b   :  { %958 = vmatpush.msrb.mxu3 %v3866_v10  ;;  %822 = vmatpush.msra.mxu0 %v4888_v5  ;;  %v4890_v10 = vld [vmem:[#allocation36_spill] sm:$0xff]  ;;  %v1407_v5 = vld [vmem:[#allocation7 + $0x730] sm:$0xff] }
  0x7c   :  { %899 = vmatpush.msrb.mxu2 %v3923_v29  ;;  %862 = vmatpush.msra.mxu1 %v3971_v46  ;;  %v1563_v29 = vld [vmem:[#allocation7 + $0xc10] sm:$0xff] }
  0x7d   :  { %960 = vmatpush.msrb.mxu3 %v3868_v11  ;;  %825 = vmatpush.msra.mxu0 %v4889_v9  ;;  %v4891_v11 = vld [vmem:[#allocation38_spill] sm:$0xff]  ;;  %v1376_v9 = vld [vmem:[#allocation7 + $0x638] sm:$0xff] }
  0x7e   :  { %903 = vmatpush.msrb.mxu2 %v3943_v36  ;;  %864 = vmatpush.msra.mxu1 %v3991_v52  ;;  %v1531_v36 = vld [vmem:[#allocation7 + $0xb10] sm:$0xff] }
  0x7f   :  { %962 = vmatpush.msrb.mxu3 %v3887_v17  ;;  %828 = vmatpush.msra.mxu0 %v4890_v10  ;;  %v4892_v17 = vld [vmem:[#allocation42_spill] sm:$0xff]  ;;  %v1375_v10 = vld [vmem:[#allocation7 + $0x630] sm:$0xff] }
  0x80   :  { %907 = vmatpush.msrb.mxu2 %v3974_v47  ;;  %866 = vmatpush.msra.mxu1 %v4868_v24  ;;  %v1467_v47 = vld [vmem:[#allocation7 + $0x910] sm:$0xff] }
  0x81   :  { %964 = vmatpush.msrb.mxu3 %v3898_v21  ;;  %831 = vmatpush.msra.mxu0 %v4891_v11  ;;  %v1659_v21 = vld [vmem:[#allocation7 + $0xf10] sm:$0xff]  ;;  %v1344_v11 = vld [vmem:[#allocation7 + $0x538] sm:$0xff] }
  0x82   :  { %911 = vmatpush.msrb.mxu2 %v3994_v53  ;;  %868 = vmatpush.msra.mxu1 %v4870_v39  ;;  %v1435_v53 = vld [vmem:[#allocation7 + $0x810] sm:$0xff] }
  0x83   :  { %966 = vmatpush.msrb.mxu3 %v3936_v34  ;;  %834 = vmatpush.msra.mxu0 %v4134_v15  ;;  %v1660_v15 = vld [vmem:[#allocation7 + $0xf18] sm:$0xff] }
  0x84   :  { %915 = vmatpush.msrb.mxu2 %v4011_v59  ;;  %870 = vmatpush.msra.mxu1 %v4873_v56  ;;  %v1532_v34 = vld [vmem:[#allocation7 + $0xb18] sm:$0xff] }
  0x85   :  { %968 = vmatpush.msrb.mxu3 %v3956_v41  ;;  %1002 = vmatpush.msrb.mxu0 %v4035_v7  ;;  %v1500_v41 = vld [vmem:[#allocation7 + $0xa18] sm:$0xff] }
  0x86   :  { %919 = vmatpush.msrb.mxu2 %v4030_v2  ;;  %872 = vmatpush.msra.mxu1 %v4092_v45  ;;  %v1404_v59 = vld [vmem:[#allocation7 + $0x718] sm:$0xff]  ;;  %v1403_v2 = vld [vmem:[#allocation7 + $0x710] sm:$0xff] }
  0x87   :  { %970 = vmatpush.msrb.mxu3 %v3971_v46  ;;  %876 = vmatmul.f32.vlgmr.msra.gmra.mxu1 %v679_v28  ;;  %v1468_v46 = vld [vmem:[#allocation7 + $0x918] sm:$0xff]  ;;  %v1567_v28 = vld [vmem:[#allocation7 + $0xc30] sm:$0xff] }
  0x88   :  { %923 = vmatpush.msrb.mxu2 %v4050_v30  ;;  %1035 = vmatpush.msrb.mxu1 %v4892_v17  ;;  %v1372_v30 = vld [vmem:[#allocation7 + $0x618] sm:$0xff]  ;;  %v1343_v17 = vld [vmem:[#allocation7 + $0x530] sm:$0xff] }
  0x89   :  { %972 = vmatpush.msrb.mxu3 %v3991_v52  ;;  %1004 = vmatpush.msrb.mxu0 %v4041_v13  ;;  %v1436_v52 = vld [vmem:[#allocation7 + $0x818] sm:$0xff] }
  0x8a   :  { %927 = vmatpush.msrb.mxu2 %v4074_v54  ;;  %1041 = vmatpush.msrb.mxu1 %v4187_v32  ;;  %v1339_v54 = vld [vmem:[#allocation7 + $0x510] sm:$0xff]  ;;  %v1212_v32 = vld [vmem:[#allocation7 + $0x118] sm:$0xff] }
  0x8b   :  { %974 = vmatpush.msrb.mxu3 %v4868_v24  ;;  %837 = vmatmul.f32.vlgmr.msra.gmra.mxu0 %v4310_v37  ;;  %v1180_v24 = vld [vmem:[#allocation7 + $0x18] sm:$0xff]  ;;  %v1599_v37 = vld [vmem:[#allocation7 + $0xd30] sm:$0xff] }
  0x8c   :  { %931 = vmatpush.msrb.mxu2 %v4103_v61  ;;  %1047 = vmatpush.msrb.mxu1 %v4199_v60  ;;  %v1276_v60 = vld [vmem:[#allocation7 + $0x318] sm:$0xff] }
  0x8d   :  { %976 = vmatpush.msrb.mxu3 %v4870_v39  ;;  %1006 = vmatpush.msrb.mxu0 %v4065_v42  ;;  %v1244_v61 = vld [vmem:[#allocation7 + $0x218] sm:$0xff] }
  0x8e   :  { %935 = vmatpush.msrb.mxu2 %v4120_v18  ;;  %1053 = vmatpush.msrb.mxu1 %v4208_v19  ;;  %v1627_v18 = vld [vmem:[#allocation7 + $0xe10] sm:$0xff]  ;;  %v1664_v39 = vld [vmem:[#allocation7 + $0xf38] sm:$0xff] }
  0x8f   :  { %978 = vmatpush.msrb.mxu3 %v4873_v56  ;;  %v1595_v19 = vld [vmem:[#allocation7 + $0xd10] sm:$0xff]  ;;  %1008 = vmatpush.msrb.mxu0 %v4084_v35 }
  0x90   :  { %939 = vmatpush.msrb.mxu2 %v4144_v0  ;;  %1102 = vmatpush.msra.mxu1 %v4035_v7  ;;  %v1307_v0 = vld [vmem:[#allocation7 + $0x410] sm:$0xff] }
  0x91   :  { %980 = vmatpush.msrb.mxu3 %v4092_v45  ;;  %1073 = vmatpush.msra.mxu0 %v4053_v31  ;;  %v1499_v45 = vld [vmem:[#allocation7 + $0xa10] sm:$0xff] }
  0x92   :  { %943 = vmatpush.msrb.mxu2 %v4169_v33  ;;  %982 = vmatmul.f32.vlgmr.msrb.gmra.mxu3 %v4302_v40  ;;  %v1371_v31 = vld [vmem:[#allocation7 + $0x610] sm:$0xff]  ;;  %v1340_v33 = vld [vmem:[#allocation7 + $0x518] sm:$0xff] }
  0x93   :  { %1758 = vmatpush.msra.mxu3 %v1660_v15  ;;  %945 = vmatmul.f32.vlgmr.msrb.gmra.mxu2 %v4302_v40  ;;  %v1179_v56 = vld [vmem:[#allocation7 + $0x10] sm:$0xff]  ;;  %v1600_v40 = vld [vmem:[#allocation7 + $0xd38] sm:$0xff] }
  0x94   :  { %1735 = vmatpush.msra.mxu2 %v1659_v21  ;;  %1104 = vmatpush.msra.mxu1 %v4041_v13  ;;  %v1312_v15 = vld [vmem:[#allocation7 + $0x438] sm:$0xff]  ;;  %v1311_v21 = vld [vmem:[#allocation7 + $0x430] sm:$0xff] }
  0x95   :  { %1759 = vmatpush.msra.mxu3 %v1628_v25  ;;  %1076 = vmatpush.msra.mxu0 %v4082_v57  ;;  %v1308_v57 = vld [vmem:[#allocation7 + $0x418] sm:$0xff] }
  0x96   :  { %1736 = vmatpush.msra.mxu2 %v1627_v18  ;;  %1106 = vmatpush.msra.mxu1 %v4065_v42  ;;  %v1280_v25 = vld [vmem:[#allocation7 + $0x338] sm:$0xff]  ;;  %v1279_v18 = vld [vmem:[#allocation7 + $0x330] sm:$0xff] }
  0x97   :  { %1760 = vmatpush.msra.mxu3 %v1596_v26  ;;  %1079 = vmatpush.msra.mxu0 %v4106_v23  ;;  %v1243_v23 = vld [vmem:[#allocation7 + $0x210] sm:$0xff]  ;;  %v1248_v26 = vld [vmem:[#allocation7 + $0x238] sm:$0xff] }
  0x98   :  { %1737 = vmatpush.msra.mxu2 %v1595_v19  ;;  %1108 = vmatpush.msra.mxu1 %v4084_v35  ;;  %v1247_v19 = vld [vmem:[#allocation7 + $0x230] sm:$0xff] }
  0x99   :  { %1761 = vmatpush.msra.mxu3 %v1564_v27  ;;  %1082 = vmatpush.msra.mxu0 %v4125_v16  ;;  %v1275_v16 = vld [vmem:[#allocation7 + $0x310] sm:$0xff]  ;;  %v1216_v27 = vld [vmem:[#allocation7 + $0x138] sm:$0xff] }
  0x9a   :  { %1738 = vmatpush.msra.mxu2 %v1563_v29  ;;  %v1215_v29 = vld [vmem:[#allocation7 + $0x130] sm:$0xff] }
  0x9b   :  { %1762 = vmatpush.msra.mxu3 %v1532_v34  ;;  %v1184_v34 = vld [vmem:[#allocation7 + $0x38] sm:$0xff] }
  0x9c   :  { %1739 = vmatpush.msra.mxu2 %v1531_v36 }
  0x9d   :  { %1763 = vmatpush.msra.mxu3 %v1500_v41  ;;  %v1668_v41 = vld [vmem:[#allocation7 + $0xf58] sm:$0xff] }
  0x9e   :  { %1740 = vmatpush.msra.mxu2 %v1499_v45  ;;  %v1183_v45 = vld [vmem:[#allocation7 + $0x30] sm:$0xff] }
  0x9f   :  { %1764 = vmatpush.msra.mxu3 %v1468_v46  ;;  %v1667_v46 = vld [vmem:[#allocation7 + $0xf50] sm:$0xff] }
  0xa0   :  { %1741 = vmatpush.msra.mxu2 %v1467_v47 }
  0xa1   :  { %1765 = vmatpush.msra.mxu3 %v1436_v52  ;;  %v1636_v52 = vld [vmem:[#allocation7 + $0xe58] sm:$0xff] }
  0xa2   :  { %1742 = vmatpush.msra.mxu2 %v1435_v53  ;;  %v1635_v53 = vld [vmem:[#allocation7 + $0xe50] sm:$0xff] }
  0xa3   :  { %1766 = vmatpush.msra.mxu3 %v1404_v59  ;;  %v1604_v59 = vld [vmem:[#allocation7 + $0xd58] sm:$0xff] }
  0xa4   :  { %1743 = vmatpush.msra.mxu2 %v1403_v2  ;;  %v1603_v2 = vld [vmem:[#allocation7 + $0xd50] sm:$0xff] }
  0xa5   :  { %1767 = vmatpush.msra.mxu3 %v1372_v30  ;;  %v1572_v30 = vld [vmem:[#allocation7 + $0xc58] sm:$0xff] }
  0xa6   :  { %1744 = vmatpush.msra.mxu2 %v1371_v31 }
  0xa7   :  { %1768 = vmatpush.msra.mxu3 %v1340_v33 }
  0xa8   :  { %1745 = vmatpush.msra.mxu2 %v1339_v54  ;;  %v1571_v54 = vld [vmem:[#allocation7 + $0xc50] sm:$0xff] }
  0xa9   :  { %1769 = vmatpush.msra.mxu3 %v1308_v57  ;;  %v1540_v57 = vld [vmem:[#allocation7 + $0xb58] sm:$0xff] }
  0xaa   :  { %1746 = vmatpush.msra.mxu2 %v1307_v0  ;;  %v1539_v0 = vld [vmem:[#allocation7 + $0xb50] sm:$0xff] }
  0xab   :  { %1770 = vmatpush.msra.mxu3 %v1276_v60 }
  0xac   :  { %1747 = vmatpush.msra.mxu2 %v1275_v16 }
  0xad   :  { %1771 = vmatpush.msra.mxu3 %v1244_v61  ;;  %v1508_v61 = vld [vmem:[#allocation7 + $0xa58] sm:$0xff] }
  0xae   :  { %1748 = vmatpush.msra.mxu2 %v1243_v23  ;;  %v1507_v23 = vld [vmem:[#allocation7 + $0xa50] sm:$0xff] }
  0xaf   :  { %1772 = vmatpush.msra.mxu3 %v1212_v32 }
  0xb0   :  { %1749 = vmatpush.msra.mxu2 %v1211_v63  ;;  %v1476_v63 = vld [vmem:[#allocation7 + $0x958] sm:$0xff] }
  0xb1   :  { %1773 = vmatpush.msra.mxu3 %v1180_v24  ;;  %v1475_v24 = vld [vmem:[#allocation7 + $0x950] sm:$0xff] }
  0xb2   :  { %1750 = vmatpush.msra.mxu2 %v1179_v56  ;;  %1774 = vmatmul.f32.vlgmr.msra.gmra.mxu3 %v4893_v49  ;;  %v1444_v56 = vld [vmem:[#allocation7 + $0x858] sm:$0xff] }
  0xb3   :  { %1850 = vmatpush.msrb.mxu3 %v1664_v39  ;;  %1751 = vmatmul.f32.vlgmr.msra.gmra.mxu2 %v4893_v49 }
  0xb4   :  { %1827 = vmatpush.msrb.mxu2 %v1663_v14  ;;  %v1443_v14 = vld [vmem:[#allocation7 + $0x850] sm:$0xff] }
  0xb5   :  { %1851 = vmatpush.msrb.mxu3 %v1632_v51  ;;  %v1412_v51 = vld [vmem:[#allocation7 + $0x758] sm:$0xff] }
  0xb6   :  { %1828 = vmatpush.msrb.mxu2 %v1631_v8 }
  0xb7   :  { %1852 = vmatpush.msrb.mxu3 %v1600_v40  ;;  %v1411_v40 = vld [vmem:[#allocation7 + $0x750] sm:$0xff] }
  0xb8   :  { %1829 = vmatpush.msrb.mxu2 %v1599_v37 }
  0xb9   :  { %1853 = vmatpush.msrb.mxu3 %v1568_v38  ;;  %v1380_v38 = vld [vmem:[#allocation7 + $0x658] sm:$0xff] }
  0xba   :  { %1830 = vmatpush.msrb.mxu2 %v1567_v28  ;;  %1777 = vmatmul.f32.gmra.mxu3 %v4297_v48  ;;  %v1379_v28 = vld [vmem:[#allocation7 + $0x650] sm:$0xff] }
  0xbb   :  { %1854 = vmatpush.msrb.mxu3 %v1536_v44  ;;  %1754 = vmatmul.f32.gmra.mxu2 %v4297_v48 }
  0xbc   :  { %1831 = vmatpush.msrb.mxu2 %v1535_v12 }
  0xbd   :  { %1855 = vmatpush.msrb.mxu3 %v1504_v50  ;;  %v1348_v50 = vld [vmem:[#allocation7 + $0x558] sm:$0xff] }
  0xbe   :  { %1832 = vmatpush.msrb.mxu2 %v1503_v55 }
  0xbf   :  { %1856 = vmatpush.msrb.mxu3 %v1472_v62  ;;  %v1347_v62 = vld [vmem:[#allocation7 + $0x550] sm:$0xff] }
  0xc0   :  { %1833 = vmatpush.msrb.mxu2 %v1471_v58  ;;  %v346_v47 = vpop.f32.mrf.mxu3 }
  0xc1   :  { %1857 = vmatpush.msrb.mxu3 %v1440_v1 }
  0xc2   :  { %1834 = vmatpush.msrb.mxu2 %v1439_v3  ;;  %v307_v36 = vpop.f32.mrf.mxu2  ;;  %v1316_v3 = vld [vmem:[#allocation7 + $0x458] sm:$0xff] }
  0xc3   :  { %1858 = vmatpush.msrb.mxu3 %v1408_v4  ;;  %v1315_v4 = vld [vmem:[#allocation7 + $0x450] sm:$0xff] }
  0xc4   :  { %1835 = vmatpush.msrb.mxu2 %v1407_v5 }
  0xc5   :  { %1859 = vmatpush.msrb.mxu3 %v1376_v9  ;;  %v1284_v9 = vld [vmem:[#allocation7 + $0x358] sm:$0xff] }
  0xc6   :  { %1836 = vmatpush.msrb.mxu2 %v1375_v10  ;;  %v1283_v10 = vld [vmem:[#allocation7 + $0x350] sm:$0xff] }
  0xc7   :  { %1860 = vmatpush.msrb.mxu3 %v1344_v11 }
  0xc8   :  { %1837 = vmatpush.msrb.mxu2 %v1343_v17  ;;  %v1252_v17 = vld [vmem:[#allocation7 + $0x258] sm:$0xff] }
  0xc9   :  { %1861 = vmatpush.msrb.mxu3 %v1312_v15  ;;  %v525_v32 = vpop.f32.mrf.mxu3  ;;  %v1251_v15 = vld [vmem:[#allocation7 + $0x250] sm:$0xff] }
  0xca   :  { %1838 = vmatpush.msrb.mxu2 %v1311_v21 }
  0xcb   :  { %1862 = vmatpush.msrb.mxu3 %v1280_v25  ;;  %v484_v60 = vpop.f32.mrf.mxu2  ;;  %v1220_v25 = vld [vmem:[#allocation7 + $0x158] sm:$0xff] }
  0xcc   :  { %1839 = vmatpush.msrb.mxu2 %v1279_v18 }
  0xcd   :  { %1863 = vmatpush.msrb.mxu3 %v1248_v26  ;;  %v1219_v26 = vld [vmem:[#allocation7 + $0x150] sm:$0xff] }
  0xce   :  { %1840 = vmatpush.msrb.mxu2 %v1247_v19 }
  0xcf   :  { %1864 = vmatpush.msrb.mxu3 %v1216_v27  ;;  %v152_v31 = vpop.f32.mrf.mxu0  ;;  %v1188_v27 = vld [vmem:[#allocation7 + $0x58] sm:$0xff] }
  0xd0   :  { %1841 = vmatpush.msrb.mxu2 %v1215_v29  ;;  %v253_v33 = vpop.f32.mrf.mxu1 }
  0xd1   :  { %1865 = vmatpush.msrb.mxu3 %v1184_v34  ;;  %v254_v16 = vadd.f32 %v253_v33, %v152_v31  ;;  %v1672_v34 = vld [vmem:[#allocation7 + $0xf78] sm:$0xff]  ;;  %v1575_v33 = vld [vmem:[#allocation7 + $0xc70] sm:$0xff] }
  0xd2   :  { %1842 = vmatpush.msrb.mxu2 %v1183_v45  ;;  %1866 = vmatmul.f32.vlgmr.msrb.gmra.mxu3 %v4893_v49  ;;  %v1671_v45 = vld [vmem:[#allocation7 + $0xf70] sm:$0xff]  ;;  %v1576_v31 = vld [vmem:[#allocation7 + $0xc78] sm:$0xff] }
  0xd3   :  { %1942 = vmatpush.msra.mxu3 %v1668_v41  ;;  %1843 = vmatmul.f32.vlgmr.msrb.gmra.mxu2 %v4893_v49  ;;  %v308_v39 = vadd.f32 %v307_v36, %v254_v16  ;;  %v582_v58 = vpop.f32.mrf.mxu3  ;;  %v1187_v36 = vld [vmem:[#allocation7 + $0x50] sm:$0xff]  ;;  %v1512_v16 = vld [vmem:[#allocation7 + $0xa78] sm:$0xff] }
  0xd4   :  { %1919 = vmatpush.msra.mxu2 %v1667_v46  ;;  %v1640_v46 = vld [vmem:[#allocation7 + $0xe78] sm:$0xff] }
  0xd5   :  { %1943 = vmatpush.msra.mxu3 %v1636_v52  ;;  %v347_v37 = vadd.f32 %v346_v47, %v308_v39  ;;  %v1639_v52 = vld [vmem:[#allocation7 + $0xe70] sm:$0xff] }
  0xd6   :  { %1920 = vmatpush.msra.mxu2 %v1635_v53  ;;  %v555_v44 = vpop.f32.mrf.mxu2  ;;  %v1608_v53 = vld [vmem:[#allocation7 + $0xd78] sm:$0xff]  ;;  %v1447_v39 = vld [vmem:[#allocation7 + $0x870] sm:$0xff] }
  0xd7   :  { %1944 = vmatpush.msra.mxu3 %v1604_v59 }
  0xd8   :  { %1921 = vmatpush.msra.mxu2 %v1603_v2  ;;  %v1607_v2 = vld [vmem:[#allocation7 + $0xd70] sm:$0xff] }
  0xd9   :  { %1945 = vmatpush.msra.mxu3 %v1572_v30  ;;  %v415_v8 = vpop.f32.mrf.mxu0 }
  0xda   :  { %1922 = vmatpush.msra.mxu2 %v1571_v54  ;;  %1869 = vmatmul.f32.gmra.mxu3 %v4297_v48  ;;  %v416_v12 = vadd.f32 %v415_v8, %v347_v37  ;;  %v1352_v8 = vld [vmem:[#allocation7 + $0x578] sm:$0xff]  ;;  %v1351_v37 = vld [vmem:[#allocation7 + $0x570] sm:$0xff] }
  0xdb   :  { %1946 = vmatpush.msra.mxu3 %v1540_v57  ;;  %1846 = vmatmul.f32.gmra.mxu2 %v4297_v48  ;;  %v1544_v57 = vld [vmem:[#allocation7 + $0xb78] sm:$0xff] }
  0xdc   :  { %1923 = vmatpush.msra.mxu2 %v1539_v0  ;;  %v1543_v0 = vld [vmem:[#allocation7 + $0xb70] sm:$0xff] }
  0xdd   :  { %1947 = vmatpush.msra.mxu3 %v1508_v61  ;;  %v1480_v61 = vld [vmem:[#allocation7 + $0x978] sm:$0xff] }
  0xde   :  { %1924 = vmatpush.msra.mxu2 %v1507_v23 }
  0xdf   :  { %1948 = vmatpush.msra.mxu3 %v1476_v63  ;;  %v1658_v63 = vld [vmem:[#allocation7 + $0xf08] sm:$0xff] }
  0xe0   :  { %1925 = vmatpush.msra.mxu2 %v1475_v24  ;;  %v1448_v24 = vld [vmem:[#allocation7 + $0x878] sm:$0xff] }
  0xe1   :  { %1949 = vmatpush.msra.mxu3 %v1444_v56  ;;  %v452_v55 = vpop.f32.mrf.mxu1  ;;  %v640_v29 = vpop.f32.mrf.mxu3  ;;  %v1416_v56 = vld [vmem:[#allocation7 + $0x778] sm:$0xff] }
  0xe2   :  { %1926 = vmatpush.msra.mxu2 %v1443_v14  ;;  %v453_v1 = vadd.f32 %v452_v55, %v416_v12  ;;  %v1384_v14 = vld [vmem:[#allocation7 + $0x678] sm:$0xff]  ;;  %v1287_v55 = vld [vmem:[#allocation7 + $0x370] sm:$0xff] }
  0xe3   :  { %1950 = vmatpush.msra.mxu3 %v1412_v51  ;;  %v1383_v51 = vld [vmem:[#allocation7 + $0x670] sm:$0xff]  ;;  %v1288_v12 = vld [vmem:[#allocation7 + $0x378] sm:$0xff] }
  0xe4   :  { %1927 = vmatpush.msra.mxu2 %v1411_v40  ;;  %v485_v5 = vadd.f32 %v484_v60, %v453_v1  ;;  %v1657_v40 = vld [vmem:[#allocation7 + $0xf00] sm:$0xff]  ;;  %v1255_v1 = vld [vmem:[#allocation7 + $0x270] sm:$0xff] }
  0xe5   :  { %1951 = vmatpush.msra.mxu3 %v1380_v38  ;;  %v1320_v38 = vld [vmem:[#allocation7 + $0x478] sm:$0xff] }
  0xe6   :  { %1928 = vmatpush.msra.mxu2 %v1379_v28  ;;  %v526_v11 = vadd.f32 %v525_v32, %v485_v5  ;;  %v1498_v28 = vld [vmem:[#allocation7 + $0xa08] sm:$0xff]  ;;  %v1529_v5 = vld [vmem:[#allocation7 + $0xb00] sm:$0xff] }
  0xe7   :  { %1952 = vmatpush.msra.mxu3 %v1348_v50  ;;  %v1466_v50 = vld [vmem:[#allocation7 + $0x908] sm:$0xff] }
  0xe8   :  { %1929 = vmatpush.msra.mxu2 %v1347_v62  ;;  %v556_v21 = vadd.f32 %v555_v44, %v526_v11  ;;  %v615_v18 = vpop.f32.mrf.mxu2  ;;  %v1319_v44 = vld [vmem:[#allocation7 + $0x470] sm:$0xff]  ;;  %v1256_v62 = vld [vmem:[#allocation7 + $0x278] sm:$0xff]  ;;  %v1370_v11 = vld [vmem:[#allocation7 + $0x608] sm:$0xff] }
  0xe9   :  { %1953 = vmatpush.msra.mxu3 %v1316_v3  ;;  %v1224_v3 = vld [vmem:[#allocation7 + $0x178] sm:$0xff] }
  0xea   :  { %1930 = vmatpush.msra.mxu2 %v1315_v4  ;;  %v583_v19 = vadd.f32 %v582_v58, %v556_v21  ;;  %v1434_v58 = vld [vmem:[#allocation7 + $0x808] sm:$0xff]  ;;  %v1191_v21 = vld [vmem:[#allocation7 + $0x70] sm:$0xff] }
  0xeb   :  { %1954 = vmatpush.msra.mxu3 %v1284_v9  ;;  %v1402_v4 = vld [vmem:[#allocation7 + $0x708] sm:$0xff]  ;;  %v1223_v9 = vld [vmem:[#allocation7 + $0x170] sm:$0xff] }
  0xec   :  { %1931 = vmatpush.msra.mxu2 %v1283_v10  ;;  %v616_v41 = vadd.f32 %v615_v18, %v583_v19  ;;  %v1192_v10 = vld [vmem:[#allocation7 + $0x78] sm:$0xff]  ;;  %v1675_v18 = vld [vmem:[#allocation7 + $0xf90] sm:$0xff]  ;;  %v1465_v19 = vld [vmem:[#allocation7 + $0x900] sm:$0xff] }
  0xed   :  { %1955 = vmatpush.msra.mxu3 %v1252_v17  ;;  %v1676_v17 = vld [vmem:[#allocation7 + $0xf98] sm:$0xff] }
  0xee   :  { %1932 = vmatpush.msra.mxu2 %v1251_v15  ;;  %v641_v47 = vadd.f32 %v640_v29, %v616_v41  ;;  %v1497_v15 = vld [vmem:[#allocation7 + $0xa00] sm:$0xff]  ;;  %v1643_v29 = vld [vmem:[#allocation7 + $0xe90] sm:$0xff]  ;;  %v1274_v41 = vld [vmem:[#allocation7 + $0x308] sm:$0xff] }
  0xef   :  { %1956 = vmatpush.msra.mxu3 %v1220_v25  ;;  %v1338_v25 = vld [vmem:[#allocation7 + $0x508] sm:$0xff] }
  0xf0   :  { %1933 = vmatpush.msra.mxu2 %v1219_v26  ;;  %643 = vst.msk [vmem:[#allocation3 + $0x8] sm:$0xff] %vm88_vm0, %v641_v47  ;;  %v987_v59 = vsel %vm88_vm0, %v641_v47, 0  ;;  %v1644_v26 = vld [vmem:[#allocation7 + $0xe98] sm:$0xff]  ;;  %v1401_v47 = vld [vmem:[#allocation7 + $0x700] sm:$0xff] }
  0xf1   :  { %1957 = vmatpush.msra.mxu3 %v1188_v27  ;;  %v4410_v30 = vand.u32 4294901760, %v987_v59  ;;  %v1306_v27 = vld [vmem:[#allocation7 + $0x408] sm:$0xff] }
  0xf2   :  { %1934 = vmatpush.msra.mxu2 %v1187_v36  ;;  %1958 = vmatmul.f32.vlgmr.msra.gmra.mxu3 %v4893_v49  ;;  %v1433_v36 = vld [vmem:[#allocation7 + $0x800] sm:$0xff] }
  0xf3   :  { %2034 = vmatpush.msrb.mxu3 %v1672_v34  ;;  %1935 = vmatmul.f32.vlgmr.msra.gmra.mxu2 %v4893_v49  ;;  %v1010_v54 = vsub.f32 %v987_v59, %v4410_v30  ;;  %v1511_v49 = vld [vmem:[#allocation7 + $0xa70] sm:$0xff]  ;;  %v1612_v34 = vld [vmem:[#allocation7 + $0xd98] sm:$0xff] }
  0xf4   :  { %2011 = vmatpush.msrb.mxu2 %v1671_v45  ;;  %1055 = vmatmul.f32.vlgmr.msrb.gmra.mxu1 %v4410_v30  ;;  %v1611_v45 = vld [vmem:[#allocation7 + $0xd90] sm:$0xff]  ;;  %v1548_v59 = vld [vmem:[#allocation7 + $0xb98] sm:$0xff] }
  0xf5   :  { %2035 = vmatpush.msrb.mxu3 %v1640_v46  ;;  %1162 = vmatpush.msrb.mxu1 %v4035_v7  ;;  %v1011_v60 = vand.u32 4294901760, %v1010_v54  ;;  %v1479_v7 = vld [vmem:[#allocation7 + $0x970] sm:$0xff]  ;;  %v1580_v46 = vld [vmem:[#allocation7 + $0xc98] sm:$0xff] }
  0xf6   :  { %2012 = vmatpush.msrb.mxu2 %v1639_v52  ;;  %v1242_v52 = vld [vmem:[#allocation7 + $0x208] sm:$0xff] }
  0xf7   :  { %2036 = vmatpush.msrb.mxu3 %v1608_v53  ;;  %1164 = vmatpush.msrb.mxu1 %v4041_v13  ;;  %v1012_v23 = vsub.f32 %v1010_v54, %v1011_v60  ;;  %v1626_v13 = vld [vmem:[#allocation7 + $0xe08] sm:$0xff]  ;;  %v1579_v53 = vld [vmem:[#allocation7 + $0xc90] sm:$0xff] }
  0xf8   :  { %2013 = vmatpush.msrb.mxu2 %v1607_v2  ;;  %v1369_v2 = vld [vmem:[#allocation7 + $0x600] sm:$0xff] }
  0xf9   :  { %2037 = vmatpush.msrb.mxu3 %v1576_v31  ;;  %1166 = vmatpush.msrb.mxu1 %v4065_v42  ;;  %v1013_v32 = vand.u32 4294901760, %v1012_v23  ;;  %v1415_v42 = vld [vmem:[#allocation7 + $0x770] sm:$0xff]  ;;  %v1452_v23 = vld [vmem:[#allocation7 + $0x898] sm:$0xff] }
  0xfa   :  { %2014 = vmatpush.msrb.mxu2 %v1575_v33  ;;  %1961 = vmatmul.f32.gmra.mxu3 %v4297_v48  ;;  %v1594_v48 = vld [vmem:[#allocation7 + $0xd08] sm:$0xff]  ;;  %v1547_v31 = vld [vmem:[#allocation7 + $0xb90] sm:$0xff]  ;;  %v1516_v33 = vld [vmem:[#allocation7 + $0xa98] sm:$0xff] }
  0xfb   :  { %2038 = vmatpush.msrb.mxu3 %v1544_v57  ;;  %1168 = vmatpush.msrb.mxu1 %v4084_v35  ;;  %v1562_v35 = vld [vmem:[#allocation7 + $0xc08] sm:$0xff] }
  0xfc   :  { %2015 = vmatpush.msrb.mxu2 %v1543_v0  ;;  %1014 = vmatmul.f32.vlgmr.msrb.gmra.mxu0 %v1013_v32  ;;  %v1178_v57 = vld [vmem:[#allocation7 + $0x8] sm:$0xff]  ;;  %v1515_v0 = vld [vmem:[#allocation7 + $0xa90] sm:$0xff]  ;;  %v1273_v32 = vld [vmem:[#allocation7 + $0x300] sm:$0xff] }
  0xfd   :  { %2039 = vmatpush.msrb.mxu3 %v1512_v16  ;;  %1112 = vmatmul.f32.vlgmr.msra.gmra.mxu1 %v1011_v60  ;;  %v1484_v60 = vld [vmem:[#allocation7 + $0x998] sm:$0xff]  ;;  %v1305_v16 = vld [vmem:[#allocation7 + $0x400] sm:$0xff] }
  0xfe   :  { %2016 = vmatpush.msrb.mxu2 %v1511_v49  ;;  %1712 = vmatpush.msra.mxu1 %v1658_v63  ;;  %v1662_v49 = vld [vmem:[#allocation7 + $0xf28] sm:$0xff] }
  0xff   :  { %2040 = vmatpush.msrb.mxu3 %v1480_v61  ;;  %1131 = vmatpush.msrb.mxu0 %v4095_v20  ;;  %v1530_v20 = vld [vmem:[#allocation7 + $0xb08] sm:$0xff]  ;;  %v1483_v61 = vld [vmem:[#allocation7 + $0x990] sm:$0xff] }
 0x100   :  { %2017 = vmatpush.msrb.mxu2 %v1479_v7  ;;  %1713 = vmatpush.msra.mxu1 %v1626_v13  ;;  %v1630_v63 = vld [vmem:[#allocation7 + $0xe28] sm:$0xff]  ;;  %v1451_v7 = vld [vmem:[#allocation7 + $0x890] sm:$0xff]  ;;  %v1241_v13 = vld [vmem:[#allocation7 + $0x200] sm:$0xff] }
 0x101   :  { %2041 = vmatpush.msrb.mxu3 %v1448_v24  ;;  %1135 = vmatpush.msrb.mxu0 %v4117_v6  ;;  %v1625_v6 = vld [vmem:[#allocation7 + $0xe00] sm:$0xff]  ;;  %v1420_v24 = vld [vmem:[#allocation7 + $0x798] sm:$0xff] }
 0x102   :  { %2018 = vmatpush.msrb.mxu2 %v1447_v39  ;;  %1714 = vmatpush.msra.mxu1 %v1594_v48  ;;  %v1598_v39 = vld [vmem:[#allocation7 + $0xd28] sm:$0xff]  ;;  %v1388_v48 = vld [vmem:[#allocation7 + $0x698] sm:$0xff] }
 0x103   :  { %2042 = vmatpush.msrb.mxu3 %v1416_v56  ;;  %1139 = vmatpush.msrb.mxu0 %v4141_v43  ;;  %v1593_v43 = vld [vmem:[#allocation7 + $0xd00] sm:$0xff]  ;;  %v1419_v56 = vld [vmem:[#allocation7 + $0x790] sm:$0xff] }
 0x104   :  { %2019 = vmatpush.msrb.mxu2 %v1415_v42  ;;  %1715 = vmatpush.msra.mxu1 %v1562_v35  ;;  %v1209_v42 = vld [vmem:[#allocation7 + $0x100] sm:$0xff]  ;;  %v1387_v35 = vld [vmem:[#allocation7 + $0x690] sm:$0xff] }
 0x105   :  { %2043 = vmatpush.msrb.mxu3 %v1384_v14  ;;  %1143 = vmatpush.msrb.mxu0 %v4160_v22  ;;  %v1561_v22 = vld [vmem:[#allocation7 + $0xc00] sm:$0xff]  ;;  %v1566_v14 = vld [vmem:[#allocation7 + $0xc28] sm:$0xff] }
 0x106   :  { %2020 = vmatpush.msrb.mxu2 %v1383_v51  ;;  %1085 = vmatmul.f32.vlgmr.msra.gmra.mxu0 %v1010_v54  ;;  %v1337_v54 = vld [vmem:[#allocation7 + $0x500] sm:$0xff]  ;;  %v1356_v51 = vld [vmem:[#allocation7 + $0x598] sm:$0xff] }
 0x107   :  { %2044 = vmatpush.msrb.mxu3 %v1352_v8  ;;  %1170 = vmatmul.f32.vlgmr.msrb.gmra.mxu1 %v4410_v30  ;;  %v1177_v8 = vld [vmem:[#allocation7] sm:$0xff] }
 0x108   :  { %1689 = vmatpush.msra.mxu0 %v1657_v40  ;;  %1716 = vmatpush.msra.mxu1 %v1530_v20  ;;  %v1534_v40 = vld [vmem:[#allocation7 + $0xb28] sm:$0xff]  ;;  %v1661_v20 = vld [vmem:[#allocation7 + $0xf20] sm:$0xff] }
 0x109   :  { %2021 = vmatpush.msrb.mxu2 %v1351_v37  ;;  %2045 = vmatpush.msrb.mxu3 %v1320_v38  ;;  %v1355_v37 = vld [vmem:[#allocation7 + $0x590] sm:$0xff]  ;;  %v1324_v38 = vld [vmem:[#allocation7 + $0x498] sm:$0xff] }
 0x10a   :  { %1690 = vmatpush.msra.mxu0 %v1625_v6  ;;  %1717 = vmatpush.msra.mxu1 %v1498_v28  ;;  %v1502_v6 = vld [vmem:[#allocation7 + $0xa28] sm:$0xff]  ;;  %v1629_v28 = vld [vmem:[#allocation7 + $0xe20] sm:$0xff] }
 0x10b   :  { %2022 = vmatpush.msrb.mxu2 %v1319_v44  ;;  %2046 = vmatpush.msrb.mxu3 %v1288_v12  ;;  %v1323_v44 = vld [vmem:[#allocation7 + $0x490] sm:$0xff]  ;;  %v1292_v12 = vld [vmem:[#allocation7 + $0x398] sm:$0xff] }
 0x10c   :  { %1691 = vmatpush.msra.mxu0 %v1593_v43  ;;  %1718 = vmatpush.msra.mxu1 %v1466_v50  ;;  %v1597_v43 = vld [vmem:[#allocation7 + $0xd20] sm:$0xff]  ;;  %v1470_v50 = vld [vmem:[#allocation7 + $0x928] sm:$0xff] }
 0x10d   :  { %2023 = vmatpush.msrb.mxu2 %v1287_v55  ;;  %2047 = vmatpush.msrb.mxu3 %v1256_v62  ;;  %v1291_v55 = vld [vmem:[#allocation7 + $0x390] sm:$0xff]  ;;  %v1260_v62 = vld [vmem:[#allocation7 + $0x298] sm:$0xff] }
 0x10e   :  { %1692 = vmatpush.msra.mxu0 %v1561_v22  ;;  %1719 = vmatpush.msra.mxu1 %v1434_v58  ;;  %v4425_v22 = vld [vmem:[#allocation4 + $0x8] sm:$0xff]  ;;  %v1565_v58 = vld [vmem:[#allocation7 + $0xc20] sm:$0xff] }
 0x10f   :  { %2024 = vmatpush.msrb.mxu2 %v1255_v1  ;;  %2048 = vmatpush.msrb.mxu3 %v1224_v3  ;;  %v1438_v1 = vld [vmem:[#allocation7 + $0x828] sm:$0xff]  ;;  %v1259_v3 = vld [vmem:[#allocation7 + $0x290] sm:$0xff] }
 0x110   :  { %1145 = vmatmul.f32.vlgmr.msrb.gmra.mxu0 %v4410_v30  ;;  %1720 = vmatpush.msra.mxu1 %v1402_v4  ;;  %v1210_v30 = vld [vmem:[#allocation7 + $0x108] sm:$0xff]  ;;  %v1228_v4 = vld [vmem:[#allocation7 + $0x198] sm:$0xff] }
 0x111   :  { %1693 = vmatpush.msra.mxu0 %v1529_v5  ;;  %2025 = vmatpush.msrb.mxu2 %v1223_v9  ;;  %v1533_v5 = vld [vmem:[#allocation7 + $0xb20] sm:$0xff]  ;;  %v1406_v9 = vld [vmem:[#allocation7 + $0x728] sm:$0xff] }
 0x112   :  { %2049 = vmatpush.msrb.mxu3 %v1192_v10  ;;  %1721 = vmatpush.msra.mxu1 %v1370_v11  ;;  %v1227_v10 = vld [vmem:[#allocation7 + $0x190] sm:$0xff]  ;;  %v1196_v11 = vld [vmem:[#allocation7 + $0x98] sm:$0xff] }
 0x113   :  { %1694 = vmatpush.msra.mxu0 %v1497_v15  ;;  %2026 = vmatpush.msrb.mxu2 %v1191_v21  ;;  %v1680_v15 = vld [vmem:[#allocation7 + $0xfb8] sm:$0xff]  ;;  %v1374_v21 = vld [vmem:[#allocation7 + $0x628] sm:$0xff] }
 0x114   :  { %2126 = vmatpush.msra.mxu3 %v1676_v17  ;;  %1722 = vmatpush.msra.mxu1 %v1338_v25  ;;  %v1501_v17 = vld [vmem:[#allocation7 + $0xa20] sm:$0xff]  ;;  %v1195_v25 = vld [vmem:[#allocation7 + $0x90] sm:$0xff] }
 0x115   :  { %2103 = vmatpush.msra.mxu2 %v1675_v18  ;;  %1695 = vmatpush.msra.mxu0 %v1465_v19  ;;  %v1469_v18 = vld [vmem:[#allocation7 + $0x920] sm:$0xff]  ;;  %v1648_v19 = vld [vmem:[#allocation7 + $0xeb8] sm:$0xff] }
 0x116   :  { %2127 = vmatpush.msra.mxu3 %v1644_v26  ;;  %1723 = vmatpush.msra.mxu1 %v1306_v27  ;;  %v4428_v26 = vld [vmem:[#allocation4] sm:$0xff] }
 0x117   :  { %2104 = vmatpush.msra.mxu2 %v1643_v29  ;;  %1696 = vmatpush.msra.mxu0 %v1433_v36  ;;  %v1679_v27 = vld [vmem:[#allocation7 + $0xfb0] sm:$0xff]  ;;  %v1342_v29 = vld [vmem:[#allocation7 + $0x528] sm:$0xff]  ;;  %v1437_v36 = vld [vmem:[#allocation7 + $0x820] sm:$0xff] }
 0x118   :  { %2128 = vmatpush.msra.mxu3 %v1612_v34  ;;  %1724 = vmatpush.msra.mxu1 %v1274_v41  ;;  %v1616_v34 = vld [vmem:[#allocation7 + $0xdb8] sm:$0xff]  ;;  %v1647_v41 = vld [vmem:[#allocation7 + $0xeb0] sm:$0xff] }
 0x119   :  { %2105 = vmatpush.msra.mxu2 %v1611_v45  ;;  %1697 = vmatpush.msra.mxu0 %v1401_v47  ;;  %v1310_v45 = vld [vmem:[#allocation7 + $0x428] sm:$0xff]  ;;  %v1405_v47 = vld [vmem:[#allocation7 + $0x720] sm:$0xff] }
 0x11a   :  { %2129 = vmatpush.msra.mxu3 %v1580_v46  ;;  %1725 = vmatpush.msra.mxu1 %v1242_v52  ;;  %v1584_v46 = vld [vmem:[#allocation7 + $0xcb8] sm:$0xff]  ;;  %v1615_v52 = vld [vmem:[#allocation7 + $0xdb0] sm:$0xff] }
 0x11b   :  { %2106 = vmatpush.msra.mxu2 %v1579_v53  ;;  %1698 = vmatpush.msra.mxu0 %v1369_v2  ;;  %v1278_v53 = vld [vmem:[#allocation7 + $0x328] sm:$0xff]  ;;  %v1373_v2 = vld [vmem:[#allocation7 + $0x620] sm:$0xff] }
 0x11c   :  { %2130 = vmatpush.msra.mxu3 %v1548_v59  ;;  %1726 = vmatpush.msra.mxu1 %v1210_v30  ;;  %v1552_v59 = vld [vmem:[#allocation7 + $0xbb8] sm:$0xff]  ;;  %v1583_v30 = vld [vmem:[#allocation7 + $0xcb0] sm:$0xff] }
 0x11d   :  { %2107 = vmatpush.msra.mxu2 %v1547_v31  ;;  %1699 = vmatpush.msra.mxu0 %v1337_v54  ;;  %v1246_v31 = vld [vmem:[#allocation7 + $0x228] sm:$0xff]  ;;  %v1341_v54 = vld [vmem:[#allocation7 + $0x520] sm:$0xff] }
 0x11e   :  { %2131 = vmatpush.msra.mxu3 %v1516_v33  ;;  %1727 = vmatpush.msra.mxu1 %v1178_v57  ;;  %v1520_v33 = vld [vmem:[#allocation7 + $0xab8] sm:$0xff]  ;;  %v1551_v57 = vld [vmem:[#allocation7 + $0xbb0] sm:$0xff] }
 0x11f   :  { %2108 = vmatpush.msra.mxu2 %v1515_v0  ;;  %1700 = vmatpush.msra.mxu0 %v1305_v16  ;;  %v1214_v0 = vld [vmem:[#allocation7 + $0x128] sm:$0xff]  ;;  %v1309_v16 = vld [vmem:[#allocation7 + $0x420] sm:$0xff] }
 0x120   :  { %2132 = vmatpush.msra.mxu3 %v1484_v60  ;;  %1804 = vmatpush.msrb.mxu1 %v1662_v49  ;;  %v1488_v60 = vld [vmem:[#allocation7 + $0x9b8] sm:$0xff]  ;;  %v1519_v49 = vld [vmem:[#allocation7 + $0xab0] sm:$0xff] }
 0x121   :  { %2109 = vmatpush.msra.mxu2 %v1483_v61  ;;  %1701 = vmatpush.msra.mxu0 %v1273_v32  ;;  %v1182_v61 = vld [vmem:[#allocation7 + $0x28] sm:$0xff] }
 0x122   :  { %2133 = vmatpush.msra.mxu3 %v1452_v23  ;;  %1805 = vmatpush.msrb.mxu1 %v1630_v63  ;;  %v1456_v23 = vld [vmem:[#allocation7 + $0x8b8] sm:$0xff]  ;;  %v1666_v32 = vld [vmem:[#allocation7 + $0xf48] sm:$0xff]  ;;  %v1487_v63 = vld [vmem:[#allocation7 + $0x9b0] sm:$0xff] }
 0x123   :  { %2110 = vmatpush.msra.mxu2 %v1451_v7  ;;  %1702 = vmatpush.msra.mxu0 %v1241_v13  ;;  %v1277_v7 = vld [vmem:[#allocation7 + $0x320] sm:$0xff]  ;;  %v1634_v13 = vld [vmem:[#allocation7 + $0xe48] sm:$0xff] }
 0x124   :  { %2134 = vmatpush.msra.mxu3 %v1420_v24  ;;  %1806 = vmatpush.msrb.mxu1 %v1598_v39  ;;  %v1424_v24 = vld [vmem:[#allocation7 + $0x7b8] sm:$0xff]  ;;  %v1455_v39 = vld [vmem:[#allocation7 + $0x8b0] sm:$0xff] }
 0x125   :  { %2111 = vmatpush.msra.mxu2 %v1419_v56  ;;  %1703 = vmatpush.msra.mxu0 %v1209_v42  ;;  %v1245_v56 = vld [vmem:[#allocation7 + $0x220] sm:$0xff]  ;;  %v1602_v42 = vld [vmem:[#allocation7 + $0xd48] sm:$0xff] }
 0x126   :  { %2135 = vmatpush.msra.mxu3 %v1388_v48  ;;  %1807 = vmatpush.msrb.mxu1 %v1566_v14  ;;  %v1392_v48 = vld [vmem:[#allocation7 + $0x6b8] sm:$0xff]  ;;  %v1423_v14 = vld [vmem:[#allocation7 + $0x7b0] sm:$0xff] }
 0x127   :  { %2112 = vmatpush.msra.mxu2 %v1387_v35  ;;  %1704 = vmatpush.msra.mxu0 %v1177_v8  ;;  %v1213_v35 = vld [vmem:[#allocation7 + $0x120] sm:$0xff]  ;;  %v1570_v8 = vld [vmem:[#allocation7 + $0xc48] sm:$0xff] }
 0x128   :  { %2136 = vmatpush.msra.mxu3 %v1356_v51  ;;  %1808 = vmatpush.msrb.mxu1 %v1534_v40  ;;  %v1360_v51 = vld [vmem:[#allocation7 + $0x5b8] sm:$0xff]  ;;  %v1391_v40 = vld [vmem:[#allocation7 + $0x6b0] sm:$0xff] }
 0x129   :  { %1781 = vmatpush.msrb.mxu0 %v1661_v20  ;;  %2113 = vmatpush.msra.mxu2 %v1355_v37  ;;  %v1181_v20 = vld [vmem:[#allocation7 + $0x20] sm:$0xff]  ;;  %v1328_v37 = vld [vmem:[#allocation7 + $0x4b8] sm:$0xff] }
 0x12a   :  { %2137 = vmatpush.msra.mxu3 %v1324_v38  ;;  %1809 = vmatpush.msrb.mxu1 %v1502_v6  ;;  %v1538_v38 = vld [vmem:[#allocation7 + $0xb48] sm:$0xff]  ;;  %v1665_v6 = vld [vmem:[#allocation7 + $0xf40] sm:$0xff] }
 0x12b   :  { %1782 = vmatpush.msrb.mxu0 %v1629_v28  ;;  %2114 = vmatpush.msra.mxu2 %v1323_v44  ;;  %v1359_v28 = vld [vmem:[#allocation7 + $0x5b0] sm:$0xff]  ;;  %v1506_v44 = vld [vmem:[#allocation7 + $0xa48] sm:$0xff] }
 0x12c   :  { %2138 = vmatpush.msra.mxu3 %v1292_v12  ;;  %1938 = vmatmul.f32.gmra.mxu2 %v4425_v22  ;;  %v1633_v12 = vld [vmem:[#allocation7 + $0xe40] sm:$0xff] }
 0x12d   :  { %1783 = vmatpush.msrb.mxu0 %v1597_v43  ;;  %1810 = vmatpush.msrb.mxu1 %v1470_v50  ;;  %v1327_v43 = vld [vmem:[#allocation7 + $0x4b0] sm:$0xff]  ;;  %v1296_v50 = vld [vmem:[#allocation7 + $0x3b8] sm:$0xff] }
 0x12e   :  { %2115 = vmatpush.msra.mxu2 %v1291_v55  ;;  %2139 = vmatpush.msra.mxu3 %v1260_v62  ;;  %v1601_v55 = vld [vmem:[#allocation7 + $0xd40] sm:$0xff]  ;;  %v1474_v62 = vld [vmem:[#allocation7 + $0x948] sm:$0xff] }
 0x12f   :  { %1784 = vmatpush.msrb.mxu0 %v1565_v58  ;;  %1811 = vmatpush.msrb.mxu1 %v1438_v1  ;;  %v1295_v58 = vld [vmem:[#allocation7 + $0x3b0] sm:$0xff]  ;;  %v1264_v1 = vld [vmem:[#allocation7 + $0x2b8] sm:$0xff] }
 0x130   :  { %2116 = vmatpush.msra.mxu2 %v1259_v3  ;;  %2140 = vmatpush.msra.mxu3 %v1228_v4  ;;  %v1569_v3 = vld [vmem:[#allocation7 + $0xc40] sm:$0xff]  ;;  %v1442_v4 = vld [vmem:[#allocation7 + $0x848] sm:$0xff] }
 0x131   :  { %1785 = vmatpush.msrb.mxu0 %v1533_v5  ;;  %1812 = vmatpush.msrb.mxu1 %v1406_v9  ;;  %v1263_v5 = vld [vmem:[#allocation7 + $0x2b0] sm:$0xff]  ;;  %v1232_v9 = vld [vmem:[#allocation7 + $0x1b8] sm:$0xff] }
 0x132   :  { %2117 = vmatpush.msra.mxu2 %v1227_v10  ;;  %2141 = vmatpush.msra.mxu3 %v1196_v11  ;;  %v1537_v10 = vld [vmem:[#allocation7 + $0xb40] sm:$0xff]  ;;  %v1410_v11 = vld [vmem:[#allocation7 + $0x748] sm:$0xff] }
 0x133   :  { %2050 = vmatmul.f32.vlgmr.msrb.gmra.mxu3 %v4428_v26  ;;  %1786 = vmatpush.msrb.mxu0 %v1501_v17  ;;  %v1231_v17 = vld [vmem:[#allocation7 + $0x1b0] sm:$0xff] }
 0x134   :  { %2218 = vmatpush.msrb.mxu3 %v1680_v15  ;;  %1813 = vmatpush.msrb.mxu1 %v1374_v21  ;;  %v1200_v15 = vld [vmem:[#allocation7 + $0xb8] sm:$0xff]  ;;  %v1505_v21 = vld [vmem:[#allocation7 + $0xa40] sm:$0xff] }
 0x135   :  { %2118 = vmatpush.msra.mxu2 %v1195_v25  ;;  %1787 = vmatpush.msrb.mxu0 %v1469_v18  ;;  %v1684_v25 = vld [vmem:[#allocation7 + $0xfd8] sm:$0xff]  ;;  %v1378_v18 = vld [vmem:[#allocation7 + $0x648] sm:$0xff] }
 0x136   :  { %2027 = vmatmul.f32.vlgmr.msrb.gmra.mxu2 %v4428_v26  ;;  %2219 = vmatpush.msrb.mxu3 %v1648_v19  ;;  %v1199_v19 = vld [vmem:[#allocation7 + $0xb0] sm:$0xff] }
 0x137   :  { %2195 = vmatpush.msrb.mxu2 %v1679_v27  ;;  %1814 = vmatpush.msrb.mxu1 %v1342_v29  ;;  %v1473_v27 = vld [vmem:[#allocation7 + $0x940] sm:$0xff]  ;;  %v1652_v29 = vld [vmem:[#allocation7 + $0xed8] sm:$0xff] }
 0x138   :  { %2220 = vmatpush.msrb.mxu3 %v1616_v34  ;;  %1788 = vmatpush.msrb.mxu0 %v1437_v36  ;;  %v1683_v34 = vld [vmem:[#allocation7 + $0xfd0] sm:$0xff]  ;;  %v1346_v36 = vld [vmem:[#allocation7 + $0x548] sm:$0xff] }
 0x139   :  { %2196 = vmatpush.msrb.mxu2 %v1647_v41  ;;  %1815 = vmatpush.msrb.mxu1 %v1310_v45  ;;  %v1620_v41 = vld [vmem:[#allocation7 + $0xdd8] sm:$0xff]  ;;  %v1441_v45 = vld [vmem:[#allocation7 + $0x840] sm:$0xff] }
 0x13a   :  { %2221 = vmatpush.msrb.mxu3 %v1584_v46  ;;  %1789 = vmatpush.msrb.mxu0 %v1405_v47  ;;  %v1651_v46 = vld [vmem:[#allocation7 + $0xed0] sm:$0xff]  ;;  %v1314_v47 = vld [vmem:[#allocation7 + $0x448] sm:$0xff] }
 0x13b   :  { %2197 = vmatpush.msrb.mxu2 %v1615_v52  ;;  %1816 = vmatpush.msrb.mxu1 %v1278_v53  ;;  %v1588_v52 = vld [vmem:[#allocation7 + $0xcd8] sm:$0xff]  ;;  %v1619_v53 = vld [vmem:[#allocation7 + $0xdd0] sm:$0xff] }
 0x13c   :  { %2222 = vmatpush.msrb.mxu3 %v1552_v59  ;;  %1790 = vmatpush.msrb.mxu0 %v1373_v2  ;;  %v1409_v59 = vld [vmem:[#allocation7 + $0x740] sm:$0xff]  ;;  %v1282_v2 = vld [vmem:[#allocation7 + $0x348] sm:$0xff] }
 0x13d   :  { %2198 = vmatpush.msrb.mxu2 %v1583_v30  ;;  %1817 = vmatpush.msrb.mxu1 %v1246_v31  ;;  %v1556_v30 = vld [vmem:[#allocation7 + $0xbd8] sm:$0xff]  ;;  %v1587_v31 = vld [vmem:[#allocation7 + $0xcd0] sm:$0xff] }
 0x13e   :  { %2223 = vmatpush.msrb.mxu3 %v1520_v33  ;;  %1791 = vmatpush.msrb.mxu0 %v1341_v54  ;;  %v1377_v33 = vld [vmem:[#allocation7 + $0x640] sm:$0xff]  ;;  %v1250_v54 = vld [vmem:[#allocation7 + $0x248] sm:$0xff] }
 0x13f   :  { %2199 = vmatpush.msrb.mxu2 %v1551_v57  ;;  %1818 = vmatpush.msrb.mxu1 %v1214_v0  ;;  %v1524_v57 = vld [vmem:[#allocation7 + $0xad8] sm:$0xff]  ;;  %v1555_v0 = vld [vmem:[#allocation7 + $0xbd0] sm:$0xff] }
 0x140   :  { %2224 = vmatpush.msrb.mxu3 %v1488_v60  ;;  %1792 = vmatpush.msrb.mxu0 %v1309_v16  ;;  %v1345_v60 = vld [vmem:[#allocation7 + $0x540] sm:$0xff]  ;;  %v1218_v16 = vld [vmem:[#allocation7 + $0x148] sm:$0xff] }
 0x141   :  { %2200 = vmatpush.msrb.mxu2 %v1519_v49  ;;  %1819 = vmatpush.msrb.mxu1 %v1182_v61  ;;  %v1492_v49 = vld [vmem:[#allocation7 + $0x9d8] sm:$0xff]  ;;  %v1523_v61 = vld [vmem:[#allocation7 + $0xad0] sm:$0xff] }
 0x142   :  { %1728 = vmatmul.f32.vlgmr.msra.gmra.mxu1 %v4428_v26  ;;  %2225 = vmatpush.msrb.mxu3 %v1456_v23  ;;  %v1313_v23 = vld [vmem:[#allocation7 + $0x440] sm:$0xff] }
 0x143   :  { %1896 = vmatpush.msra.mxu1 %v1666_v32  ;;  %2201 = vmatpush.msrb.mxu2 %v1487_v63  ;;  %v1186_v32 = vld [vmem:[#allocation7 + $0x48] sm:$0xff]  ;;  %v1491_v63 = vld [vmem:[#allocation7 + $0x9d0] sm:$0xff] }
 0x144   :  { %1793 = vmatpush.msrb.mxu0 %v1277_v7  ;;  %2226 = vmatpush.msrb.mxu3 %v1424_v24  ;;  %v1670_v7 = vld [vmem:[#allocation7 + $0xf68] sm:$0xff]  ;;  %v1460_v24 = vld [vmem:[#allocation7 + $0x8d8] sm:$0xff] }
 0x145   :  { %1897 = vmatpush.msra.mxu1 %v1634_v13  ;;  %2202 = vmatpush.msrb.mxu2 %v1455_v39  ;;  %v1281_v13 = vld [vmem:[#allocation7 + $0x340] sm:$0xff]  ;;  %v1459_v39 = vld [vmem:[#allocation7 + $0x8d0] sm:$0xff] }
 0x146   :  { %1794 = vmatpush.msrb.mxu0 %v1245_v56  ;;  %2227 = vmatpush.msrb.mxu3 %v1392_v48  ;;  %v1638_v56 = vld [vmem:[#allocation7 + $0xe68] sm:$0xff]  ;;  %v1428_v48 = vld [vmem:[#allocation7 + $0x7d8] sm:$0xff] }
 0x147   :  { %1898 = vmatpush.msra.mxu1 %v1602_v42  ;;  %2203 = vmatpush.msrb.mxu2 %v1423_v14  ;;  %v1249_v42 = vld [vmem:[#allocation7 + $0x240] sm:$0xff]  ;;  %v1427_v14 = vld [vmem:[#allocation7 + $0x7d0] sm:$0xff] }
 0x148   :  { %1795 = vmatpush.msrb.mxu0 %v1213_v35  ;;  %2228 = vmatpush.msrb.mxu3 %v1360_v51  ;;  %v1606_v35 = vld [vmem:[#allocation7 + $0xd68] sm:$0xff]  ;;  %v1396_v51 = vld [vmem:[#allocation7 + $0x6d8] sm:$0xff] }
 0x149   :  { %1899 = vmatpush.msra.mxu1 %v1570_v8  ;;  %2204 = vmatpush.msrb.mxu2 %v1391_v40  ;;  %v1217_v8 = vld [vmem:[#allocation7 + $0x140] sm:$0xff]  ;;  %v1395_v40 = vld [vmem:[#allocation7 + $0x6d0] sm:$0xff] }
 0x14a   :  { %1796 = vmatpush.msrb.mxu0 %v1181_v20  ;;  %2229 = vmatpush.msrb.mxu3 %v1328_v37  ;;  %v1574_v20 = vld [vmem:[#allocation7 + $0xc68] sm:$0xff]  ;;  %v1364_v37 = vld [vmem:[#allocation7 + $0x5d8] sm:$0xff] }
 0x14b   :  { %1705 = vmatmul.f32.vlgmr.msra.gmra.mxu0 %v4428_v26  ;;  %1900 = vmatpush.msra.mxu1 %v1538_v38  ;;  %v1185_v38 = vld [vmem:[#allocation7 + $0x40] sm:$0xff] }
 0x14c   :  { %1873 = vmatpush.msra.mxu0 %v1665_v6  ;;  %2205 = vmatpush.msrb.mxu2 %v1359_v28  ;;  %v1542_v6 = vld [vmem:[#allocation7 + $0xb68] sm:$0xff]  ;;  %v1669_v28 = vld [vmem:[#allocation7 + $0xf60] sm:$0xff] }
 0x14d   :  { %2053 = vmatmul.f32.gmra.mxu3 %v4425_v22  ;;  %1901 = vmatpush.msra.mxu1 %v1506_v44  ;;  %v1363_v44 = vld [vmem:[#allocation7 + $0x5d0] sm:$0xff] }
 0x14e   :  { %1874 = vmatpush.msra.mxu0 %v1633_v12  ;;  %2206 = vmatpush.msrb.mxu2 %v1327_v43  ;;  %v784_v12 = vpop.f32.mrf.mxu3  ;;  %v1332_v43 = vld [vmem:[#allocation7 + $0x4d8] sm:$0xff] }
 0x14f   :  { %2230 = vmatpush.msrb.mxu3 %v1296_v50  ;;  %2030 = vmatmul.f32.gmra.mxu2 %v4425_v22  ;;  %v1510_v50 = vld [vmem:[#allocation7 + $0xa68] sm:$0xff] }
 0x150   :  { %1875 = vmatpush.msra.mxu0 %v1601_v55  ;;  %1902 = vmatpush.msra.mxu1 %v1474_v62  ;;  %v1637_v55 = vld [vmem:[#allocation7 + $0xe60] sm:$0xff]  ;;  %v683_v62 = vpop.f32.mrf.mxu2 }
 0x151   :  { %2207 = vmatpush.msrb.mxu2 %v1295_v58  ;;  %2231 = vmatpush.msrb.mxu3 %v1264_v1  ;;  %v1331_v58 = vld [vmem:[#allocation7 + $0x4d0] sm:$0xff]  ;;  %v1300_v1 = vld [vmem:[#allocation7 + $0x3d8] sm:$0xff] }
 0x152   :  { %1876 = vmatpush.msra.mxu0 %v1569_v3  ;;  %1903 = vmatpush.msra.mxu1 %v1442_v4  ;;  %v785_v3 = vadd.f32 %v784_v12, %v683_v62  ;;  %v1605_v4 = vld [vmem:[#allocation7 + $0xd60] sm:$0xff]  ;;  %v1495_v12 = vld [vmem:[#allocation7 + $0x9f0] sm:$0xff] }
 0x153   :  { %2208 = vmatpush.msrb.mxu2 %v1263_v5  ;;  %2232 = vmatpush.msrb.mxu3 %v1232_v9  ;;  %v1478_v5 = vld [vmem:[#allocation7 + $0x968] sm:$0xff]  ;;  %v877_v9 = vpop.f32.mrf.mxu1  ;;  %v1285_v62 = vld [vmem:[#allocation7 + $0x360] sm:$0xff] }
 0x154   :  { %1877 = vmatpush.msra.mxu0 %v1537_v10  ;;  %1904 = vmatpush.msra.mxu1 %v1410_v11  ;;  %v838_v10 = vpop.f32.mrf.mxu0  ;;  %v1299_v11 = vld [vmem:[#allocation7 + $0x3d0] sm:$0xff] }
 0x155   :  { %2209 = vmatpush.msrb.mxu2 %v1231_v17  ;;  %2233 = vmatpush.msrb.mxu3 %v1200_v15  ;;  %v1268_v17 = vld [vmem:[#allocation7 + $0x2d8] sm:$0xff]  ;;  %v1573_v15 = vld [vmem:[#allocation7 + $0xc60] sm:$0xff] }
 0x156   :  { %2142 = vmatmul.f32.vlgmr.msra.gmra.mxu3 %v4428_v26  ;;  %1878 = vmatpush.msra.mxu0 %v1505_v21  ;;  %v1446_v21 = vld [vmem:[#allocation7 + $0x868] sm:$0xff] }
 0x157   :  { %2310 = vmatpush.msra.mxu3 %v1684_v25  ;;  %1905 = vmatpush.msra.mxu1 %v1378_v18  ;;  %v1267_v25 = vld [vmem:[#allocation7 + $0x2d0] sm:$0xff]  ;;  %v1236_v18 = vld [vmem:[#allocation7 + $0x1d8] sm:$0xff] }
 0x158   :  { %2210 = vmatpush.msrb.mxu2 %v1199_v19  ;;  %1879 = vmatpush.msra.mxu0 %v1473_v27  ;;  %v839_v19 = vadd.f32 %v838_v10, %v785_v3  ;;  %v1541_v27 = vld [vmem:[#allocation7 + $0xb60] sm:$0xff]  ;;  %v1432_v3 = vld [vmem:[#allocation7 + $0x7f8] sm:$0xff] }
 0x159   :  { %2119 = vmatmul.f32.vlgmr.msra.gmra.mxu2 %v4428_v26  ;;  %2311 = vmatpush.msra.mxu3 %v1652_v29  ;;  %v1414_v29 = vld [vmem:[#allocation7 + $0x768] sm:$0xff] }
 0x15a   :  { %2287 = vmatpush.msra.mxu2 %v1683_v34  ;;  %1906 = vmatpush.msra.mxu1 %v1346_v36  ;;  %v1235_v34 = vld [vmem:[#allocation7 + $0x1d0] sm:$0xff]  ;;  %v1204_v36 = vld [vmem:[#allocation7 + $0xd8] sm:$0xff] }
 0x15b   :  { %2312 = vmatpush.msra.mxu3 %v1620_v41  ;;  %1880 = vmatpush.msra.mxu0 %v1441_v45  ;;  %v1509_v41 = vld [vmem:[#allocation7 + $0xa60] sm:$0xff]  ;;  %v1688_v45 = vld [vmem:[#allocation7 + $0xff8] sm:$0xff] }
 0x15c   :  { %2288 = vmatpush.msra.mxu2 %v1651_v46  ;;  %1907 = vmatpush.msra.mxu1 %v1314_v47  ;;  %v1382_v46 = vld [vmem:[#allocation7 + $0x668] sm:$0xff]  ;;  %v878_v47 = vadd.f32 %v877_v9, %v839_v19  ;;  %v1399_v19 = vld [vmem:[#allocation7 + $0x6f0] sm:$0xff] }
 0x15d   :  { %1731 = vmatmul.f32.gmra.mxu1 %v4425_v22  ;;  %2313 = vmatpush.msra.mxu3 %v1588_v52  ;;  %v1477_v52 = vld [vmem:[#allocation7 + $0x960] sm:$0xff]  ;;  %v1610_v9 = vld [vmem:[#allocation7 + $0xd88] sm:$0xff] }
 0x15e   :  { %2289 = vmatpush.msra.mxu2 %v1619_v53  ;;  %1881 = vmatpush.msra.mxu0 %v1409_v59  ;;  %v946_v53 = vpop.f32.mrf.mxu2  ;;  %v1203_v59 = vld [vmem:[#allocation7 + $0xd0] sm:$0xff] }
 0x15f   :  { %1908 = vmatpush.msra.mxu1 %v1282_v2  ;;  %2314 = vmatpush.msra.mxu3 %v1556_v30  ;;  %v1656_v2 = vld [vmem:[#allocation7 + $0xef8] sm:$0xff]  ;;  %v1687_v30 = vld [vmem:[#allocation7 + $0xff0] sm:$0xff] }
 0x160   :  { %2290 = vmatpush.msra.mxu2 %v1587_v31  ;;  %1882 = vmatpush.msra.mxu0 %v1377_v33  ;;  %v1350_v31 = vld [vmem:[#allocation7 + $0x568] sm:$0xff] }
 0x161   :  { %1909 = vmatpush.msra.mxu1 %v1250_v54  ;;  %2315 = vmatpush.msra.mxu3 %v1524_v57  ;;  %v1624_v57 = vld [vmem:[#allocation7 + $0xdf8] sm:$0xff] }
 0x162   :  { %2291 = vmatpush.msra.mxu2 %v1555_v0  ;;  %1883 = vmatpush.msra.mxu0 %v1345_v60  ;;  %v1445_v0 = vld [vmem:[#allocation7 + $0x860] sm:$0xff]  ;;  %v947_v60 = vadd.f32 %v946_v53, %v878_v47  ;;  %v1514_v47 = vld [vmem:[#allocation7 + $0xa88] sm:$0xff]  ;;  %v1335_v53 = vld [vmem:[#allocation7 + $0x4f0] sm:$0xff] }
 0x163   :  { %1910 = vmatpush.msra.mxu1 %v1218_v16  ;;  %2316 = vmatpush.msra.mxu3 %v1492_v49  ;;  %v1655_v16 = vld [vmem:[#allocation7 + $0xef0] sm:$0xff]  ;;  %v1318_v49 = vld [vmem:[#allocation7 + $0x468] sm:$0xff] }
 0x164   :  { %2292 = vmatpush.msra.mxu2 %v1523_v61  ;;  %1884 = vmatpush.msra.mxu0 %v1313_v23  ;;  %v983_v61 = vpop.f32.mrf.mxu3  ;;  %v1592_v23 = vld [vmem:[#allocation7 + $0xcf8] sm:$0xff] }
 0x165   :  { %1911 = vmatpush.msra.mxu1 %v1186_v32  ;;  %1708 = vmatmul.f32.gmra.mxu0 %v4425_v22  ;;  %v1623_v32 = vld [vmem:[#allocation7 + $0xdf0] sm:$0xff] }
 0x166   :  { %1820 = vmatmul.f32.vlgmr.msrb.gmra.mxu1 %v4428_v26  ;;  %2293 = vmatpush.msra.mxu2 %v1491_v63  ;;  %v1413_v63 = vld [vmem:[#allocation7 + $0x760] sm:$0xff] }
 0x167   :  { %1988 = vmatpush.msrb.mxu1 %v1670_v7  ;;  %2317 = vmatpush.msra.mxu3 %v1460_v24  ;;  %v1286_v7 = vld [vmem:[#allocation7 + $0x368] sm:$0xff]  ;;  %v984_v24 = vadd.f32 %v983_v61, %v947_v60  ;;  %v1271_v60 = vld [vmem:[#allocation7 + $0x2f0] sm:$0xff] }
 0x168   :  { %1885 = vmatpush.msra.mxu0 %v1281_v13  ;;  %2294 = vmatpush.msra.mxu2 %v1459_v39  ;;  %v1591_v13 = vld [vmem:[#allocation7 + $0xcf0] sm:$0xff]  ;;  %v1560_v39 = vld [vmem:[#allocation7 + $0xbf8] sm:$0xff]  ;;  %v1418_v61 = vld [vmem:[#allocation7 + $0x788] sm:$0xff] }
 0x169   :  { %1989 = vmatpush.msrb.mxu1 %v1638_v56  ;;  %2318 = vmatpush.msra.mxu3 %v1428_v48  ;;  %v1381_v56 = vld [vmem:[#allocation7 + $0x660] sm:$0xff]  ;;  %v1254_v48 = vld [vmem:[#allocation7 + $0x268] sm:$0xff] }
 0x16a   :  { %1886 = vmatpush.msra.mxu0 %v1249_v42  ;;  %2295 = vmatpush.msra.mxu2 %v1427_v14  ;;  %v1528_v14 = vld [vmem:[#allocation7 + $0xaf8] sm:$0xff] }
 0x16b   :  { %1990 = vmatpush.msrb.mxu1 %v1606_v35  ;;  %2319 = vmatpush.msra.mxu3 %v1396_v51  ;;  %v1559_v35 = vld [vmem:[#allocation7 + $0xbf0] sm:$0xff]  ;;  %v1349_v51 = vld [vmem:[#allocation7 + $0x560] sm:$0xff] }
 0x16c   :  { %1887 = vmatpush.msra.mxu0 %v1217_v8  ;;  %2296 = vmatpush.msra.mxu2 %v1395_v40  ;;  %v1222_v40 = vld [vmem:[#allocation7 + $0x168] sm:$0xff] }
 0x16d   :  { %1991 = vmatpush.msrb.mxu1 %v1574_v20  ;;  %2320 = vmatpush.msra.mxu3 %v1364_v37  ;;  %v1496_v20 = vld [vmem:[#allocation7 + $0x9f8] sm:$0xff] }
 0x16e   :  { %1888 = vmatpush.msra.mxu0 %v1185_v38  ;;  %2145 = vmatmul.f32.gmra.mxu3 %v4425_v22  ;;  %v1527_v38 = vld [vmem:[#allocation7 + $0xaf0] sm:$0xff] }
 0x16f   :  { %1797 = vmatmul.f32.vlgmr.msrb.gmra.mxu0 %v4428_v26  ;;  %1992 = vmatpush.msrb.mxu1 %v1542_v6  ;;  %v1317_v6 = vld [vmem:[#allocation7 + $0x460] sm:$0xff] }
 0x170   :  { %1965 = vmatpush.msrb.mxu0 %v1669_v28  ;;  %2297 = vmatpush.msra.mxu2 %v1363_v44  ;;  %v1190_v44 = vld [vmem:[#allocation7 + $0x68] sm:$0xff] }
 0x171   :  { %2321 = vmatpush.msra.mxu3 %v1332_v43  ;;  %1993 = vmatpush.msrb.mxu1 %v1510_v50  ;;  %v1056_v33 = vpop.f32.mrf.mxu1  ;;  %v1674_v50 = vld [vmem:[#allocation7 + $0xf88] sm:$0xff] }
 0x172   :  { %1966 = vmatpush.msrb.mxu0 %v1637_v55  ;;  %2122 = vmatmul.f32.gmra.mxu2 %v4425_v22  ;;  %v1464_v55 = vld [vmem:[#allocation7 + $0x8f8] sm:$0xff] }
 0x173   :  { %2298 = vmatpush.msra.mxu2 %v1331_v58  ;;  %2322 = vmatpush.msra.mxu3 %v1300_v1  ;;  %v1642_v58 = vld [vmem:[#allocation7 + $0xe88] sm:$0xff]  ;;  %v1463_v1 = vld [vmem:[#allocation7 + $0x8f0] sm:$0xff] }
 0x174   :  { %1967 = vmatpush.msrb.mxu0 %v1605_v4  ;;  %1994 = vmatpush.msrb.mxu1 %v1478_v5  ;;  %v1253_v4 = vld [vmem:[#allocation7 + $0x260] sm:$0xff] }
 0x175   :  { %2299 = vmatpush.msra.mxu2 %v1299_v11  ;;  %2323 = vmatpush.msra.mxu3 %v1268_v17  ;;  %v1431_v11 = vld [vmem:[#allocation7 + $0x7f0] sm:$0xff]  ;;  %v1400_v17 = vld [vmem:[#allocation7 + $0x6f8] sm:$0xff] }
 0x176   :  { %1968 = vmatpush.msrb.mxu0 %v1573_v15  ;;  %1995 = vmatpush.msrb.mxu1 %v1446_v21  ;;  %v1221_v21 = vld [vmem:[#allocation7 + $0x160] sm:$0xff] }
 0x177   :  { %2300 = vmatpush.msra.mxu2 %v1267_v25  ;;  %2324 = vmatpush.msra.mxu3 %v1236_v18  ;;  %v1578_v25 = vld [vmem:[#allocation7 + $0xc88] sm:$0xff] }
 0x178   :  { %1969 = vmatpush.msrb.mxu0 %v1541_v27  ;;  %1996 = vmatpush.msrb.mxu1 %v1414_v29  ;;  %v1368_v27 = vld [vmem:[#allocation7 + $0x5f8] sm:$0xff] }
 0x179   :  { %2234 = vmatmul.f32.vlgmr.msrb.gmra.mxu3 %v4428_v26  ;;  %2301 = vmatpush.msra.mxu2 %v1235_v34  ;;  %v1015_v54 = vpop.f32.mrf.mxu0  ;;  %v1189_v34 = vld [vmem:[#allocation7 + $0x60] sm:$0xff] }
 0x17a   :  { %2325 = vmatpush.msra.mxu3 %v1204_v36  ;;  %1970 = vmatpush.msrb.mxu0 %v1509_v41  ;;  %v1016_v42 = vadd.f32 %v1015_v54, %v984_v24  ;;  %v1113_v37 = vpop.f32.mrf.mxu1  ;;  %v1546_v36 = vld [vmem:[#allocation7 + $0xb88] sm:$0xff]  ;;  %v1367_v41 = vld [vmem:[#allocation7 + $0x5f0] sm:$0xff]  ;;  %v4456_v54 = vpop.f32.mrf.mxu3 }
 0x17b   :  { %1997 = vmatpush.msrb.mxu1 %v1382_v46  ;;  %2211 = vmatmul.f32.vlgmr.msrb.gmra.mxu2 %v4428_v26  ;;  %v1336_v46 = vld [vmem:[#allocation7 + $0x4f8] sm:$0xff]  ;;  %v1386_v24 = vld [vmem:[#allocation7 + $0x688] sm:$0xff] }
 0x17c   :  { %2402 = vmatpush.msrb.mxu3 %v1688_v45  ;;  %1971 = vmatpush.msrb.mxu0 %v1477_v52  ;;  %v1057_v28 = vadd.f32 %v1056_v33, %v1016_v42  ;;  %v1673_v45 = vld [vmem:[#allocation7 + $0xf80] sm:$0xff]  ;;  %v1272_v33 = vld [vmem:[#allocation7 + $0x2f8] sm:$0xff] }
 0x17d   :  { %2302 = vmatpush.msra.mxu2 %v1203_v59  ;;  %1998 = vmatpush.msrb.mxu1 %v1350_v31  ;;  %v1641_v52 = vld [vmem:[#allocation7 + $0xe80] sm:$0xff]  ;;  %v1304_v59 = vld [vmem:[#allocation7 + $0x3f8] sm:$0xff]  ;;  %v1303_v31 = vld [vmem:[#allocation7 + $0x3f0] sm:$0xff] }
 0x17e   :  { %2403 = vmatpush.msrb.mxu3 %v1656_v2  ;;  %1972 = vmatpush.msrb.mxu0 %v1445_v0  ;;  %v1609_v2 = vld [vmem:[#allocation7 + $0xd80] sm:$0xff]  ;;  %v1450_v0 = vld [vmem:[#allocation7 + $0x888] sm:$0xff] }
 0x17f   :  { %2379 = vmatpush.msrb.mxu2 %v1687_v30  ;;  %1999 = vmatpush.msrb.mxu1 %v1318_v49  ;;  %v1482_v30 = vld [vmem:[#allocation7 + $0x988] sm:$0xff]  ;;  %v1545_v49 = vld [vmem:[#allocation7 + $0xb80] sm:$0xff] }
 0x180   :  { %2404 = vmatpush.msrb.mxu3 %v1624_v57  ;;  %1823 = vmatmul.f32.gmra.mxu1 %v4425_v22  ;;  %v1577_v57 = vld [vmem:[#allocation7 + $0xc80] sm:$0xff] }
 0x181   :  { %2380 = vmatpush.msrb.mxu2 %v1655_v16  ;;  %1973 = vmatpush.msrb.mxu0 %v1413_v63  ;;  %v1240_v16 = vld [vmem:[#allocation7 + $0x1f8] sm:$0xff]  ;;  %v1449_v42 = vld [vmem:[#allocation7 + $0x880] sm:$0xff] }
 0x182   :  { %2405 = vmatpush.msrb.mxu3 %v1592_v23  ;;  %2000 = vmatpush.msrb.mxu1 %v1286_v7  ;;  %v4459_v23 = vpop.f32.mrf.mxu2  ;;  %v1208_v63 = vld [vmem:[#allocation7 + $0xf8] sm:$0xff]  ;;  %v1513_v7 = vld [vmem:[#allocation7 + $0xa80] sm:$0xff] }
 0x183   :  { %2381 = vmatpush.msrb.mxu2 %v1623_v32  ;;  %2237 = vmatmul.f32.gmra.mxu3 %v4425_v22  ;;  %v1086_v8 = vpop.f32.mrf.mxu0  ;;  %v1239_v32 = vld [vmem:[#allocation7 + $0x1f0] sm:$0xff] }
 0x184   :  { %2406 = vmatpush.msrb.mxu3 %v1560_v39  ;;  %1974 = vmatpush.msrb.mxu0 %v1381_v56  ;;  %v1087_v43 = vadd.f32 %v1086_v8, %v1057_v28  ;;  %v1171_v18 = vpop.f32.mrf.mxu1  ;;  %v1481_v39 = vld [vmem:[#allocation7 + $0x980] sm:$0xff]  ;;  %v1354_v56 = vld [vmem:[#allocation7 + $0x588] sm:$0xff] }
 0x185   :  { %2382 = vmatpush.msrb.mxu2 %v1591_v13  ;;  %2001 = vmatpush.msrb.mxu1 %v1254_v48  ;;  %v1207_v13 = vld [vmem:[#allocation7 + $0xf0] sm:$0xff]  ;;  %v2654_v48 = vld [vmem:[#allocation9 + $0x318] sm:$0xff]  ;;  %v1417_v8 = vld [vmem:[#allocation7 + $0x780] sm:$0xff] }
 0x186   :  { %2214 = vmatmul.f32.gmra.mxu2 %v4425_v22  ;;  %2407 = vmatpush.msrb.mxu3 %v1528_v14  ;;  %v1114_v5 = vadd.f32 %v1113_v37, %v1087_v43  ;;  %v1322_v14 = vld [vmem:[#allocation7 + $0x488] sm:$0xff]  ;;  %v2621_v37 = vld [vmem:[#allocation9 + $0x210] sm:$0xff] }
 0x187   :  { %2383 = vmatpush.msrb.mxu2 %v1559_v35  ;;  %1975 = vmatpush.msrb.mxu0 %v1349_v51  ;;  %v2653_v35 = vld [vmem:[#allocation9 + $0x310] sm:$0xff]  ;;  %v4463_v51 = vpop.f32.mrf.mxu3  ;;  %v1258_v28 = vld [vmem:[#allocation7 + $0x288] sm:$0xff] }
 0x188   :  { %2002 = vmatpush.msrb.mxu1 %v1222_v40  ;;  %2408 = vmatpush.msrb.mxu3 %v1496_v20  ;;  %v2622_v40 = vld [vmem:[#allocation9 + $0x218] sm:$0xff]  ;;  %v1290_v20 = vld [vmem:[#allocation7 + $0x388] sm:$0xff] }
 0x189   :  { %2384 = vmatpush.msrb.mxu2 %v1527_v38  ;;  %1976 = vmatpush.msrb.mxu0 %v1317_v6  ;;  %v1385_v38 = vld [vmem:[#allocation7 + $0x680] sm:$0xff]  ;;  %v1226_v43 = vld [vmem:[#allocation7 + $0x188] sm:$0xff] }
 0x18a   :  { %2003 = vmatpush.msrb.mxu1 %v1190_v44  ;;  %1800 = vmatmul.f32.gmra.mxu0 %v4425_v22  ;;  %v4466_v6 = vpop.f32.mrf.mxu2  ;;  %v2590_v44 = vld [vmem:[#allocation9 + $0x118] sm:$0xff] }
 0x18b   :  { %1912 = vmatmul.f32.vlgmr.msra.gmra.mxu1 %v4428_v26  ;;  %2385 = vmatpush.msrb.mxu2 %v1495_v12  ;;  %v1353_v12 = vld [vmem:[#allocation7 + $0x580] sm:$0xff] }
 0x18c   :  { %2080 = vmatpush.msra.mxu1 %v1674_v50  ;;  %2409 = vmatpush.msrb.mxu3 %v1464_v55  ;;  %v1321_v50 = vld [vmem:[#allocation7 + $0x480] sm:$0xff]  ;;  %v1194_v55 = vld [vmem:[#allocation7 + $0x88] sm:$0xff] }
 0x18d   :  { %1977 = vmatpush.msrb.mxu0 %v1285_v62  ;;  %2326 = vmatmul.f32.vlgmr.msra.gmra.mxu3 %v4428_v26  ;;  %v1146_v10 = vpop.f32.mrf.mxu0  ;;  %v2589_v62 = vld [vmem:[#allocation9 + $0x110] sm:$0xff] }
 0x18e   :  { %2081 = vmatpush.msra.mxu1 %v1642_v58  ;;  %2386 = vmatpush.msrb.mxu2 %v1463_v1  ;;  %v1147_v15 = vadd.f32 %v1146_v10, %v1114_v5  ;;  %v1678_v58 = vld [vmem:[#allocation7 + $0xfa8] sm:$0xff]  ;;  %v1289_v1 = vld [vmem:[#allocation7 + $0x380] sm:$0xff] }
 0x18f   :  { %2410 = vmatpush.msrb.mxu3 %v1432_v3  ;;  %1978 = vmatpush.msrb.mxu0 %v1253_v4  ;;  %v2558_v3 = vld [vmem:[#allocation9 + $0x18] sm:$0xff]  ;;  %v2557_v4 = vld [vmem:[#allocation9 + $0x10] sm:$0xff]  ;;  %v4472_v5 = vpop.f32.mrf.mxu3  ;;  %v1646_v10 = vld [vmem:[#allocation7 + $0xea8] sm:$0xff] }
 0x190   :  { %2303 = vmatmul.f32.vlgmr.msra.gmra.mxu2 %v4428_v26  ;;  %2082 = vmatpush.msra.mxu1 %v1610_v9  ;;  %v1172_v29 = vadd.f32 %v1171_v18, %v1147_v15  ;;  %v4474_v9 = vld [vmem:[#allocation3] sm:$0xff] }
 0x191   :  { %2387 = vmatpush.msrb.mxu2 %v1431_v11  ;;  %2411 = vmatpush.msrb.mxu3 %v1400_v17  ;;  %v1257_v11 = vld [vmem:[#allocation7 + $0x280] sm:$0xff]  ;;  %v2658_v17 = vld [vmem:[#allocation9 + $0x338] sm:$0xff] }
 0x192   :  { %1979 = vmatpush.msrb.mxu0 %v1221_v21  ;;  %2083 = vmatpush.msra.mxu1 %v1578_v25  ;;  %1174 = vst.msk [vmem:[#allocation2] sm:$0xff] %vm88_vm0, %v1172_v29  ;;  %v4476_v15 = vpop.f32.mrf.mxu2  ;;  %v2657_v21 = vld [vmem:[#allocation9 + $0x330] sm:$0xff]  ;;  %v1582_v25 = vld [vmem:[#allocation7 + $0xca8] sm:$0xff]  ;;  %v1193_v18 = vld [vmem:[#allocation7 + $0x80] sm:$0xff] }
 0x193   :  { %2388 = vmatpush.msrb.mxu2 %v1399_v19  ;;  %2412 = vmatpush.msrb.mxu3 %v1368_v27  ;;  %v2626_v19 = vld [vmem:[#allocation9 + $0x238] sm:$0xff]  ;;  %v1677_v27 = vld [vmem:[#allocation7 + $0xfa0] sm:$0xff]  ;;  %v1550_v29 = vld [vmem:[#allocation7 + $0xba8] sm:$0xff] }
 0x194   :  { %1980 = vmatpush.msrb.mxu0 %v1189_v34  ;;  %2084 = vmatpush.msra.mxu1 %v1546_v36  ;;  %v4482_v34 = vld [vmem:[#allocation4] sm:$0xff] }
 0x195   :  { %1889 = vmatmul.f32.vlgmr.msra.gmra.mxu0 %v4428_v26  ;;  %2389 = vmatpush.msrb.mxu2 %v1367_v41  ;;  %v2625_v36 = vld [vmem:[#allocation9 + $0x230] sm:$0xff]  ;;  %v2594_v41 = vld [vmem:[#allocation9 + $0x138] sm:$0xff] }
 0x196   :  { %2057 = vmatpush.msra.mxu0 %v1673_v45  ;;  %2413 = vmatpush.msrb.mxu3 %v1336_v46  ;;  %v1645_v45 = vld [vmem:[#allocation7 + $0xea0] sm:$0xff]  ;;  %v1518_v46 = vld [vmem:[#allocation7 + $0xaa8] sm:$0xff] }
 0x197   :  { %2329 = vmatmul.f32.gmra.mxu3 %v4425_v22  ;;  %2085 = vmatpush.msra.mxu1 %v1514_v47  ;;  %v2593_v47 = vld [vmem:[#allocation9 + $0x130] sm:$0xff] }
 0x198   :  { %2058 = vmatpush.msra.mxu0 %v1641_v52  ;;  %2390 = vmatpush.msrb.mxu2 %v1335_v53  ;;  %v4485_v52 = vpop.f32.mrf.mxu3  ;;  %v1613_v53 = vld [vmem:[#allocation7 + $0xda0] sm:$0xff] }
 0x199   :  { %2414 = vmatpush.msrb.mxu3 %v1304_v59  ;;  %2306 = vmatmul.f32.gmra.mxu2 %v4425_v22  ;;  %v1486_v59 = vld [vmem:[#allocation7 + $0x9a8] sm:$0xff] }
 0x19a   :  { %2059 = vmatpush.msra.mxu0 %v1609_v2  ;;  %2086 = vmatpush.msra.mxu1 %v1482_v30  ;;  %v4487_v2 = vld [vmem:[#allocation3 + $0x8] sm:$0xff]  ;;  %v2562_v30 = vld [vmem:[#allocation9 + $0x38] sm:$0xff] }
 0x19b   :  { %2391 = vmatpush.msrb.mxu2 %v1303_v31  ;;  %2415 = vmatpush.msrb.mxu3 %v1272_v33  ;;  %v1581_v31 = vld [vmem:[#allocation7 + $0xca0] sm:$0xff]  ;;  %v1454_v33 = vld [vmem:[#allocation7 + $0x8a8] sm:$0xff] }
 0x19c   :  { %2060 = vmatpush.msra.mxu0 %v1577_v57  ;;  %2087 = vmatpush.msra.mxu1 %v1450_v0  ;;  %v4491_v57 = vpop.f32.mrf.mxu2  ;;  %v2561_v0 = vld [vmem:[#allocation9 + $0x30] sm:$0xff] }
 0x19d   :  { %2392 = vmatpush.msrb.mxu2 %v1271_v60  ;;  %2416 = vmatpush.msrb.mxu3 %v1240_v16  ;;  %v1549_v60 = vld [vmem:[#allocation7 + $0xba0] sm:$0xff]  ;;  %v1422_v16 = vld [vmem:[#allocation7 + $0x7a8] sm:$0xff] }
 0x19e   :  { %2061 = vmatpush.msra.mxu0 %v1545_v49  ;;  %2088 = vmatpush.msra.mxu1 %v1418_v61  ;;  %v2662_v49 = vld [vmem:[#allocation9 + $0x358] sm:$0xff]  ;;  %v2661_v61 = vld [vmem:[#allocation9 + $0x350] sm:$0xff] }
 0x19f   :  { %2393 = vmatpush.msrb.mxu2 %v1239_v32  ;;  %2417 = vmatpush.msrb.mxu3 %v1208_v63  ;;  %v1517_v32 = vld [vmem:[#allocation7 + $0xaa0] sm:$0xff]  ;;  %v1390_v63 = vld [vmem:[#allocation7 + $0x6a8] sm:$0xff] }
 0x1a0   :  { %2418 = vmatmul.f32.vlgmr.msrb.gmra.mxu3 %v4428_v26  ;;  %2062 = vmatpush.msra.mxu0 %v1513_v7  ;;  %v4495_v7 = vld [vmem:[#allocation4 + $0x8] sm:$0xff] }
 0x1a1   :  { %2089 = vmatpush.msra.mxu1 %v1386_v24  ;;  %2394 = vmatpush.msrb.mxu2 %v1207_v13  ;;  %v1485_v24 = vld [vmem:[#allocation7 + $0x9a0] sm:$0xff]  ;;  %v1358_v13 = vld [vmem:[#allocation7 + $0x5a8] sm:$0xff] }
 0x1a2   :  { %2395 = vmatmul.f32.vlgmr.msrb.gmra.mxu2 %v4428_v26  ;;  %2063 = vmatpush.msra.mxu0 %v1481_v39 }
 0x1a3   :  { %2090 = vmatpush.msra.mxu1 %v1354_v56  ;;  %2770 = vmatpush.msra.mxu3 %v2654_v48  ;;  %v2630_v56 = vld [vmem:[#allocation9 + $0x258] sm:$0xff]  ;;  %v4498_v48 = vpop.f32.mrf.mxu3 }
 0x1a4   :  { %2064 = vmatpush.msra.mxu0 %v1449_v42  ;;  %1915 = vmatmul.f32.gmra.mxu1 %v4425_v22  ;;  %v1453_v42 = vld [vmem:[#allocation7 + $0x8a0] sm:$0xff] }
 0x1a5   :  { %2091 = vmatpush.msra.mxu1 %v1322_v14  ;;  %2747 = vmatpush.msra.mxu2 %v2653_v35  ;;  %v1326_v14 = vld [vmem:[#allocation7 + $0x4a8] sm:$0xff]  ;;  %v2629_v35 = vld [vmem:[#allocation9 + $0x250] sm:$0xff] }
 0x1a6   :  { %2065 = vmatpush.msra.mxu0 %v1417_v8  ;;  %2771 = vmatpush.msra.mxu3 %v2622_v40  ;;  %v1421_v8 = vld [vmem:[#allocation7 + $0x7a0] sm:$0xff]  ;;  %v1294_v40 = vld [vmem:[#allocation7 + $0x3a8] sm:$0xff] }
 0x1a7   :  { %2092 = vmatpush.msra.mxu1 %v1290_v20  ;;  %2748 = vmatpush.msra.mxu2 %v2621_v37  ;;  %v4505_v20 = vpop.f32.mrf.mxu2  ;;  %v2598_v37 = vld [vmem:[#allocation9 + $0x158] sm:$0xff] }
 0x1a8   :  { %2421 = vmatmul.f32.gmra.mxu3 %v4425_v22  ;;  %2066 = vmatpush.msra.mxu0 %v1385_v38  ;;  %v2597_v38 = vld [vmem:[#allocation9 + $0x150] sm:$0xff] }
 0x1a9   :  { %2093 = vmatpush.msra.mxu1 %v1258_v28  ;;  %2772 = vmatpush.msra.mxu3 %v2590_v44  ;;  %v1389_v28 = vld [vmem:[#allocation7 + $0x6a0] sm:$0xff]  ;;  %v1262_v44 = vld [vmem:[#allocation7 + $0x2a8] sm:$0xff] }
 0x1aa   :  { %2398 = vmatmul.f32.gmra.mxu2 %v4425_v22  ;;  %2067 = vmatpush.msra.mxu0 %v1353_v12  ;;  %v2565_v12 = vld [vmem:[#allocation9 + $0x50] sm:$0xff] }
 0x1ab   :  { %2094 = vmatpush.msra.mxu1 %v1226_v43  ;;  %1892 = vmatmul.f32.gmra.mxu0 %v4425_v22  ;;  %v1614_v22 = vld [vmem:[#allocation7 + $0xda8] sm:$0xff]  ;;  %v1357_v43 = vld [vmem:[#allocation7 + $0x5a0] sm:$0xff] }
 0x1ac   :  { %2068 = vmatpush.msra.mxu0 %v1321_v50  ;;  %2004 = vmatmul.f32.vlgmr.msrb.gmra.mxu1 %v4428_v26  ;;  %v1225_v26 = vld [vmem:[#allocation7 + $0x180] sm:$0xff]  ;;  %v1230_v50 = vld [vmem:[#allocation7 + $0x1a8] sm:$0xff] }
 0x1ad   :  { %2095 = vmatpush.msra.mxu1 %v1194_v55  ;;  %2749 = vmatpush.msra.mxu2 %v2589_v62  ;;  %v2566_v55 = vld [vmem:[#allocation9 + $0x58] sm:$0xff] }
 0x1ae   :  { %2069 = vmatpush.msra.mxu0 %v1289_v1  ;;  %2773 = vmatpush.msra.mxu3 %v2558_v3  ;;  %v1198_v1 = vld [vmem:[#allocation7 + $0xa8] sm:$0xff] }
 0x1af   :  { %2172 = vmatpush.msrb.mxu1 %v1678_v58  ;;  %2750 = vmatpush.msra.mxu2 %v2557_v4  ;;  %v1325_v58 = vld [vmem:[#allocation7 + $0x4a0] sm:$0xff]  ;;  %v1682_v3 = vld [vmem:[#allocation7 + $0xfc8] sm:$0xff]  ;;  %v4510_v4 = vpop.f32.mrf.mxu3 }
 0x1b0   :  { %3580 = vmatmul.msk.f32.vlgmr.msra.gmra.mxu3 %vm88_vm0, %v4474_v9  ;;  %2070 = vmatpush.msra.mxu0 %v1257_v11  ;;  %v2666_v11 = vld [vmem:[#allocation9 + $0x378] sm:$0xff] }
 0x1b1   :  { %2173 = vmatpush.msrb.mxu1 %v1646_v10  ;;  %2862 = vmatpush.msrb.mxu3 %v2658_v17  ;;  %v1293_v10 = vld [vmem:[#allocation7 + $0x3a0] sm:$0xff]  ;;  %v1650_v17 = vld [vmem:[#allocation7 + $0xec8] sm:$0xff] }
 0x1b2   :  { %3578 = vmatmul.msk.f32.vlgmr.msra.gmra.mxu2 %vm88_vm0, %v4474_v9  ;;  %2071 = vmatpush.msra.mxu0 %v1225_v26  ;;  %v1261_v26 = vld [vmem:[#allocation7 + $0x2a0] sm:$0xff] }
 0x1b3   :  { %2174 = vmatpush.msrb.mxu1 %v1614_v22  ;;  %2839 = vmatpush.msrb.mxu2 %v2657_v21  ;;  %v2665_v22 = vld [vmem:[#allocation9 + $0x370] sm:$0xff]  ;;  %v2634_v21 = vld [vmem:[#allocation9 + $0x278] sm:$0xff] }
 0x1b4   :  { %1981 = vmatmul.f32.vlgmr.msrb.gmra.mxu0 %v4482_v34  ;;  %2863 = vmatpush.msrb.mxu3 %v2626_v19  ;;  %v1229_v19 = vld [vmem:[#allocation7 + $0x1a0] sm:$0xff] }
 0x1b5   :  { %2175 = vmatpush.msrb.mxu1 %v1582_v25  ;;  %2072 = vmatpush.msra.mxu0 %v1193_v18  ;;  %v4515_v25 = vpop.f32.mrf.mxu2  ;;  %v1618_v18 = vld [vmem:[#allocation7 + $0xdc8] sm:$0xff] }
 0x1b6   :  { %2840 = vmatpush.msrb.mxu2 %v2625_v36  ;;  %2864 = vmatpush.msrb.mxu3 %v2594_v41  ;;  %v1197_v36 = vld [vmem:[#allocation7 + $0xa0] sm:$0xff]  ;;  %v2602_v41 = vld [vmem:[#allocation9 + $0x178] sm:$0xff] }
 0x1b7   :  { %2149 = vmatpush.msrb.mxu0 %v1677_v27  ;;  %2176 = vmatpush.msrb.mxu1 %v1550_v29  ;;  %v2633_v27 = vld [vmem:[#allocation9 + $0x270] sm:$0xff]  ;;  %v1586_v29 = vld [vmem:[#allocation7 + $0xcc8] sm:$0xff] }
 0x1b8   :  { %3581 = vmatmul.msk.f32.gmra.mxu3 %vm88_vm0, %v4487_v2  ;;  %2841 = vmatpush.msrb.mxu2 %v2593_v47  ;;  %v2601_v47 = vld [vmem:[#allocation9 + $0x170] sm:$0xff] }
 0x1b9   :  { %2150 = vmatpush.msrb.mxu0 %v1645_v45  ;;  %2177 = vmatpush.msrb.mxu1 %v1518_v46  ;;  %v1681_v45 = vld [vmem:[#allocation7 + $0xfc0] sm:$0xff]  ;;  %v1554_v46 = vld [vmem:[#allocation7 + $0xbc8] sm:$0xff] }
 0x1ba   :  { %3579 = vmatmul.msk.f32.gmra.mxu2 %vm88_vm0, %v4487_v2  ;;  %2865 = vmatpush.msrb.mxu3 %v2562_v30  ;;  %v1522_v30 = vld [vmem:[#allocation7 + $0xac8] sm:$0xff] }
 0x1bb   :  { %2151 = vmatpush.msrb.mxu0 %v1613_v53  ;;  %2178 = vmatpush.msrb.mxu1 %v1486_v59  ;;  %v2570_v53 = vld [vmem:[#allocation9 + $0x78] sm:$0xff]  ;;  %v1649_v59 = vld [vmem:[#allocation7 + $0xec0] sm:$0xff] }
 0x1bc   :  { %2842 = vmatpush.msrb.mxu2 %v2561_v0  ;;  %2007 = vmatmul.f32.gmra.mxu1 %v4495_v7  ;;  %v1617_v0 = vld [vmem:[#allocation7 + $0xdc0] sm:$0xff] }
 0x1bd   :  { %2152 = vmatpush.msrb.mxu0 %v1581_v31  ;;  %2179 = vmatpush.msrb.mxu1 %v1454_v33  ;;  %v4521_v31 = vpop.f32.mrf.mxu3  ;;  %v2569_v33 = vld [vmem:[#allocation9 + $0x70] sm:$0xff] }
 0x1be   :  { %2954 = vmatpush.msra.mxu3 %v2662_v49  ;;  %2931 = vmatpush.msra.mxu2 %v2661_v61  ;;  %v2670_v49 = vld [vmem:[#allocation9 + $0x398] sm:$0xff]  ;;  %v1585_v61 = vld [vmem:[#allocation7 + $0xcc0] sm:$0xff] }
 0x1bf   :  { %2153 = vmatpush.msrb.mxu0 %v1549_v60  ;;  %2180 = vmatpush.msrb.mxu1 %v1422_v16  ;;  %v1729_v39 = vpop.f32.mrf.mxu1  ;;  %v1490_v60 = vld [vmem:[#allocation7 + $0x9c8] sm:$0xff]  ;;  %v4523_v16 = vpop.f32.mrf.mxu2 }
 0x1c0   :  { %2426 = vst [vmem:[#allocation12 + $0x8] sm:$0xff] %v1729_v39  ;;  %3588 = vmatmul.msk.f32.vlgmr.msrb.gmra.mxu3 %vm88_vm0, %v4474_v9  ;;  %1984 = vmatmul.f32.gmra.mxu0 %v4495_v7  ;;  %v1426_v39 = vld [vmem:[#allocation7 + $0x7c8] sm:$0xff] }
 0x1c1   :  { %2154 = vmatpush.msrb.mxu0 %v1517_v32  ;;  %2181 = vmatpush.msrb.mxu1 %v1390_v63  ;;  %v1458_v32 = vld [vmem:[#allocation7 + $0x8c8] sm:$0xff]  ;;  %v1553_v63 = vld [vmem:[#allocation7 + $0xbc0] sm:$0xff] }
 0x1c2   :  { %3586 = vmatmul.msk.f32.vlgmr.msrb.gmra.mxu2 %vm88_vm0, %v4474_v9  ;;  %2955 = vmatpush.msra.mxu3 %v2630_v56  ;;  %v2638_v56 = vld [vmem:[#allocation9 + $0x298] sm:$0xff] }
 0x1c3   :  { %2155 = vmatpush.msrb.mxu0 %v1485_v24  ;;  %2182 = vmatpush.msrb.mxu1 %v1358_v13  ;;  %v2669_v24 = vld [vmem:[#allocation9 + $0x390] sm:$0xff] }
 0x1c4   :  { %2096 = vmatmul.f32.vlgmr.msra.gmra.mxu1 %v4482_v34  ;;  %2932 = vmatpush.msra.mxu2 %v2629_v35  ;;  %v1394_v35 = vld [vmem:[#allocation7 + $0x6c8] sm:$0xff] }
 0x1c5   :  { %2156 = vmatpush.msrb.mxu0 %v1453_v42  ;;  %2183 = vmatpush.msrb.mxu1 %v1326_v14  ;;  %v1521_v42 = vld [vmem:[#allocation7 + $0xac0] sm:$0xff]  ;;  %v2637_v14 = vld [vmem:[#allocation9 + $0x290] sm:$0xff] }
 0x1c6   :  { %2956 = vmatpush.msra.mxu3 %v2598_v37  ;;  %2933 = vmatpush.msra.mxu2 %v2597_v38  ;;  %v1362_v38 = vld [vmem:[#allocation7 + $0x5c8] sm:$0xff] }
 0x1c7   :  { %2157 = vmatpush.msrb.mxu0 %v1421_v8  ;;  %2184 = vmatpush.msrb.mxu1 %v1294_v40  ;;  %v2606_v8 = vld [vmem:[#allocation9 + $0x198] sm:$0xff]  ;;  %v1489_v40 = vld [vmem:[#allocation7 + $0x9c0] sm:$0xff] }
 0x1c8   :  { %v1706_v62 = vpop.f32.mrf.mxu0  ;;  %3589 = vmatmul.msk.f32.gmra.mxu3 %vm88_vm0, %v4487_v2  ;;  %2934 = vmatpush.msra.mxu2 %v2565_v12  ;;  %v1330_v12 = vld [vmem:[#allocation7 + $0x4c8] sm:$0xff] }
 0x1c9   :  { %2158 = vmatpush.msrb.mxu0 %v1389_v28  ;;  %2185 = vmatpush.msrb.mxu1 %v1262_v44  ;;  %2425 = vst [vmem:[#allocation12] sm:$0xff] %v1706_v62  ;;  %v2605_v28 = vld [vmem:[#allocation9 + $0x190] sm:$0xff]  ;;  %v1457_v44 = vld [vmem:[#allocation7 + $0x8c0] sm:$0xff] }
 0x1ca   :  { %3587 = vmatmul.msk.f32.gmra.mxu2 %vm88_vm0, %v4487_v2  ;;  %2957 = vmatpush.msra.mxu3 %v2566_v55  ;;  %v1425_v55 = vld [vmem:[#allocation7 + $0x7c0] sm:$0xff] }
 0x1cb   :  { %2159 = vmatpush.msrb.mxu0 %v1357_v43  ;;  %2186 = vmatpush.msrb.mxu1 %v1230_v50  ;;  %v2574_v50 = vld [vmem:[#allocation9 + $0x98] sm:$0xff] }
 0x1cc   :  { %2073 = vmatmul.f32.vlgmr.msra.gmra.mxu0 %v4482_v34  ;;  %3046 = vmatpush.msrb.mxu3 %v2666_v11  ;;  %v1266_v11 = vld [vmem:[#allocation7 + $0x2c8] sm:$0xff] }
 0x1cd   :  { %2160 = vmatpush.msrb.mxu0 %v1325_v58  ;;  %2187 = vmatpush.msrb.mxu1 %v1198_v1  ;;  %v1298_v58 = vld [vmem:[#allocation7 + $0x3c8] sm:$0xff]  ;;  %v2573_v1 = vld [vmem:[#allocation9 + $0x90] sm:$0xff] }
 0x1ce   :  { %3023 = vmatpush.msrb.mxu2 %v2665_v22  ;;  %3047 = vmatpush.msrb.mxu3 %v2634_v21  ;;  %v1234_v22 = vld [vmem:[#allocation7 + $0x1c8] sm:$0xff]  ;;  %v1329_v21 = vld [vmem:[#allocation7 + $0x4c0] sm:$0xff] }
 0x1cf   :  { %2264 = vmatpush.msra.mxu1 %v1682_v3  ;;  %2161 = vmatpush.msrb.mxu0 %v1293_v10  ;;  %v1393_v3 = vld [vmem:[#allocation7 + $0x6c0] sm:$0xff]  ;;  %v2674_v10 = vld [vmem:[#allocation9 + $0x3b8] sm:$0xff] }
 0x1d0   :  { %3596 = vmatmul.msk.f32.vlgmr.msra.gmra.mxu3 %vm88_vm0, %v4474_v9  ;;  %3024 = vmatpush.msrb.mxu2 %v2633_v27  ;;  %v4531_v37 = vpop.f32.mrf.mxu3  ;;  %v2642_v27 = vld [vmem:[#allocation9 + $0x2b8] sm:$0xff] }
 0x1d1   :  { %2265 = vmatpush.msra.mxu1 %v1650_v17  ;;  %2162 = vmatpush.msrb.mxu0 %v1261_v26  ;;  %v1361_v17 = vld [vmem:[#allocation7 + $0x5c0] sm:$0xff]  ;;  %v2673_v26 = vld [vmem:[#allocation9 + $0x3b0] sm:$0xff] }
 0x1d2   :  { %3594 = vmatmul.msk.f32.vlgmr.msra.gmra.mxu2 %vm88_vm0, %v4474_v9  ;;  %3048 = vmatpush.msrb.mxu3 %v2602_v41  ;;  %v4535_v43 = vpop.f32.mrf.mxu2 }
 0x1d3   :  { %2266 = vmatpush.msra.mxu1 %v1618_v18  ;;  %2163 = vmatpush.msrb.mxu0 %v1229_v19  ;;  %v1202_v19 = vld [vmem:[#allocation7 + $0xc8] sm:$0xff] }
 0x1d4   :  { %3025 = vmatpush.msrb.mxu2 %v2601_v47  ;;  %3049 = vmatpush.msrb.mxu3 %v2570_v53  ;;  %v1265_v47 = vld [vmem:[#allocation7 + $0x2c0] sm:$0xff] }
 0x1d5   :  { %2267 = vmatpush.msra.mxu1 %v1586_v29  ;;  %2164 = vmatpush.msrb.mxu0 %v1197_v36  ;;  %v1686_v29 = vld [vmem:[#allocation7 + $0xfe8] sm:$0xff]  ;;  %v1297_v36 = vld [vmem:[#allocation7 + $0x3c0] sm:$0xff] }
 0x1d6   :  { %3026 = vmatpush.msrb.mxu2 %v2569_v33  ;;  %2099 = vmatmul.f32.gmra.mxu1 %v4495_v7  ;;  %v1233_v33 = vld [vmem:[#allocation7 + $0x1c0] sm:$0xff] }
 0x1d7   :  { %2241 = vmatpush.msra.mxu0 %v1681_v45  ;;  %2268 = vmatpush.msra.mxu1 %v1554_v46  ;;  %v2641_v45 = vld [vmem:[#allocation9 + $0x2b0] sm:$0xff]  ;;  %v1654_v46 = vld [vmem:[#allocation7 + $0xee8] sm:$0xff] }
 0x1d8   :  { %3597 = vmatmul.msk.f32.gmra.mxu3 %vm88_vm0, %v4487_v2  ;;  %2076 = vmatmul.f32.gmra.mxu0 %v4495_v7 }
 0x1d9   :  { %2242 = vmatpush.msra.mxu0 %v1649_v59  ;;  %2269 = vmatpush.msra.mxu1 %v1522_v30  ;;  %v4540_v18 = vpop.f32.mrf.mxu3  ;;  %v2610_v59 = vld [vmem:[#allocation9 + $0x1b8] sm:$0xff]  ;;  %v1622_v30 = vld [vmem:[#allocation7 + $0xde8] sm:$0xff] }
 0x1da   :  { %3138 = vmatpush.msra.mxu3 %v2670_v49  ;;  %v1732_v13 = vpop.f32.mrf.mxu1  ;;  %3595 = vmatmul.msk.f32.gmra.mxu2 %vm88_vm0, %v4487_v2  ;;  %v1201_v49 = vld [vmem:[#allocation7 + $0xc0] sm:$0xff] }
 0x1db   :  { %2243 = vmatpush.msra.mxu0 %v1617_v0  ;;  %2270 = vmatpush.msra.mxu1 %v1490_v60  ;;  %2458 = vst [vmem:[#allocation12 + $0x108] sm:$0xff] %v1732_v13  ;;  %v2609_v0 = vld [vmem:[#allocation9 + $0x1b0] sm:$0xff]  ;;  %v1590_v60 = vld [vmem:[#allocation7 + $0xce8] sm:$0xff] }
 0x1dc   :  { %3115 = vmatpush.msra.mxu2 %v2669_v24  ;;  %3139 = vmatpush.msra.mxu3 %v2638_v56  ;;  %v4547_v41 = vpop.f32.mrf.mxu2  ;;  %v2577_v13 = vld [vmem:[#allocation9 + $0xb0] sm:$0xff]  ;;  %v1526_v56 = vld [vmem:[#allocation7 + $0xae8] sm:$0xff] }
 0x1dd   :  { %2244 = vmatpush.msra.mxu0 %v1585_v61  ;;  %2271 = vmatpush.msra.mxu1 %v1458_v32  ;;  %v2578_v61 = vld [vmem:[#allocation9 + $0xb8] sm:$0xff]  ;;  %v1685_v32 = vld [vmem:[#allocation7 + $0xfe0] sm:$0xff] }
 0x1de   :  { %3116 = vmatpush.msra.mxu2 %v2637_v14  ;;  %3140 = vmatpush.msra.mxu3 %v2606_v8  ;;  %v2678_v14 = vld [vmem:[#allocation9 + $0x3d8] sm:$0xff]  ;;  %v1494_v8 = vld [vmem:[#allocation7 + $0x9e8] sm:$0xff] }
 0x1df   :  { %2245 = vmatpush.msra.mxu0 %v1553_v63  ;;  %2272 = vmatpush.msra.mxu1 %v1426_v39  ;;  %v1558_v63 = vld [vmem:[#allocation7 + $0xbe8] sm:$0xff]  ;;  %v1653_v39 = vld [vmem:[#allocation7 + $0xee0] sm:$0xff] }
 0x1e0   :  { %3604 = vmatmul.msk.f32.vlgmr.msrb.gmra.mxu3 %vm88_vm0, %v4474_v9  ;;  %3117 = vmatpush.msra.mxu2 %v2605_v28  ;;  %v1462_v28 = vld [vmem:[#allocation7 + $0x8e8] sm:$0xff] }
 0x1e1   :  { %2246 = vmatpush.msra.mxu0 %v1521_v42  ;;  %2273 = vmatpush.msra.mxu1 %v1394_v35  ;;  %v1621_v35 = vld [vmem:[#allocation7 + $0xde0] sm:$0xff] }
 0x1e2   :  { %v1709_v62 = vpop.f32.mrf.mxu0  ;;  %3602 = vmatmul.msk.f32.vlgmr.msrb.gmra.mxu2 %vm88_vm0, %v4474_v9  ;;  %3141 = vmatpush.msra.mxu3 %v2574_v50  ;;  %v1430_v50 = vld [vmem:[#allocation7 + $0x7e8] sm:$0xff] }
 0x1e3   :  { %2247 = vmatpush.msra.mxu0 %v1489_v40  ;;  %2274 = vmatpush.msra.mxu1 %v1362_v38  ;;  %2457 = vst [vmem:[#allocation12 + $0x100] sm:$0xff] %v1709_v62  ;;  %v2677_v40 = vld [vmem:[#allocation9 + $0x3d0] sm:$0xff]  ;;  %v1589_v38 = vld [vmem:[#allocation7 + $0xce0] sm:$0xff] }
 0x1e4   :  { %2188 = vmatmul.f32.vlgmr.msrb.gmra.mxu1 %v4482_v34  ;;  %3118 = vmatpush.msra.mxu2 %v2573_v1  ;;  %v1525_v62 = vld [vmem:[#allocation7 + $0xae0] sm:$0xff] }
 0x1e5   :  { %2248 = vmatpush.msra.mxu0 %v1457_v44  ;;  %2275 = vmatpush.msra.mxu1 %v1330_v12  ;;  %v2646_v44 = vld [vmem:[#allocation9 + $0x2d8] sm:$0xff]  ;;  %v1557_v12 = vld [vmem:[#allocation7 + $0xbe0] sm:$0xff] }
 0x1e6   :  { %3230 = vmatpush.msrb.mxu3 %v2674_v10  ;;  %2165 = vmatmul.f32.vlgmr.msrb.gmra.mxu0 %v4482_v34  ;;  %v1493_v10 = vld [vmem:[#allocation7 + $0x9e0] sm:$0xff] }
 0x1e7   :  { %2249 = vmatpush.msra.mxu0 %v1425_v55  ;;  %2276 = vmatpush.msra.mxu1 %v1298_v58  ;;  %v2645_v55 = vld [vmem:[#allocation9 + $0x2d0] sm:$0xff]  ;;  %v1398_v58 = vld [vmem:[#allocation7 + $0x6e8] sm:$0xff] }
 0x1e8   :  { %3605 = vmatmul.msk.f32.gmra.mxu3 %vm88_vm0, %v4487_v2  ;;  %3207 = vmatpush.msrb.mxu2 %v2673_v26  ;;  %v1461_v26 = vld [vmem:[#allocation7 + $0x8e0] sm:$0xff] }
 0x1e9   :  { %2250 = vmatpush.msra.mxu0 %v1393_v3  ;;  %2277 = vmatpush.msra.mxu1 %v1266_v11  ;;  %v2614_v3 = vld [vmem:[#allocation9 + $0x1d8] sm:$0xff]  ;;  %v1366_v11 = vld [vmem:[#allocation7 + $0x5e8] sm:$0xff] }
 0x1ea   :  { %3603 = vmatmul.msk.f32.gmra.mxu2 %vm88_vm0, %v4487_v2  ;;  %3231 = vmatpush.msrb.mxu3 %v2642_v27  ;;  %v1429_v27 = vld [vmem:[#allocation7 + $0x7e0] sm:$0xff] }
 0x1eb   :  { %2251 = vmatpush.msra.mxu0 %v1361_v17  ;;  %2278 = vmatpush.msra.mxu1 %v1234_v22  ;;  %v2613_v22 = vld [vmem:[#allocation9 + $0x1d0] sm:$0xff] }
 0x1ec   :  { %v1798_v53 = vpop.f32.mrf.mxu0  ;;  %2191 = vmatmul.f32.gmra.mxu1 %v4495_v7  ;;  %3208 = vmatpush.msrb.mxu2 %v2641_v45  ;;  %v2682_v45 = vld [vmem:[#allocation9 + $0x3f8] sm:$0xff] }
 0x1ed   :  { %2252 = vmatpush.msra.mxu0 %v1329_v21  ;;  %2279 = vmatpush.msra.mxu1 %v1202_v19  ;;  %2429 = vst [vmem:[#allocation12 + $0x20] sm:$0xff] %v1798_v53  ;;  %v1334_v21 = vld [vmem:[#allocation7 + $0x4e8] sm:$0xff]  ;;  %v2582_v19 = vld [vmem:[#allocation9 + $0xd8] sm:$0xff]  ;;  %v2681_v53 = vld [vmem:[#allocation9 + $0x3f0] sm:$0xff] }
 0x1ee   :  { %2168 = vmatmul.f32.gmra.mxu0 %v4495_v7  ;;  %3232 = vmatpush.msrb.mxu3 %v2610_v59  ;;  %v2650_v59 = vld [vmem:[#allocation9 + $0x2f8] sm:$0xff] }
 0x1ef   :  { %2356 = vmatpush.msrb.mxu1 %v1686_v29  ;;  %2253 = vmatpush.msra.mxu0 %v1297_v36  ;;  %v1302_v29 = vld [vmem:[#allocation7 + $0x3e8] sm:$0xff]  ;;  %v2581_v36 = vld [vmem:[#allocation9 + $0xd0] sm:$0xff] }
 0x1f0   :  { %3612 = vmatmul.msk.f32.vlgmr.msra.gmra.mxu3 %vm88_vm0, %v4474_v9  ;;  %3209 = vmatpush.msrb.mxu2 %v2609_v0 }
 0x1f1   :  { %2357 = vmatpush.msrb.mxu1 %v1654_v46  ;;  %2254 = vmatpush.msra.mxu0 %v1265_v47  ;;  %v4553_v24 = vpop.f32.mrf.mxu3  ;;  %v1397_v46 = vld [vmem:[#allocation7 + $0x6e0] sm:$0xff]  ;;  %v1270_v47 = vld [vmem:[#allocation7 + $0x2e8] sm:$0xff] }
 0x1f2   :  { %3610 = vmatmul.msk.f32.vlgmr.msra.gmra.mxu2 %vm88_vm0, %v4474_v9  ;;  %3233 = vmatpush.msrb.mxu3 %v2578_v61  ;;  %v1206_v61 = vld [vmem:[#allocation7 + $0xe8] sm:$0xff] }
 0x1f3   :  { %2358 = vmatpush.msrb.mxu1 %v1622_v30  ;;  %2255 = vmatpush.msra.mxu0 %v1233_v33  ;;  %v1365_v30 = vld [vmem:[#allocation7 + $0x5e0] sm:$0xff]  ;;  %v1238_v33 = vld [vmem:[#allocation7 + $0x1e8] sm:$0xff] }
 0x1f4   :  { %2280 = vmatmul.f32.vlgmr.msra.gmra.mxu1 %v4482_v34  ;;  %3210 = vmatpush.msrb.mxu2 %v2577_v13  ;;  %v2652_v13 = vld [vmem:[#allocation9 + $0x308] sm:$0xff] }
 0x1f5   :  { %2359 = vmatpush.msrb.mxu1 %v1590_v60  ;;  %2256 = vmatpush.msra.mxu0 %v1201_v49  ;;  %v4557_v42 = vpop.f32.mrf.mxu2  ;;  %v2649_v60 = vld [vmem:[#allocation9 + $0x2f0] sm:$0xff]  ;;  %v1333_v49 = vld [vmem:[#allocation7 + $0x4e0] sm:$0xff] }
 0x1f6   :  { %2257 = vmatmul.f32.vlgmr.msra.gmra.mxu0 %v4482_v34  ;;  %3322 = vmatpush.msra.mxu3 %v2678_v14  ;;  %v1269_v14 = vld [vmem:[#allocation7 + $0x2e0] sm:$0xff] }
 0x1f7   :  { %2333 = vmatpush.msrb.mxu0 %v1685_v32  ;;  %2360 = vmatpush.msrb.mxu1 %v1558_v63  ;;  %v1301_v63 = vld [vmem:[#allocation7 + $0x3e0] sm:$0xff] }
 0x1f8   :  { %3613 = vmatmul.msk.f32.gmra.mxu3 %vm88_vm0, %v4487_v2  ;;  %3299 = vmatpush.msra.mxu2 %v2677_v40  ;;  %v2585_v40 = vld [vmem:[#allocation9 + $0xf0] sm:$0xff] }
 0x1f9   :  { %2334 = vmatpush.msrb.mxu0 %v1653_v39  ;;  %2361 = vmatpush.msrb.mxu1 %v1526_v56  ;;  %v2618_v39 = vld [vmem:[#allocation9 + $0x1f8] sm:$0xff]  ;;  %v2617_v56 = vld [vmem:[#allocation9 + $0x1f0] sm:$0xff] }
 0x1fa   :  { %3611 = vmatmul.msk.f32.gmra.mxu2 %vm88_vm0, %v4487_v2  ;;  %3323 = vmatpush.msra.mxu3 %v2646_v44  ;;  %v1205_v44 = vld [vmem:[#allocation7 + $0xe0] sm:$0xff] }
 0x1fb   :  { %2335 = vmatpush.msrb.mxu0 %v1621_v35  ;;  %2362 = vmatpush.msrb.mxu1 %v1494_v8  ;;  %v2620_v35 = vld [vmem:[#allocation9 + $0x208] sm:$0xff]  ;;  %v2586_v8 = vld [vmem:[#allocation9 + $0xf8] sm:$0xff] }
 0x1fc   :  { %v4565_v1 = vpop.f32.mrf.mxu3  ;;  %2283 = vmatmul.f32.gmra.mxu1 %v4495_v7  ;;  %3300 = vmatpush.msra.mxu2 %v2645_v55  ;;  %v2651_v55 = vld [vmem:[#allocation9 + $0x300] sm:$0xff] }
 0x1fd   :  { %2336 = vmatpush.msrb.mxu0 %v1589_v38  ;;  %2363 = vmatpush.msrb.mxu1 %v1462_v28  ;;  %v1237_v38 = vld [vmem:[#allocation7 + $0x1e0] sm:$0xff]  ;;  %v2588_v28 = vld [vmem:[#allocation9 + $0x108] sm:$0xff] }
 0x1fe   :  { %v4568_v17 = vpop.f32.mrf.mxu2  ;;  %2260 = vmatmul.f32.gmra.mxu0 %v4495_v7  ;;  %3324 = vmatpush.msra.mxu3 %v2614_v3  ;;  %v2619_v3 = vld [vmem:[#allocation9 + $0x200] sm:$0xff] }
 0x1ff   :  { %2337 = vmatpush.msrb.mxu0 %v1557_v12  ;;  %2364 = vmatpush.msrb.mxu1 %v1430_v50  ;;  %v2556_v50 = vld [vmem:[#allocation9 + $0x8] sm:$0xff] }
 0x200   :  { %3620 = vmatmul.msk.f32.vlgmr.msrb.gmra.mxu3 %vm88_vm0, %v4474_v9  ;;  %3301 = vmatpush.msra.mxu2 %v2613_v22  ;;  %v2592_v22 = vld [vmem:[#allocation9 + $0x128] sm:$0xff] }
 0x201   :  { %2338 = vmatpush.msrb.mxu0 %v1525_v62  ;;  %2365 = vmatpush.msrb.mxu1 %v1398_v58  ;;  %v2656_v58 = vld [vmem:[#allocation9 + $0x328] sm:$0xff] }
 0x202   :  { %3618 = vmatmul.msk.f32.vlgmr.msrb.gmra.mxu2 %vm88_vm0, %v4474_v9  ;;  %3325 = vmatpush.msra.mxu3 %v2582_v19 }
 0x203   :  { %2339 = vmatpush.msrb.mxu0 %v1493_v10  ;;  %2366 = vmatpush.msrb.mxu1 %v1366_v11  ;;  %v2624_v10 = vld [vmem:[#allocation9 + $0x228] sm:$0xff]  ;;  %v2587_v11 = vld [vmem:[#allocation9 + $0x100] sm:$0xff] }
 0x204   :  { %3302 = vmatpush.msra.mxu2 %v2581_v36  ;;  %3414 = vmatpush.msrb.mxu3 %v2682_v45  ;;  %v2623_v36 = vld [vmem:[#allocation9 + $0x220] sm:$0xff]  ;;  %v2660_v45 = vld [vmem:[#allocation9 + $0x348] sm:$0xff] }
 0x205   :  { %2340 = vmatpush.msrb.mxu0 %v1461_v26  ;;  %2367 = vmatpush.msrb.mxu1 %v1334_v21  ;;  %v2555_v26 = vld [vmem:[#allocation9] sm:$0xff]  ;;  %v4594_v21 = vpop.f32.mrf.mxu1 }
 0x206   :  { %v4575_v0 = vpop.f32.mrf.mxu3  ;;  %3391 = vmatpush.msrb.mxu2 %v2681_v53  ;;  %3415 = vmatpush.msrb.mxu3 %v2650_v59  ;;  %v2559_v53 = vld [vmem:[#allocation9 + $0x20] sm:$0xff]  ;;  %v2596_v59 = vld [vmem:[#allocation9 + $0x148] sm:$0xff] }
 0x207   :  { %2341 = vmatpush.msrb.mxu0 %v1429_v27  ;;  %2368 = vmatpush.msrb.mxu1 %v1302_v29  ;;  %v2560_v27 = vld [vmem:[#allocation9 + $0x28] sm:$0xff] }
 0x208   :  { %3621 = vmatmul.msk.f32.gmra.mxu3 %vm88_vm0, %v4487_v2  ;;  %3392 = vmatpush.msrb.mxu2 %v2649_v60  ;;  %v2564_v60 = vld [vmem:[#allocation9 + $0x48] sm:$0xff] }
 0x209   :  { %2342 = vmatpush.msrb.mxu0 %v1397_v46  ;;  %2369 = vmatpush.msrb.mxu1 %v1270_v47  ;;  %v4577_v32 = vpop.f32.mrf.mxu2  ;;  %v2591_v46 = vld [vmem:[#allocation9 + $0x120] sm:$0xff]  ;;  %v2628_v47 = vld [vmem:[#allocation9 + $0x248] sm:$0xff] }
 0x20a   :  { %3619 = vmatmul.msk.f32.gmra.mxu2 %vm88_vm0, %v4487_v2  ;;  %3416 = vmatpush.msrb.mxu3 %v2618_v39  ;;  %v4621_v39 = vpop.f32.mrf.mxu0 }
 0x20b   :  { %2343 = vmatpush.msrb.mxu0 %v1365_v30  ;;  %2370 = vmatpush.msrb.mxu1 %v1238_v33 }
 0x20c   :  { %3393 = vmatpush.msrb.mxu2 %v2617_v56  ;;  %3417 = vmatpush.msrb.mxu3 %v2586_v8 }
 0x20d   :  { %2344 = vmatpush.msrb.mxu0 %v1333_v49  ;;  %2371 = vmatpush.msrb.mxu1 %v1206_v61  ;;  %v4607_v30 = vpop.f32.mrf.mxu1  ;;  %v2627_v49 = vld [vmem:[#allocation9 + $0x240] sm:$0xff] }
 0x20e   :  { %2372 = vmatmul.f32.vlgmr.msrb.gmra.mxu1 %v4482_v34  ;;  %3394 = vmatpush.msrb.mxu2 %v2585_v40  ;;  %v2632_v40 = vld [vmem:[#allocation9 + $0x268] sm:$0xff] }
 0x20f   :  { %2345 = vmatpush.msrb.mxu0 %v1301_v63  ;;  %2724 = vmatpush.msra.mxu1 %v2652_v13  ;;  %v2595_v63 = vld [vmem:[#allocation9 + $0x140] sm:$0xff] }
 0x210   :  { %v4584_v12 = vpop.f32.mrf.mxu3  ;;  %3628 = vmatmul.msk.f32.vlgmr.msra.gmra.mxu3 %vm88_vm0, %v4474_v9  ;;  %v2563_v13 = vld [vmem:[#allocation9 + $0x40] sm:$0xff] }
 0x211   :  { %2346 = vmatpush.msrb.mxu0 %v1269_v14  ;;  %2725 = vmatpush.msra.mxu1 %v2620_v35  ;;  %v2664_v14 = vld [vmem:[#allocation9 + $0x368] sm:$0xff] }
 0x212   :  { %3626 = vmatmul.msk.f32.vlgmr.msra.gmra.mxu2 %vm88_vm0, %v4474_v9 }
 0x213   :  { %2347 = vmatpush.msrb.mxu0 %v1237_v38  ;;  %2726 = vmatpush.msra.mxu1 %v2588_v28  ;;  %v4588_v62 = vpop.f32.mrf.mxu2  ;;  %v2600_v38 = vld [vmem:[#allocation9 + $0x168] sm:$0xff] }
 0x214   :  { %v2568_v28 = vld [vmem:[#allocation9 + $0x68] sm:$0xff] }
 0x215   :  { %2348 = vmatpush.msrb.mxu0 %v1205_v44  ;;  %2727 = vmatpush.msra.mxu1 %v2556_v50  ;;  %v4627_v35 = vpop.f32.mrf.mxu1  ;;  %v2663_v44 = vld [vmem:[#allocation9 + $0x360] sm:$0xff]  ;;  %v4637_v50 = vpop.f32.mrf.mxu0 }
 0x216   :  { %2349 = vmatmul.f32.vlgmr.msrb.gmra.mxu0 %v4482_v34  ;;  %2375 = vmatmul.f32.gmra.mxu1 %v4495_v7  ;;  %v2655_v34 = vld [vmem:[#allocation9 + $0x320] sm:$0xff] }
 0x217   :  { %2701 = vmatpush.msra.mxu0 %v2651_v55  ;;  %2816 = vmatpush.msrb.mxu1 %v2656_v58 }
 0x218   :  { %3629 = vmatmul.msk.f32.gmra.mxu3 %vm88_vm0, %v4487_v2 }
 0x219   :  { %2702 = vmatpush.msra.mxu0 %v2619_v3  ;;  %2817 = vmatpush.msrb.mxu1 %v2624_v10  ;;  %v2631_v10 = vld [vmem:[#allocation9 + $0x260] sm:$0xff] }
 0x21a   :  { %v4598_v19 = vpop.f32.mrf.mxu3  ;;  %3627 = vmatmul.msk.f32.gmra.mxu2 %vm88_vm0, %v4487_v2 }
 0x21b   :  { %2703 = vmatpush.msra.mxu0 %v2587_v11  ;;  %2818 = vmatpush.msrb.mxu1 %v2592_v22 }
 0x21c   :  { %v4603_v29 = vpop.f32.mrf.mxu2 }
 0x21d   :  { %2704 = vmatpush.msra.mxu0 %v2555_v26  ;;  %2819 = vmatpush.msrb.mxu1 %v2560_v27  ;;  %v2599_v26 = vld [vmem:[#allocation9 + $0x160] sm:$0xff] }
 0x21e   :  { %2352 = vmatmul.f32.gmra.mxu0 %v4495_v7  ;;  %3576 = vmatmul.msk.f32.vlgmr.msra.gmra.mxu1 %vm88_vm0, %v4474_v9  ;;  %v2659_v7 = vld [vmem:[#allocation9 + $0x340] sm:$0xff] }
 0x21f   :  { %2793 = vmatpush.msrb.mxu0 %v2655_v34  ;;  %2908 = vmatpush.msra.mxu1 %v2660_v45  ;;  %v2567_v34 = vld [vmem:[#allocation9 + $0x60] sm:$0xff] }
 0x220   :  { %3636 = vmatmul.msk.f32.vlgmr.msrb.gmra.mxu3 %vm88_vm0, %v4474_v9 }
 0x221   :  { %2794 = vmatpush.msrb.mxu0 %v2623_v36  ;;  %2909 = vmatpush.msra.mxu1 %v2628_v47  ;;  %v4639_v58 = vpop.f32.mrf.mxu1 }
 0x222   :  { %3634 = vmatmul.msk.f32.vlgmr.msrb.gmra.mxu2 %vm88_vm0, %v4474_v9 }
 0x223   :  { %2795 = vmatpush.msrb.mxu0 %v2591_v46  ;;  %v4611_v33 = vpop.f32.mrf.mxu3  ;;  %2910 = vmatpush.msra.mxu1 %v2596_v59  ;;  %v2636_v46 = vld [vmem:[#allocation9 + $0x288] sm:$0xff] }
 0x224   :  { %v2604_v59 = vld [vmem:[#allocation9 + $0x188] sm:$0xff] }
 0x225   :  { %2796 = vmatpush.msrb.mxu0 %v2559_v53  ;;  %v4619_v61 = vpop.f32.mrf.mxu2  ;;  %2911 = vmatpush.msra.mxu1 %v2564_v60  ;;  %v2667_v60 = vld [vmem:[#allocation9 + $0x380] sm:$0xff] }
 0x226   :  { %3574 = vmatmul.msk.f32.vlgmr.msra.gmra.mxu0 %vm88_vm0, %v4474_v9  ;;  %3577 = vmatmul.msk.f32.gmra.mxu1 %vm88_vm0, %v4487_v2 }
 0x227   :  { %2885 = vmatpush.msra.mxu0 %v2659_v7  ;;  %v2572_v7 = vld [vmem:[#allocation9 + $0x88] sm:$0xff] }
 0x228   :  { %3637 = vmatmul.msk.f32.gmra.mxu3 %vm88_vm0, %v4487_v2  ;;  %v4647_v27 = vpop.f32.mrf.mxu0 }
 0x229   :  { %2886 = vmatpush.msra.mxu0 %v2627_v49 }
 0x22a   :  { %3635 = vmatmul.msk.f32.gmra.mxu2 %vm88_vm0, %v4487_v2 }
 0x22b   :  { %2887 = vmatpush.msra.mxu0 %v2595_v63  ;;  %v4625_v56 = vpop.f32.mrf.mxu3 }
 0x22d   :  { %2888 = vmatpush.msra.mxu0 %v2563_v13  ;;  %v4635_v8 = vpop.f32.mrf.mxu2 }
 0x22e   :  { %3575 = vmatmul.msk.f32.gmra.mxu0 %vm88_vm0, %v4487_v2  ;;  %3584 = vmatmul.msk.f32.vlgmr.msrb.gmra.mxu1 %vm88_vm0, %v4474_v9 }
 0x22f   :  { %3000 = vmatpush.msrb.mxu1 %v2664_v14 }
 0x231   :  { %3001 = vmatpush.msrb.mxu1 %v2632_v40  ;;  %v4659_v63 = vpop.f32.mrf.mxu0  ;;  %v2603_v40 = vld [vmem:[#allocation9 + $0x180] sm:$0xff] }
 0x233   :  { %3002 = vmatpush.msrb.mxu1 %v2600_v38  ;;  %v2775_v55 = vpop.f32.mrf.mxu3 }
 0x234   :  { %v3428_v3 = vadd.f32 %v2775_v55, %v4456_v54  ;;  %v2668_v54 = vld [vmem:[#allocation9 + $0x388] sm:$0xff] }
 0x235   :  { %3003 = vmatpush.msrb.mxu1 %v2568_v28  ;;  %v2752_v11 = vpop.f32.mrf.mxu2  ;;  %v2571_v28 = vld [vmem:[#allocation9 + $0x80] sm:$0xff] }
 0x236   :  { %3582 = vmatmul.msk.f32.vlgmr.msrb.gmra.mxu0 %vm88_vm0, %v4474_v9  ;;  %3585 = vmatmul.msk.f32.gmra.mxu1 %vm88_vm0, %v4487_v2  ;;  %3492 = vst [vmem:[#allocation12 + $0x18] sm:$0xff] %v3428_v3  ;;  %v3427_v22 = vadd.f32 %v2752_v11, %v4459_v23  ;;  %v4654_v23 = vpop.f32.mrf.mxu1  ;;  %v4672_v3 = vld [vmem:[#allocation3] sm:$0xff] }
 0x237   :  { %2977 = vmatpush.msrb.mxu0 %v2663_v44 }
 0x238   :  { %3491 = vst [vmem:[#allocation12 + $0x10] sm:$0xff] %v3427_v22  ;;  %v2608_v22 = vld [vmem:[#allocation9 + $0x1a8] sm:$0xff] }
 0x239   :  { %2978 = vmatpush.msrb.mxu0 %v2631_v10 }
 0x23b   :  { %2979 = vmatpush.msrb.mxu0 %v2599_v26  ;;  %v2778_v36 = vpop.f32.mrf.mxu3 }
 0x23c   :  { %v3460_v45 = vadd.f32 %v2778_v36, %v4463_v51  ;;  %v2635_v51 = vld [vmem:[#allocation9 + $0x280] sm:$0xff] }
 0x23d   :  { %2980 = vmatpush.msrb.mxu0 %v2567_v34  ;;  %v2755_v47 = vpop.f32.mrf.mxu2  ;;  %v2576_v34 = vld [vmem:[#allocation9 + $0xa8] sm:$0xff]  ;;  %v2639_v36 = vld [vmem:[#allocation9 + $0x2a0] sm:$0xff] }
 0x23e   :  { %3583 = vmatmul.msk.f32.gmra.mxu0 %vm88_vm0, %v4487_v2  ;;  %3592 = vmatmul.msk.f32.vlgmr.msra.gmra.mxu1 %vm88_vm0, %v4474_v9  ;;  %3524 = vst [vmem:[#allocation12 + $0x118] sm:$0xff] %v3460_v45  ;;  %v3459_v53 = vadd.f32 %v2755_v47, %v4466_v6  ;;  %v4664_v14 = vpop.f32.mrf.mxu1 }
 0x23f   :  { %3092 = vmatpush.msra.mxu1 %v2668_v54  ;;  %v2671_v54 = vld [vmem:[#allocation9 + $0x3a0] sm:$0xff] }
 0x240   :  { %3523 = vst [vmem:[#allocation12 + $0x110] sm:$0xff] %v3459_v53 }
 0x241   :  { %3093 = vmatpush.msra.mxu1 %v2636_v46  ;;  %v2607_v46 = vld [vmem:[#allocation9 + $0x1a0] sm:$0xff] }
 0x243   :  { %3094 = vmatpush.msra.mxu1 %v2604_v59  ;;  %v2867_v49 = vpop.f32.mrf.mxu3 }
 0x244   :  { %v3432_v13 = vadd.f32 %v2867_v49, %v4472_v5  ;;  %v4669_v5 = vpop.f32.mrf.mxu0  ;;  %v4689_v49 = vld [vmem:[#allocation3 + $0x8] sm:$0xff] }
 0x245   :  { %3095 = vmatpush.msra.mxu1 %v2572_v7  ;;  %v2844_v6 = vpop.f32.mrf.mxu2  ;;  %v2575_v7 = vld [vmem:[#allocation9 + $0xa0] sm:$0xff] }
 0x246   :  { %3590 = vmatmul.msk.f32.vlgmr.msra.gmra.mxu0 %vm88_vm0, %v4474_v9  ;;  %3593 = vmatmul.msk.f32.gmra.mxu1 %vm88_vm0, %v4487_v2  ;;  %3496 = vst [vmem:[#allocation12 + $0x38] sm:$0xff] %v3432_v13  ;;  %v3431_v38 = vadd.f32 %v2844_v6, %v4476_v15  ;;  %v2672_v9 = vld [vmem:[#allocation9 + $0x3a8] sm:$0xff]  ;;  %v4677_v26 = vpop.f32.mrf.mxu1 }
 0x247   :  { %3069 = vmatpush.msra.mxu0 %v2667_v60  ;;  %v2640_v15 = vld [vmem:[#allocation9 + $0x2a8] sm:$0xff] }
 0x248   :  { %3495 = vst [vmem:[#allocation12 + $0x30] sm:$0xff] %v3431_v38  ;;  %v2676_v60 = vld [vmem:[#allocation9 + $0x3c8] sm:$0xff] }
 0x249   :  { %3070 = vmatpush.msra.mxu0 %v2635_v51  ;;  %v2580_v38 = vld [vmem:[#allocation9 + $0xc8] sm:$0xff] }
 0x24b   :  { %3071 = vmatpush.msra.mxu0 %v2603_v40  ;;  %v2870_v44 = vpop.f32.mrf.mxu3  ;;  %v2612_v40 = vld [vmem:[#allocation9 + $0x1c8] sm:$0xff] }
 0x24c   :  { %v3464_v55 = vadd.f32 %v2870_v44, %v4485_v52  ;;  %v4684_v47 = vpop.f32.mrf.mxu0  ;;  %v2643_v44 = vld [vmem:[#allocation9 + $0x2c0] sm:$0xff] }
 0x24d   :  { %3072 = vmatpush.msra.mxu0 %v2571_v28  ;;  %v2847_v10 = vpop.f32.mrf.mxu2 }
 0x24e   :  { %3591 = vmatmul.msk.f32.gmra.mxu0 %vm88_vm0, %v4487_v2  ;;  %3600 = vmatmul.msk.f32.vlgmr.msrb.gmra.mxu1 %vm88_vm0, %v4672_v3  ;;  %3528 = vst [vmem:[#allocation12 + $0x138] sm:$0xff] %v3464_v55  ;;  %v3463_v11 = vadd.f32 %v2847_v10, %v4491_v57 }
 0x24f   :  { %3184 = vmatpush.msrb.mxu1 %v2672_v9  ;;  %v2675_v9 = vld [vmem:[#allocation9 + $0x3c0] sm:$0xff] }
 0x250   :  { %3527 = vst [vmem:[#allocation12 + $0x130] sm:$0xff] %v3463_v11  ;;  %v2579_v11 = vld [vmem:[#allocation9 + $0xc0] sm:$0xff] }
 0x251   :  { %3185 = vmatpush.msrb.mxu1 %v2640_v15  ;;  %v2611_v15 = vld [vmem:[#allocation9 + $0x1c0] sm:$0xff] }
 0x253   :  { %3186 = vmatpush.msrb.mxu1 %v2608_v22  ;;  %v2959_v52 = vpop.f32.mrf.mxu3  ;;  %v4687_v59 = vpop.f32.mrf.mxu1 }
 0x254   :  { %v3436_v45 = vadd.f32 %v2959_v52, %v4498_v48 }
 0x255   :  { %3187 = vmatpush.msrb.mxu1 %v2576_v34  ;;  %v2936_v57 = vpop.f32.mrf.mxu2  ;;  %v4697_v6 = vpop.f32.mrf.mxu0 }
 0x256   :  { %3598 = vmatmul.msk.f32.vlgmr.msrb.gmra.mxu0 %vm88_vm0, %v4672_v3  ;;  %3601 = vmatmul.msk.f32.gmra.mxu1 %vm88_vm0, %v4487_v2  ;;  %3500 = vst [vmem:[#allocation12 + $0x58] sm:$0xff] %v3436_v45  ;;  %v3435_v53 = vadd.f32 %v2936_v57, %v4505_v20  ;;  %v2644_v20 = vld [vmem:[#allocation9 + $0x2c8] sm:$0xff] }
 0x257   :  { %3161 = vmatpush.msrb.mxu0 %v2671_v54  ;;  %v2680_v54 = vld [vmem:[#allocation9 + $0x3e8] sm:$0xff] }
 0x258   :  { %3499 = vst [vmem:[#allocation12 + $0x50] sm:$0xff] %v3435_v53  ;;  %v2616_v57 = vld [vmem:[#allocation9 + $0x1e8] sm:$0xff]  ;;  %v2679_v53 = vld [vmem:[#allocation9 + $0x3e0] sm:$0xff] }
 0x259   :  { %3162 = vmatpush.msrb.mxu0 %v2639_v36 }
 0x25b   :  { %3163 = vmatpush.msrb.mxu0 %v2607_v46  ;;  %v2962_v48 = vpop.f32.mrf.mxu3  ;;  %v2584_v46 = vld [vmem:[#allocation9 + $0xe8] sm:$0xff] }
 0x25c   :  { %v3468_v2 = vadd.f32 %v2962_v48, %v4510_v4 }
 0x25d   :  { %3164 = vmatpush.msrb.mxu0 %v2575_v7  ;;  %v2939_v51 = vpop.f32.mrf.mxu2 }
 0x25e   :  { %3599 = vmatmul.msk.f32.gmra.mxu0 %vm88_vm0, %v4689_v49  ;;  %3608 = vmatmul.msk.f32.vlgmr.msra.gmra.mxu1 %vm88_vm0, %v4672_v3  ;;  %3532 = vst [vmem:[#allocation12 + $0x158] sm:$0xff] %v3468_v2  ;;  %v3467_v13 = vadd.f32 %v2939_v51, %v4515_v25 }
 0x25f   :  { %3276 = vmatpush.msra.mxu1 %v2676_v60 }
 0x260   :  { %3531 = vst [vmem:[#allocation12 + $0x150] sm:$0xff] %v3467_v13  ;;  %v2583_v13 = vld [vmem:[#allocation9 + $0xe0] sm:$0xff] }
 0x261   :  { %3277 = vmatpush.msra.mxu1 %v2644_v20  ;;  %v4699_v28 = vpop.f32.mrf.mxu1  ;;  %v2615_v20 = vld [vmem:[#allocation9 + $0x1e0] sm:$0xff] }
 0x263   :  { %3278 = vmatpush.msra.mxu1 %v2612_v40  ;;  %v3051_v4 = vpop.f32.mrf.mxu3  ;;  %v4707_v22 = vpop.f32.mrf.mxu0 }
 0x264   :  { %v3440_v55 = vadd.f32 %v3051_v4, %v4521_v31 }
 0x265   :  { %3279 = vmatpush.msra.mxu1 %v2580_v38  ;;  %v3028_v25 = vpop.f32.mrf.mxu2 }
 0x266   :  { %3606 = vmatmul.msk.f32.vlgmr.msra.gmra.mxu0 %vm88_vm0, %v4672_v3  ;;  %3609 = vmatmul.msk.f32.gmra.mxu1 %vm88_vm0, %v4689_v49  ;;  %3504 = vst [vmem:[#allocation12 + $0x78] sm:$0xff] %v3440_v55  ;;  %v3439_v10 = vadd.f32 %v3028_v25, %v4523_v16  ;;  %v2648_v16 = vld [vmem:[#allocation9 + $0x2e8] sm:$0xff] }
 0x267   :  { %3253 = vmatpush.msra.mxu0 %v2675_v9 }
 0x268   :  { %3503 = vst [vmem:[#allocation12 + $0x70] sm:$0xff] %v3439_v10 }
 0x269   :  { %3254 = vmatpush.msra.mxu0 %v2643_v44  ;;  %v4709_v34 = vpop.f32.mrf.mxu1 }
 0x26b   :  { %3255 = vmatpush.msra.mxu0 %v2611_v15  ;;  %v3054_v31 = vpop.f32.mrf.mxu3  ;;  %v4717_v7 = vpop.f32.mrf.mxu0 }
 0x26c   :  { %v3472_v52 = vadd.f32 %v3054_v31, %v4531_v37  ;;  %v2647_v37 = vld [vmem:[#allocation9 + $0x2e0] sm:$0xff] }
 0x26d   :  { %3256 = vmatpush.msra.mxu0 %v2579_v11  ;;  %v3031_v36 = vpop.f32.mrf.mxu2 }
 0x26e   :  { %3607 = vmatmul.msk.f32.gmra.mxu0 %vm88_vm0, %v4689_v49  ;;  %3616 = vmatmul.msk.f32.vlgmr.msrb.gmra.mxu1 %vm88_vm0, %v4672_v3  ;;  %3536 = vst [vmem:[#allocation12 + $0x178] sm:$0xff] %v3472_v52  ;;  %v3471_v45 = vadd.f32 %v3031_v36, %v4535_v43 }
 0x26f   :  { %3368 = vmatpush.msrb.mxu1 %v2680_v54 }
 0x270   :  { %3535 = vst [vmem:[#allocation12 + $0x170] sm:$0xff] %v3471_v45 }
 0x271   :  { %3369 = vmatpush.msrb.mxu1 %v2648_v16  ;;  %v4724_v43 = vpop.f32.mrf.mxu1 }
 0x273   :  { %3370 = vmatpush.msrb.mxu1 %v2616_v57  ;;  %v3143_v60 = vpop.f32.mrf.mxu3  ;;  %v4731_v40 = vpop.f32.mrf.mxu0 }
 0x274   :  { %v3444_v48 = vadd.f32 %v3143_v60, %v4540_v18 }
 0x275   :  { %3371 = vmatpush.msrb.mxu1 %v2584_v46  ;;  %v3120_v2 = vpop.f32.mrf.mxu2 }
 0x276   :  { %3614 = vmatmul.msk.f32.vlgmr.msrb.gmra.mxu0 %vm88_vm0, %v4672_v3  ;;  %3617 = vmatmul.msk.f32.gmra.mxu1 %vm88_vm0, %v4689_v49  ;;  %3508 = vst [vmem:[#allocation12 + $0x98] sm:$0xff] %v3444_v48  ;;  %v3443_v51 = vadd.f32 %v3120_v2, %v4547_v41  ;;  %v2522_v2 = vld [vmem:[#allocation12 + $0x108] sm:$0xff] }
 0x277   :  { %3345 = vmatpush.msrb.mxu0 %v2679_v53 }
 0x278   :  { %3507 = vst [vmem:[#allocation12 + $0x90] sm:$0xff] %v3443_v51 }
 0x279   :  { %3346 = vmatpush.msrb.mxu0 %v2647_v37  ;;  %v4734_v4 = vpop.f32.mrf.mxu1  ;;  %v2489_v37 = vld [vmem:[#allocation12] sm:$0xff] }
 0x27b   :  { %3347 = vmatpush.msrb.mxu0 %v2615_v20  ;;  %v3146_v18 = vpop.f32.mrf.mxu3  ;;  %v4742_v15 = vpop.f32.mrf.mxu0 }
 0x27c   :  { %v3476_v38 = vadd.f32 %v3146_v18, %v4553_v24 }
 0x27d   :  { %3348 = vmatpush.msrb.mxu0 %v2583_v13  ;;  %v3123_v9 = vpop.f32.mrf.mxu2 }
 0x27e   :  { %3615 = vmatmul.msk.f32.gmra.mxu0 %vm88_vm0, %v4689_v49  ;;  %3624 = vmatmul.msk.f32.vlgmr.msra.gmra.mxu1 %vm88_vm0, %v4672_v3  ;;  %3540 = vst [vmem:[#allocation12 + $0x198] sm:$0xff] %v3476_v38  ;;  %v3475_v41 = vadd.f32 %v3123_v9, %v4557_v42  ;;  %v2521_v38 = vld [vmem:[#allocation12 + $0x100] sm:$0xff] }
 0x280   :  { %3539 = vst [vmem:[#allocation12 + $0x190] sm:$0xff] %v3475_v41 }
 0x283   :  { %v3235_v44 = vpop.f32.mrf.mxu3 }
 0x284   :  { %v3448_v55 = vadd.f32 %v3235_v44, %v4565_v1 }
 0x285   :  { %v3212_v25 = vpop.f32.mrf.mxu2 }
 0x286   :  { %3622 = vmatmul.msk.f32.vlgmr.msra.gmra.mxu0 %vm88_vm0, %v4672_v3  ;;  %3625 = vmatmul.msk.f32.gmra.mxu1 %vm88_vm0, %v4689_v49  ;;  %3512 = vst [vmem:[#allocation12 + $0xb8] sm:$0xff] %v3448_v55  ;;  %v3447_v24 = vadd.f32 %v3212_v25, %v4568_v17 }
 0x288   :  { %3511 = vst [vmem:[#allocation12 + $0xb0] sm:$0xff] %v3447_v24 }
 0x28b   :  { %v4745_v10 = vpop.f32.mrf.mxu1  ;;  %v3238_v42 = vpop.f32.mrf.mxu3 }
 0x28c   :  { %v3480_v11 = vadd.f32 %v3238_v42, %v4575_v0  ;;  %v2493_v42 = vld [vmem:[#allocation12 + $0x20] sm:$0xff] }
 0x28d   :  { %v3215_v54 = vpop.f32.mrf.mxu2 }
 0x28e   :  { %3623 = vmatmul.msk.f32.gmra.mxu0 %vm88_vm0, %v4689_v49  ;;  %3632 = vmatmul.msk.f32.vlgmr.msrb.gmra.mxu1 %vm88_vm0, %v4672_v3  ;;  %3544 = vst [vmem:[#allocation12 + $0x1b8] sm:$0xff] %v3480_v11  ;;  %v3479_v1 = vadd.f32 %v3215_v54, %v4577_v32  ;;  %v2490_v32 = vld [vmem:[#allocation12 + $0x8] sm:$0xff] }
 0x290   :  { %3543 = vst [vmem:[#allocation12 + $0x1b0] sm:$0xff] %v3479_v1 }
 0x293   :  { %v4753_v31 = vpop.f32.mrf.mxu0  ;;  %v4755_v17 = vpop.f32.mrf.mxu1 }
 0x294   :  { %v3327_v52 = vpop.f32.mrf.mxu3 }
 0x295   :  { %v3452_v16 = vadd.f32 %v3327_v52, %v4584_v12  ;;  %v3304_v36 = vpop.f32.mrf.mxu2 }
 0x296   :  { %3630 = vmatmul.msk.f32.vlgmr.msrb.gmra.mxu0 %vm88_vm0, %v4672_v3  ;;  %3633 = vmatmul.msk.f32.gmra.mxu1 %vm88_vm0, %v4689_v49  ;;  %v3451_v0 = vadd.f32 %v3304_v36, %v4588_v62 }
 0x297   :  { %3516 = vst [vmem:[#allocation12 + $0xd8] sm:$0xff] %v3452_v16 }
 0x298   :  { %3515 = vst [vmem:[#allocation12 + $0xd0] sm:$0xff] %v3451_v0 }
 0x29b   :  { %v4763_v45 = vpop.f32.mrf.mxu0  ;;  %v2729_v57 = vpop.f32.mrf.mxu1 }
 0x29c   :  { %v3426_v46 = vadd.f32 %v2729_v57, %v2490_v32  ;;  %v3330_v3 = vpop.f32.mrf.mxu3 }
 0x29d   :  { %v3484_v53 = vadd.f32 %v3330_v3, %v4598_v19  ;;  %v3307_v60 = vpop.f32.mrf.mxu2 }
 0x29e   :  { %3631 = vmatmul.msk.f32.gmra.mxu0 %vm88_vm0, %v4689_v49  ;;  %3490 = vst [vmem:[#allocation12 + $0x8] sm:$0xff] %v3426_v46  ;;  %v3483_v12 = vadd.f32 %v3307_v60, %v4603_v29 }
 0x29f   :  { %3548 = vst [vmem:[#allocation12 + $0x1d8] sm:$0xff] %v3484_v53 }
 0x2a0   :  { %3547 = vst [vmem:[#allocation12 + $0x1d0] sm:$0xff] %v3483_v12 }
 0x2a3   :  { %v2706_v48 = vpop.f32.mrf.mxu0  ;;  %v2732_v20 = vpop.f32.mrf.mxu1 }
 0x2a4   :  { %v3425_v62 = vadd.f32 %v2706_v48, %v2489_v37  ;;  %v3458_v51 = vadd.f32 %v2732_v20, %v2522_v2  ;;  %v3419_v13 = vpop.f32.mrf.mxu3 }
 0x2a5   :  { %v3456_v49 = vadd.f32 %v3419_v13, %v4611_v33  ;;  %v3396_v18 = vpop.f32.mrf.mxu2 }
 0x2a6   :  { %3489 = vst [vmem:[#allocation12] sm:$0xff] %v3425_v62  ;;  %v3455_v19 = vadd.f32 %v3396_v18, %v4619_v61 }
 0x2a7   :  { %3522 = vst [vmem:[#allocation12 + $0x108] sm:$0xff] %v3458_v51 }
 0x2a8   :  { %3520 = vst [vmem:[#allocation12 + $0xf8] sm:$0xff] %v3456_v49 }
 0x2a9   :  { %3519 = vst [vmem:[#allocation12 + $0xf0] sm:$0xff] %v3455_v19 }
 0x2ab   :  { %v2709_v9 = vpop.f32.mrf.mxu0  ;;  %v2821_v41 = vpop.f32.mrf.mxu1 }
 0x2ac   :  { %v3457_v29 = vadd.f32 %v2709_v9, %v2521_v38  ;;  %v3430_v44 = vadd.f32 %v2821_v41, %v4594_v21  ;;  %v3422_v55 = vpop.f32.mrf.mxu3 }
 0x2ad   :  { %v3488_v25 = vadd.f32 %v3422_v55, %v4625_v56  ;;  %v3399_v24 = vpop.f32.mrf.mxu2 }
 0x2ae   :  { %3521 = vst [vmem:[#allocation12 + $0x100] sm:$0xff] %v3457_v29  ;;  %v3487_v33 = vadd.f32 %v3399_v24, %v4635_v8 }
 0x2af   :  { %3494 = vst [vmem:[#allocation12 + $0x28] sm:$0xff] %v3430_v44 }
 0x2b0   :  { %3552 = vst [vmem:[#allocation12 + $0x1f8] sm:$0xff] %v3488_v25 }
 0x2b1   :  { %3551 = vst [vmem:[#allocation12 + $0x1f0] sm:$0xff] %v3487_v33 }
 0x2b3   :  { %v2798_v11 = vpop.f32.mrf.mxu0  ;;  %v2824_v54 = vpop.f32.mrf.mxu1 }
 0x2b4   :  { %v3429_v61 = vadd.f32 %v2798_v11, %v2493_v42  ;;  %v3462_v1 = vadd.f32 %v2824_v54, %v4607_v30 }
 0x2b6   :  { %3493 = vst [vmem:[#allocation12 + $0x20] sm:$0xff] %v3429_v61 }
 0x2b7   :  { %3526 = vst [vmem:[#allocation12 + $0x128] sm:$0xff] %v3462_v1 }
 0x2bb   :  { %v2801_v52 = vpop.f32.mrf.mxu0  ;;  %v2913_v16 = vpop.f32.mrf.mxu1 }
 0x2bc   :  { %v3461_v21 = vadd.f32 %v2801_v52, %v4621_v39  ;;  %v3434_v36 = vadd.f32 %v2913_v16, %v4627_v35 }
 0x2be   :  { %3525 = vst [vmem:[#allocation12 + $0x120] sm:$0xff] %v3461_v21 }
 0x2bf   :  { %3498 = vst [vmem:[#allocation12 + $0x48] sm:$0xff] %v3434_v36 }
 0x2c3   :  { %v2890_v56 = vpop.f32.mrf.mxu0  ;;  %v2916_v0 = vpop.f32.mrf.mxu1 }
 0x2c4   :  { %v3433_v8 = vadd.f32 %v2890_v56, %v4637_v50  ;;  %v3466_v32 = vadd.f32 %v2916_v0, %v4639_v58 }
 0x2c6   :  { %3497 = vst [vmem:[#allocation12 + $0x40] sm:$0xff] %v3433_v8 }
 0x2c7   :  { %3530 = vst [vmem:[#allocation12 + $0x148] sm:$0xff] %v3466_v32 }
 0x2cb   :  { %v2893_v57 = vpop.f32.mrf.mxu0  ;;  %v3005_v46 = vpop.f32.mrf.mxu1 }
 0x2cc   :  { %v3465_v30 = vadd.f32 %v2893_v57, %v4647_v27  ;;  %v3438_v3 = vadd.f32 %v3005_v46, %v4654_v23 }
 0x2ce   :  { %3529 = vst [vmem:[#allocation12 + $0x140] sm:$0xff] %v3465_v30 }
 0x2cf   :  { %3502 = vst [vmem:[#allocation12 + $0x68] sm:$0xff] %v3438_v3 }
 0x2d3   :  { %v2982_v39 = vpop.f32.mrf.mxu0  ;;  %v3008_v53 = vpop.f32.mrf.mxu1 }
 0x2d4   :  { %v3437_v35 = vadd.f32 %v2982_v39, %v4659_v63  ;;  %v3470_v60 = vadd.f32 %v3008_v53, %v4664_v14 }
 0x2d6   :  { %3501 = vst [vmem:[#allocation12 + $0x60] sm:$0xff] %v3437_v35 }
 0x2d7   :  { %3534 = vst [vmem:[#allocation12 + $0x168] sm:$0xff] %v3470_v60 }
 0x2db   :  { %v2985_v50 = vpop.f32.mrf.mxu0  ;;  %v3097_v12 = vpop.f32.mrf.mxu1 }
 0x2dc   :  { %v3469_v58 = vadd.f32 %v2985_v50, %v4669_v5  ;;  %v3442_v37 = vadd.f32 %v3097_v12, %v4677_v26 }
 0x2de   :  { %3533 = vst [vmem:[#allocation12 + $0x160] sm:$0xff] %v3469_v58 }
 0x2df   :  { %3506 = vst [vmem:[#allocation12 + $0x88] sm:$0xff] %v3442_v37 }
 0x2e3   :  { %v3074_v27 = vpop.f32.mrf.mxu0  ;;  %v3100_v48 = vpop.f32.mrf.mxu1 }
 0x2e4   :  { %v3441_v23 = vadd.f32 %v3074_v27, %v4684_v47  ;;  %v3474_v62 = vadd.f32 %v3100_v48, %v4687_v59 }
 0x2e6   :  { %3505 = vst [vmem:[#allocation12 + $0x80] sm:$0xff] %v3441_v23 }
 0x2e7   :  { %3538 = vst [vmem:[#allocation12 + $0x188] sm:$0xff] %v3474_v62 }
 0x2eb   :  { %v3077_v63 = vpop.f32.mrf.mxu0  ;;  %v3189_v2 = vpop.f32.mrf.mxu1 }
 0x2ec   :  { %v3473_v14 = vadd.f32 %v3077_v63, %v4697_v6  ;;  %v3446_v20 = vadd.f32 %v3189_v2, %v4699_v28 }
 0x2ee   :  { %3537 = vst [vmem:[#allocation12 + $0x180] sm:$0xff] %v3473_v14 }
 0x2ef   :  { %3510 = vst [vmem:[#allocation12 + $0xa8] sm:$0xff] %v3446_v20 }
 0x2f3   :  { %v3166_v5 = vpop.f32.mrf.mxu0  ;;  %v3192_v51 = vpop.f32.mrf.mxu1 }
 0x2f4   :  { %v3445_v26 = vadd.f32 %v3166_v5, %v4707_v22  ;;  %v3478_v13 = vadd.f32 %v3192_v51, %v4709_v34 }
 0x2f6   :  { %3509 = vst [vmem:[#allocation12 + $0xa0] sm:$0xff] %v3445_v26 }
 0x2f7   :  { %3542 = vst [vmem:[#allocation12 + $0x1a8] sm:$0xff] %v3478_v13 }
 0x2fb   :  { %v3169_v47 = vpop.f32.mrf.mxu0  ;;  %v3281_v49 = vpop.f32.mrf.mxu1 }
 0x2fc   :  { %v3477_v59 = vadd.f32 %v3169_v47, %v4717_v7  ;;  %v3450_v18 = vadd.f32 %v3281_v49, %v4724_v43 }
 0x2fe   :  { %3541 = vst [vmem:[#allocation12 + $0x1a0] sm:$0xff] %v3477_v59 }
 0x2ff   :  { %3514 = vst [vmem:[#allocation12 + $0xc8] sm:$0xff] %v3450_v18 }
 0x303   :  { %v3258_v6 = vpop.f32.mrf.mxu0  ;;  %v3284_v19 = vpop.f32.mrf.mxu1 }
 0x304   :  { %v3449_v28 = vadd.f32 %v3258_v6, %v4731_v40  ;;  %v3482_v38 = vadd.f32 %v3284_v19, %v4734_v4 }
 0x306   :  { %3513 = vst [vmem:[#allocation12 + $0xc0] sm:$0xff] %v3449_v28 }
 0x307   :  { %3546 = vst [vmem:[#allocation12 + $0x1c8] sm:$0xff] %v3482_v38 }
 0x30b   :  { %v3261_v22 = vpop.f32.mrf.mxu0  ;;  %v3373_v9 = vpop.f32.mrf.mxu1 }
 0x30c   :  { %v3481_v34 = vadd.f32 %v3261_v22, %v4742_v15  ;;  %v3454_v29 = vadd.f32 %v3373_v9, %v4745_v10 }
 0x30e   :  { %3545 = vst [vmem:[#allocation12 + $0x1c0] sm:$0xff] %v3481_v34 }
 0x30f   :  { %3518 = vst [vmem:[#allocation12 + $0xe8] sm:$0xff] %v3454_v29 }
 0x313   :  { %v3350_v7 = vpop.f32.mrf.mxu0  ;;  %v3376_v41 = vpop.f32.mrf.mxu1 }
 0x314   :  { %v3453_v43 = vadd.f32 %v3350_v7, %v4753_v31  ;;  %v3486_v44 = vadd.f32 %v3376_v41, %v4755_v17 }
 0x316   :  { %3517 = vst [vmem:[#allocation12 + $0xe0] sm:$0xff] %v3453_v43 }
 0x317   :  { %3550 = vst [vmem:[#allocation12 + $0x1e8] sm:$0xff] %v3486_v44 }
 0x31b   :  { %v3353_v40 = vpop.f32.mrf.mxu0 }
 0x31c   :  { %v3485_v4 = vadd.f32 %v3353_v40, %v4763_v45 }
 0x31e   :  { %3549 = vst [vmem:[#allocation12 + $0x1e0] sm:$0xff] %v3485_v4 }
 0x31f   :  { %3565 = dma.vmem_to_hbm [thread:$0]  %s3558_s18, 8192, %s3560_s21, [#allocation6], %s3783_s26, %s3783_s26, %s3784_s27  }
 0x320   :  { %3780 = dma.done.wait [#allocation6], 8192  }
 0x321   :  { %3781 = vsyncadd [#allocation6], 4294959104 }
 0x322   :  { %3570 = vsyncpa [#allocation5], 1 }
 0x323   :  { %3571 = vsyncpa [#allocation8], 1 }
 0x324   :  { %3572 = vsyncpa [#allocation11], 1 }
 0x325   :  { %3573 = vsyncpa [#allocation6], 1 }

</bundles_post_ra>
